<compile_context>
chip_gen: v6e
topology: v6e:2x2x1
jax: 0.10.0
libtpu: 0.0.40
codegen_flags: <defaults>
</compile_context>

<pallas_src>
import math
import jax
import jax.numpy as jnp
from jax import lax
from jax.experimental import pallas as pl
from jax.experimental.pallas import tpu as pltpu

LANE = 128  # per-gate / per-hidden lane padding: one full vreg lane block


def _gru_bp_kernel(x_ref,                                    # (T*B, D)   bf16, time-major
                   wih0_ref,                                 # (D, 3P)    bf16
                   whh0_ref, wih1_ref, whh1_ref,             # (P, 3P)    bf16
                   bih0_ref, bhh0_ref, bih1_ref, bhh1_ref,   # (1, 3P)    f32
                   fc1w_ref, fc1b_ref,                       # (P, M) bf16, (1, M) f32
                   bn_scale_ref, bn_shift_ref,               # (1, M)     f32 (folded BN)
                   fc2w_ref, fc2b_ref,                       # (M, O) bf16, (1, O) f32
                   out_ref,                                  # (B, O)     f32
                   gx0_scr):                                 # VMEM scratch (T*B, 3P) f32
    B = out_ref.shape[0]
    TB = x_ref.shape[0]
    T = TB // B
    P = whh0_ref.shape[0]
    G = 3 * P

    # ---- hoisted layer-0 input projection: one (T*B,D)x(D,3P) matmul, bias added once ----
    gx0_scr[...] = (jnp.dot(x_ref[...], wih0_ref[...],
                            preferred_element_type=jnp.float32) + bih0_ref[...])

    # ---- pre-broadcast per-step biases once (JAX does not CSE broadcast_in_dim in a loop) ----
    bhh0 = jnp.broadcast_to(bhh0_ref[...], (B, G))
    bih1 = jnp.broadcast_to(bih1_ref[...], (B, G))
    bhh1 = jnp.broadcast_to(bhh1_ref[...], (B, G))

    def gru_gates(gx, gh, h):
        # PyTorch gate order (r, z, n); every gate sits in its own 128-lane block, so all
        # slices are vreg-aligned and all paired operands share lane offsets (no XLU rotate).
        #   r,z = sigmoid(gx_rz + gh_rz)
        #   n   = tanh(gx_n + r * gh_n)        (b_hh is inside the r-term via gh)
        #   h'  = (1 - z) * n + z * h
        rz = jax.nn.sigmoid(gx[:, :2 * P] + gh[:, :2 * P])
        r = rz[:, :P]
        z = rz[:, P:]
        n = jnp.tanh(gx[:, 2 * P:] + r * gh[:, 2 * P:])
        return n + z * (h - n)

    h0 = jnp.zeros((B, P), jnp.float32)   # padded lanes stay exactly 0 for all t
    h1 = jnp.zeros((B, P), jnp.float32)

    # T is a compile-time constant -> full unroll; the two recurrent dots of step t and the
    # hoisted gx0 slice are all independent of layer-0's nonlinearity, maximizing overlap.
    # TODO(synk): whh0/whh1/wih1 could be pinned in MXU weight registers with
    #             pltpu.matmul_push_rhs / matmul_acc_lhs across steps; kept on jnp.dot for
    #             lowering robustness.
    for t in range(T):
        # Both recurrent projections depend only on t-1 state -> off the critical path.
        h0b = h0.astype(jnp.bfloat16)
        h1b = h1.astype(jnp.bfloat16)
        gh0 = jnp.dot(h0b, whh0_ref[...], preferred_element_type=jnp.float32) + bhh0
        gh1 = jnp.dot(h1b, whh1_ref[...], preferred_element_type=jnp.float32) + bhh1

        gx0_t = gx0_scr[pl.ds(t * B, B), :]          # static, sublane-aligned 8-row block
        h0 = gru_gates(gx0_t, gh0, h0)

        # Layer 1: only the h0_t-dependent input projection remains on the serial chain.
        gx1 = jnp.dot(h0.astype(jnp.bfloat16), wih1_ref[...],
                      preferred_element_type=jnp.float32) + bih1
        h1 = gru_gates(gx1, gh1, h1)

    # ---- head: fc1 + SiLU -> folded BatchNorm1d (eval stats) -> Dropout(identity) -> fc2 ----
    y = jnp.dot(h1.astype(jnp.bfloat16), fc1w_ref[...],
                preferred_element_type=jnp.float32) + fc1b_ref[...]
    y = y * jax.nn.sigmoid(y)                                  # SiLU
    y = y * bn_scale_ref[...] + bn_shift_ref[...]              # BN folded to one FMA
    # Dropout: identity in eval mode.
    # TODO(synk): train-mode stochastic Dropout / batch-stat BatchNorm not reproduced (eval only).
    out = jnp.dot(y.astype(jnp.bfloat16), fc2w_ref[...],
                  preferred_element_type=jnp.float32) + fc2b_ref[...]
    out_ref[...] = out.astype(out_ref.dtype)


def _pad_gate_cols(w, H, P):
    """(K, 3H) -> (K, 3P): gate g's columns placed at lanes [g*P, g*P+H); rest zero."""
    K = w.shape[0]
    out = jnp.zeros((K, 3 * P), w.dtype)
    for g in range(3):
        out = out.at[:, g * P:g * P + H].set(w[:, g * H:(g + 1) * H])
    return out


def _pad_rows(w, P):
    """(K, N) -> (P, N): zero-pad rows (matches the zero-padded lanes of the hidden state)."""
    K, N = w.shape
    return jnp.zeros((P, N), w.dtype).at[:K, :].set(w)


def gru_bp_forward(x, params):
    """x: (B, T, D) float32 (batch_first, like the PyTorch module). Returns (B, O) float32."""
    B, T, D = x.shape
    H = params["whh0"].shape[0]
    O = params["fc2w"].shape[1]
    P = LANE
    bf = jnp.bfloat16

    # Time-major flatten: each timestep becomes a contiguous 8-row (sublane-aligned) block.
    # bf16 MXU operands; accumulation stays f32 inside the kernel.
    x_tm = jnp.transpose(x, (1, 0, 2)).reshape(T * B, D).astype(bf)

    # Gate-padded (one 128-lane block per gate) / row-padded weights, cast once to bf16.
    wih0 = _pad_gate_cols(params["wih0"], H, P).astype(bf)                   # (D, 3P)
    whh0 = _pad_rows(_pad_gate_cols(params["whh0"], H, P), P).astype(bf)     # (P, 3P)
    wih1 = _pad_rows(_pad_gate_cols(params["wih1"], H, P), P).astype(bf)     # (P, 3P)
    whh1 = _pad_rows(_pad_gate_cols(params["whh1"], H, P), P).astype(bf)     # (P, 3P)
    bih0 = _pad_gate_cols(params["bih0"], H, P)                              # (1, 3P) f32
    bhh0 = _pad_gate_cols(params["bhh0"], H, P)
    bih1 = _pad_gate_cols(params["bih1"], H, P)
    bhh1 = _pad_gate_cols(params["bhh1"], H, P)

    fc1w = _pad_rows(params["fc1w"], P).astype(bf)                           # (P, M)
    fc1b = params["fc1b"]
    fc2w = params["fc2w"].astype(bf)                                         # (M, O)
    fc2b = params["fc2b"]

    # Fold eval-mode BatchNorm1d into a single multiply-add.
    eps = 1e-5
    bn_scale = params["bn_gamma"] * lax.rsqrt(params["bn_var"] + eps)
    bn_shift = params["bn_beta"] - params["bn_mean"] * bn_scale

    inputs = (x_tm, wih0, whh0, wih1, whh1, bih0, bhh0, bih1, bhh1,
              fc1w, fc1b, bn_scale, bn_shift, fc2w, fc2b)

    vmem = pl.BlockSpec(memory_space=pltpu.MemorySpace.VMEM)
    return pl.pallas_call(
        _gru_bp_kernel,
        out_shape=jax.ShapeDtypeStruct((B, O), jnp.float32),
        in_specs=[vmem] * len(inputs),
        out_specs=vmem,
        scratch_shapes=[pltpu.VMEM((T * B, 3 * P), jnp.float32)],
        # Total footprint ~0.6 MiB: default scoped-VMEM budget is plenty.
        # TODO(synk): for large B add a batch grid with dimension_semantics=("parallel",)
        #             (v7x megacore) and tile the hoisted projection; unnecessary at B=8.
    )(*inputs)


def init_params(key, input_dim, gru_hidden_dim, mlp_hidden_dim, output_dim):
    """Deterministic PyTorch-style uniform init.  Weight matrices stored transposed as
    (in_features, out_features); biases / BN params as (1, N) rows.  Unpadded / f32 —
    padding, bf16 casts, and BN folding happen in gru_bp_forward."""
    ks = jax.random.split(key, 16)
    kH = 1.0 / math.sqrt(gru_hidden_dim)

    def u(k, shape, bound):
        return jax.random.uniform(k, shape, jnp.float32, -bound, bound)

    p = {
        # GRU layer 0: weight_ih (3H, D) stored transposed (D, 3H); gate order (r, z, n)
        "wih0": u(ks[0], (input_dim, 3 * gru_hidden_dim), kH),
        "whh0": u(ks[1], (gru_hidden_dim, 3 * gru_hidden_dim), kH),
        "bih0": u(ks[2], (1, 3 * gru_hidden_dim), kH),
        "bhh0": u(ks[3], (1, 3 * gru_hidden_dim), kH),
        # GRU layer 1 (input is H)
        "wih1": u(ks[4], (gru_hidden_dim, 3 * gru_hidden_dim), kH),
        "whh1": u(ks[5], (gru_hidden_dim, 3 * gru_hidden_dim), kH),
        "bih1": u(ks[6], (1, 3 * gru_hidden_dim), kH),
        "bhh1": u(ks[7], (1, 3 * gru_hidden_dim), kH),
    }
    k1 = 1.0 / math.sqrt(gru_hidden_dim)
    p["fc1w"] = u(ks[8], (gru_hidden_dim, mlp_hidden_dim), k1)
    p["fc1b"] = u(ks[9], (1, mlp_hidden_dim), k1)
    k2 = 1.0 / math.sqrt(mlp_hidden_dim)
    p["fc2w"] = u(ks[10], (mlp_hidden_dim, output_dim), k2)
    p["fc2b"] = u(ks[11], (1, output_dim), k2)
    # BatchNorm1d defaults (running stats)
    p["bn_gamma"] = jnp.ones((1, mlp_hidden_dim), jnp.float32)
    p["bn_beta"] = jnp.zeros((1, mlp_hidden_dim), jnp.float32)
    p["bn_mean"] = jnp.zeros((1, mlp_hidden_dim), jnp.float32)
    p["bn_var"] = jnp.ones((1, mlp_hidden_dim), jnp.float32)
    return p


if __name__ == "__main__":
    B, T, D = 8, 8, 16          # batch, sequence length, input_dim
    H, M, O = 32, 32, 4         # gru_hidden_dim, mlp_hidden_dim, output_dim

    key = jax.random.PRNGKey(0)
    kx, kp = jax.random.split(key)
    x = jax.random.normal(kx, (B, T, D), dtype=jnp.float32)
    params = init_params(kp, D, H, M, O)

    out = gru_bp_forward(x, params)
    jax.block_until_ready(out)
    assert out.shape == (B, O) and out.dtype == jnp.float32
    print("KERNEL_OK")
</pallas_src>

<mosaic_0001>
module attributes {stable_mosaic.version = 11 : i64} {
  func.func @_gru_bp_kernel(%arg0: memref<64x16xbf16, #tpu.memory_space<vmem>>, %arg1: memref<16x384xbf16, #tpu.memory_space<vmem>>, %arg2: memref<128x384xbf16, #tpu.memory_space<vmem>>, %arg3: memref<128x384xbf16, #tpu.memory_space<vmem>>, %arg4: memref<128x384xbf16, #tpu.memory_space<vmem>>, %arg5: memref<1x384xf32, #tpu.memory_space<vmem>>, %arg6: memref<1x384xf32, #tpu.memory_space<vmem>>, %arg7: memref<1x384xf32, #tpu.memory_space<vmem>>, %arg8: memref<1x384xf32, #tpu.memory_space<vmem>>, %arg9: memref<128x32xbf16, #tpu.memory_space<vmem>>, %arg10: memref<1x32xf32, #tpu.memory_space<vmem>>, %arg11: memref<1x32xf32, #tpu.memory_space<vmem>>, %arg12: memref<1x32xf32, #tpu.memory_space<vmem>>, %arg13: memref<32x4xbf16, #tpu.memory_space<vmem>>, %arg14: memref<1x4xf32, #tpu.memory_space<vmem>>, %arg15: memref<8x4xf32, #tpu.memory_space<vmem>>, %arg16: memref<64x384xf32, #tpu.memory_space<vmem>>) attributes {dimension_semantics = [], scalar_prefetch = 0 : i64, scratch_operands = 1 : i64, tpu.core_type = #tpu.core_type<tc>} {
    %c0 = arith.constant 0 : index
    %c0_0 = arith.constant 0 : index
    %0 = vector.load %arg0[%c0, %c0_0] : memref<64x16xbf16, #tpu.memory_space<vmem>>, vector<64x16xbf16>
    %c0_1 = arith.constant 0 : index
    %c0_2 = arith.constant 0 : index
    %1 = vector.load %arg1[%c0_1, %c0_2] : memref<16x384xbf16, #tpu.memory_space<vmem>>, vector<16x384xbf16>
    %cst = arith.constant dense<0.000000e+00> : vector<64x384xf32>
    %2 = tpu.matmul %0, %1, %cst {dimension_numbers = #tpu.dot_dimension_numbers<[1], [0], [0], [1], [0, 0, 1, 1], [], []>} : vector<64x16xbf16>, vector<16x384xbf16>, vector<64x384xf32> -> vector<64x384xf32>
    %c0_3 = arith.constant 0 : index
    %c0_4 = arith.constant 0 : index
    %3 = vector.load %arg5[%c0_3, %c0_4] : memref<1x384xf32, #tpu.memory_space<vmem>>, vector<1x384xf32>
    %4 = vector.broadcast %3 : vector<1x384xf32> to vector<64x384xf32>
    %5 = arith.addf %2, %4 : vector<64x384xf32>
    %c0_5 = arith.constant 0 : index
    %c0_6 = arith.constant 0 : index
    %6 = vector.load %arg16[%c0_5, %c0_6] : memref<64x384xf32, #tpu.memory_space<vmem>>, vector<64x384xf32>
    tpu.vector_store %arg16[%c0_5, %c0_6], %5 {strides = array<i32>} : memref<64x384xf32, #tpu.memory_space<vmem>>, vector<64x384xf32>,
    %c0_7 = arith.constant 0 : index
    %c0_8 = arith.constant 0 : index
    %7 = vector.load %arg6[%c0_7, %c0_8] : memref<1x384xf32, #tpu.memory_space<vmem>>, vector<1x384xf32>
    %8 = vector.shape_cast %7 : vector<1x384xf32> to vector<1x384xf32>
    %9 = vector.broadcast %8 : vector<1x384xf32> to vector<8x384xf32>
    %c0_9 = arith.constant 0 : index
    %c0_10 = arith.constant 0 : index
    %10 = vector.load %arg7[%c0_9, %c0_10] : memref<1x384xf32, #tpu.memory_space<vmem>>, vector<1x384xf32>
    %11 = vector.shape_cast %10 : vector<1x384xf32> to vector<1x384xf32>
    %12 = vector.broadcast %11 : vector<1x384xf32> to vector<8x384xf32>
    %c0_11 = arith.constant 0 : index
    %c0_12 = arith.constant 0 : index
    %13 = vector.load %arg8[%c0_11, %c0_12] : memref<1x384xf32, #tpu.memory_space<vmem>>, vector<1x384xf32>
    %14 = vector.shape_cast %13 : vector<1x384xf32> to vector<1x384xf32>
    %15 = vector.broadcast %14 : vector<1x384xf32> to vector<8x384xf32>
    %cst_13 = arith.constant 0.000000e+00 : f32
    %16 = vector.broadcast %cst_13 : f32 to vector<8x128xf32>
    %cst_14 = arith.constant 0.000000e+00 : f32
    %17 = vector.broadcast %cst_14 : f32 to vector<8x128xf32>
    %18 = arith.truncf %16 : vector<8x128xf32> to vector<8x128xbf16>
    %19 = arith.truncf %17 : vector<8x128xf32> to vector<8x128xbf16>
    %c0_15 = arith.constant 0 : index
    %c0_16 = arith.constant 0 : index
    %20 = vector.load %arg2[%c0_15, %c0_16] : memref<128x384xbf16, #tpu.memory_space<vmem>>, vector<128x384xbf16>
    %cst_17 = arith.constant dense<0.000000e+00> : vector<8x384xf32>
    %21 = tpu.matmul %18, %20, %cst_17 {dimension_numbers = #tpu.dot_dimension_numbers<[1], [0], [0], [1], [0, 0, 1, 1], [], []>} : vector<8x128xbf16>, vector<128x384xbf16>, vector<8x384xf32> -> vector<8x384xf32>
    %22 = arith.addf %21, %9 : vector<8x384xf32>
    %c0_18 = arith.constant 0 : index
    %c0_19 = arith.constant 0 : index
    %23 = vector.load %arg4[%c0_18, %c0_19] : memref<128x384xbf16, #tpu.memory_space<vmem>>, vector<128x384xbf16>
    %cst_20 = arith.constant dense<0.000000e+00> : vector<8x384xf32>
    %24 = tpu.matmul %19, %23, %cst_20 {dimension_numbers = #tpu.dot_dimension_numbers<[1], [0], [0], [1], [0, 0, 1, 1], [], []>} : vector<8x128xbf16>, vector<128x384xbf16>, vector<8x384xf32> -> vector<8x384xf32>
    %25 = arith.addf %24, %15 : vector<8x384xf32>
    %c0_21 = arith.constant 0 : index
    %c0_22 = arith.constant 0 : index
    %26 = vector.load %arg16[%c0_21, %c0_22] : memref<64x384xf32, #tpu.memory_space<vmem>>, vector<8x384xf32>
    %27 = vector.extract_strided_slice %26 {offsets = [0, 0], sizes = [8, 256], strides = [1, 1]} : vector<8x384xf32> to vector<8x256xf32>
    %28 = vector.extract_strided_slice %22 {offsets = [0, 0], sizes = [8, 256], strides = [1, 1]} : vector<8x384xf32> to vector<8x256xf32>
    %29 = arith.addf %27, %28 : vector<8x256xf32>
    %30 = arith.negf %29 : vector<8x256xf32>
    %31 = math.exp %30 : vector<8x256xf32>
    %cst_23 = arith.constant 1.000000e+00 : f32
    %32 = vector.broadcast %cst_23 : f32 to vector<8x256xf32>
    %33 = arith.addf %32, %31 : vector<8x256xf32>
    %34 = arith.divf %32, %33 : vector<8x256xf32>
    %35 = vector.extract_strided_slice %34 {offsets = [0, 0], sizes = [8, 128], strides = [1, 1]} : vector<8x256xf32> to vector<8x128xf32>
    %36 = vector.extract_strided_slice %34 {offsets = [0, 128], sizes = [8, 128], strides = [1, 1]} : vector<8x256xf32> to vector<8x128xf32>
    %37 = vector.extract_strided_slice %26 {offsets = [0, 256], sizes = [8, 128], strides = [1, 1]} : vector<8x384xf32> to vector<8x128xf32>
    %38 = vector.extract_strided_slice %22 {offsets = [0, 256], sizes = [8, 128], strides = [1, 1]} : vector<8x384xf32> to vector<8x128xf32>
    %39 = arith.mulf %35, %38 : vector<8x128xf32>
    %40 = arith.addf %37, %39 : vector<8x128xf32>
    %41 = math.tanh %40 : vector<8x128xf32>
    %42 = arith.subf %16, %41 : vector<8x128xf32>
    %43 = arith.mulf %36, %42 : vector<8x128xf32>
    %44 = arith.addf %41, %43 : vector<8x128xf32>
    %45 = arith.truncf %44 : vector<8x128xf32> to vector<8x128xbf16>
    %c0_24 = arith.constant 0 : index
    %c0_25 = arith.constant 0 : index
    %46 = vector.load %arg3[%c0_24, %c0_25] : memref<128x384xbf16, #tpu.memory_space<vmem>>, vector<128x384xbf16>
    %cst_26 = arith.constant dense<0.000000e+00> : vector<8x384xf32>
    %47 = tpu.matmul %45, %46, %cst_26 {dimension_numbers = #tpu.dot_dimension_numbers<[1], [0], [0], [1], [0, 0, 1, 1], [], []>} : vector<8x128xbf16>, vector<128x384xbf16>, vector<8x384xf32> -> vector<8x384xf32>
    %48 = arith.addf %47, %12 : vector<8x384xf32>
    %49 = vector.extract_strided_slice %48 {offsets = [0, 0], sizes = [8, 256], strides = [1, 1]} : vector<8x384xf32> to vector<8x256xf32>
    %50 = vector.extract_strided_slice %25 {offsets = [0, 0], sizes = [8, 256], strides = [1, 1]} : vector<8x384xf32> to vector<8x256xf32>
    %51 = arith.addf %49, %50 : vector<8x256xf32>
    %52 = arith.negf %51 : vector<8x256xf32>
    %53 = math.exp %52 : vector<8x256xf32>
    %cst_27 = arith.constant 1.000000e+00 : f32
    %54 = vector.broadcast %cst_27 : f32 to vector<8x256xf32>
    %55 = arith.addf %54, %53 : vector<8x256xf32>
    %56 = arith.divf %54, %55 : vector<8x256xf32>
    %57 = vector.extract_strided_slice %56 {offsets = [0, 0], sizes = [8, 128], strides = [1, 1]} : vector<8x256xf32> to vector<8x128xf32>
    %58 = vector.extract_strided_slice %56 {offsets = [0, 128], sizes = [8, 128], strides = [1, 1]} : vector<8x256xf32> to vector<8x128xf32>
    %59 = vector.extract_strided_slice %48 {offsets = [0, 256], sizes = [8, 128], strides = [1, 1]} : vector<8x384xf32> to vector<8x128xf32>
    %60 = vector.extract_strided_slice %25 {offsets = [0, 256], sizes = [8, 128], strides = [1, 1]} : vector<8x384xf32> to vector<8x128xf32>
    %61 = arith.mulf %57, %60 : vector<8x128xf32>
    %62 = arith.addf %59, %61 : vector<8x128xf32>
    %63 = math.tanh %62 : vector<8x128xf32>
    %64 = arith.subf %17, %63 : vector<8x128xf32>
    %65 = arith.mulf %58, %64 : vector<8x128xf32>
    %66 = arith.addf %63, %65 : vector<8x128xf32>
    %67 = arith.truncf %44 : vector<8x128xf32> to vector<8x128xbf16>
    %68 = arith.truncf %66 : vector<8x128xf32> to vector<8x128xbf16>
    %c0_28 = arith.constant 0 : index
    %c0_29 = arith.constant 0 : index
    %69 = vector.load %arg2[%c0_28, %c0_29] : memref<128x384xbf16, #tpu.memory_space<vmem>>, vector<128x384xbf16>
    %cst_30 = arith.constant dense<0.000000e+00> : vector<8x384xf32>
    %70 = tpu.matmul %67, %69, %cst_30 {dimension_numbers = #tpu.dot_dimension_numbers<[1], [0], [0], [1], [0, 0, 1, 1], [], []>} : vector<8x128xbf16>, vector<128x384xbf16>, vector<8x384xf32> -> vector<8x384xf32>
    %71 = arith.addf %70, %9 : vector<8x384xf32>
    %c0_31 = arith.constant 0 : index
    %c0_32 = arith.constant 0 : index
    %72 = vector.load %arg4[%c0_31, %c0_32] : memref<128x384xbf16, #tpu.memory_space<vmem>>, vector<128x384xbf16>
    %cst_33 = arith.constant dense<0.000000e+00> : vector<8x384xf32>
    %73 = tpu.matmul %68, %72, %cst_33 {dimension_numbers = #tpu.dot_dimension_numbers<[1], [0], [0], [1], [0, 0, 1, 1], [], []>} : vector<8x128xbf16>, vector<128x384xbf16>, vector<8x384xf32> -> vector<8x384xf32>
    %74 = arith.addf %73, %15 : vector<8x384xf32>
    %c8 = arith.constant 8 : index
    %c0_34 = arith.constant 0 : index
    %75 = vector.load %arg16[%c8, %c0_34] : memref<64x384xf32, #tpu.memory_space<vmem>>, vector<8x384xf32>
    %76 = vector.extract_strided_slice %75 {offsets = [0, 0], sizes = [8, 256], strides = [1, 1]} : vector<8x384xf32> to vector<8x256xf32>
    %77 = vector.extract_strided_slice %71 {offsets = [0, 0], sizes = [8, 256], strides = [1, 1]} : vector<8x384xf32> to vector<8x256xf32>
    %78 = arith.addf %76, %77 : vector<8x256xf32>
    %79 = arith.negf %78 : vector<8x256xf32>
    %80 = math.exp %79 : vector<8x256xf32>
    %cst_35 = arith.constant 1.000000e+00 : f32
    %81 = vector.broadcast %cst_35 : f32 to vector<8x256xf32>
    %82 = arith.addf %81, %80 : vector<8x256xf32>
    %83 = arith.divf %81, %82 : vector<8x256xf32>
    %84 = vector.extract_strided_slice %83 {offsets = [0, 0], sizes = [8, 128], strides = [1, 1]} : vector<8x256xf32> to vector<8x128xf32>
    %85 = vector.extract_strided_slice %83 {offsets = [0, 128], sizes = [8, 128], strides = [1, 1]} : vector<8x256xf32> to vector<8x128xf32>
    %86 = vector.extract_strided_slice %75 {offsets = [0, 256], sizes = [8, 128], strides = [1, 1]} : vector<8x384xf32> to vector<8x128xf32>
    %87 = vector.extract_strided_slice %71 {offsets = [0, 256], sizes = [8, 128], strides = [1, 1]} : vector<8x384xf32> to vector<8x128xf32>
    %88 = arith.mulf %84, %87 : vector<8x128xf32>
    %89 = arith.addf %86, %88 : vector<8x128xf32>
    %90 = math.tanh %89 : vector<8x128xf32>
    %91 = arith.subf %44, %90 : vector<8x128xf32>
    %92 = arith.mulf %85, %91 : vector<8x128xf32>
    %93 = arith.addf %90, %92 : vector<8x128xf32>
    %94 = arith.truncf %93 : vector<8x128xf32> to vector<8x128xbf16>
    %c0_36 = arith.constant 0 : index
    %c0_37 = arith.constant 0 : index
    %95 = vector.load %arg3[%c0_36, %c0_37] : memref<128x384xbf16, #tpu.memory_space<vmem>>, vector<128x384xbf16>
    %cst_38 = arith.constant dense<0.000000e+00> : vector<8x384xf32>
    %96 = tpu.matmul %94, %95, %cst_38 {dimension_numbers = #tpu.dot_dimension_numbers<[1], [0], [0], [1], [0, 0, 1, 1], [], []>} : vector<8x128xbf16>, vector<128x384xbf16>, vector<8x384xf32> -> vector<8x384xf32>
    %97 = arith.addf %96, %12 : vector<8x384xf32>
    %98 = vector.extract_strided_slice %97 {offsets = [0, 0], sizes = [8, 256], strides = [1, 1]} : vector<8x384xf32> to vector<8x256xf32>
    %99 = vector.extract_strided_slice %74 {offsets = [0, 0], sizes = [8, 256], strides = [1, 1]} : vector<8x384xf32> to vector<8x256xf32>
    %100 = arith.addf %98, %99 : vector<8x256xf32>
    %101 = arith.negf %100 : vector<8x256xf32>
    %102 = math.exp %101 : vector<8x256xf32>
    %cst_39 = arith.constant 1.000000e+00 : f32
    %103 = vector.broadcast %cst_39 : f32 to vector<8x256xf32>
    %104 = arith.addf %103, %102 : vector<8x256xf32>
    %105 = arith.divf %103, %104 : vector<8x256xf32>
    %106 = vector.extract_strided_slice %105 {offsets = [0, 0], sizes = [8, 128], strides = [1, 1]} : vector<8x256xf32> to vector<8x128xf32>
    %107 = vector.extract_strided_slice %105 {offsets = [0, 128], sizes = [8, 128], strides = [1, 1]} : vector<8x256xf32> to vector<8x128xf32>
    %108 = vector.extract_strided_slice %97 {offsets = [0, 256], sizes = [8, 128], strides = [1, 1]} : vector<8x384xf32> to vector<8x128xf32>
    %109 = vector.extract_strided_slice %74 {offsets = [0, 256], sizes = [8, 128], strides = [1, 1]} : vector<8x384xf32> to vector<8x128xf32>
    %110 = arith.mulf %106, %109 : vector<8x128xf32>
    %111 = arith.addf %108, %110 : vector<8x128xf32>
    %112 = math.tanh %111 : vector<8x128xf32>
    %113 = arith.subf %66, %112 : vector<8x128xf32>
    %114 = arith.mulf %107, %113 : vector<8x128xf32>
    %115 = arith.addf %112, %114 : vector<8x128xf32>
    %116 = arith.truncf %93 : vector<8x128xf32> to vector<8x128xbf16>
    %117 = arith.truncf %115 : vector<8x128xf32> to vector<8x128xbf16>
    %c0_40 = arith.constant 0 : index
    %c0_41 = arith.constant 0 : index
    %118 = vector.load %arg2[%c0_40, %c0_41] : memref<128x384xbf16, #tpu.memory_space<vmem>>, vector<128x384xbf16>
    %cst_42 = arith.constant dense<0.000000e+00> : vector<8x384xf32>
    %119 = tpu.matmul %116, %118, %cst_42 {dimension_numbers = #tpu.dot_dimension_numbers<[1], [0], [0], [1], [0, 0, 1, 1], [], []>} : vector<8x128xbf16>, vector<128x384xbf16>, vector<8x384xf32> -> vector<8x384xf32>
    %120 = arith.addf %119, %9 : vector<8x384xf32>
    %c0_43 = arith.constant 0 : index
    %c0_44 = arith.constant 0 : index
    %121 = vector.load %arg4[%c0_43, %c0_44] : memref<128x384xbf16, #tpu.memory_space<vmem>>, vector<128x384xbf16>
    %cst_45 = arith.constant dense<0.000000e+00> : vector<8x384xf32>
    %122 = tpu.matmul %117, %121, %cst_45 {dimension_numbers = #tpu.dot_dimension_numbers<[1], [0], [0], [1], [0, 0, 1, 1], [], []>} : vector<8x128xbf16>, vector<128x384xbf16>, vector<8x384xf32> -> vector<8x384xf32>
    %123 = arith.addf %122, %15 : vector<8x384xf32>
    %c16 = arith.constant 16 : index
    %c0_46 = arith.constant 0 : index
    %124 = vector.load %arg16[%c16, %c0_46] : memref<64x384xf32, #tpu.memory_space<vmem>>, vector<8x384xf32>
    %125 = vector.extract_strided_slice %124 {offsets = [0, 0], sizes = [8, 256], strides = [1, 1]} : vector<8x384xf32> to vector<8x256xf32>
    %126 = vector.extract_strided_slice %120 {offsets = [0, 0], sizes = [8, 256], strides = [1, 1]} : vector<8x384xf32> to vector<8x256xf32>
    %127 = arith.addf %125, %126 : vector<8x256xf32>
    %128 = arith.negf %127 : vector<8x256xf32>
    %129 = math.exp %128 : vector<8x256xf32>
    %cst_47 = arith.constant 1.000000e+00 : f32
    %130 = vector.broadcast %cst_47 : f32 to vector<8x256xf32>
    %131 = arith.addf %130, %129 : vector<8x256xf32>
    %132 = arith.divf %130, %131 : vector<8x256xf32>
    %133 = vector.extract_strided_slice %132 {offsets = [0, 0], sizes = [8, 128], strides = [1, 1]} : vector<8x256xf32> to vector<8x128xf32>
    %134 = vector.extract_strided_slice %132 {offsets = [0, 128], sizes = [8, 128], strides = [1, 1]} : vector<8x256xf32> to vector<8x128xf32>
    %135 = vector.extract_strided_slice %124 {offsets = [0, 256], sizes = [8, 128], strides = [1, 1]} : vector<8x384xf32> to vector<8x128xf32>
    %136 = vector.extract_strided_slice %120 {offsets = [0, 256], sizes = [8, 128], strides = [1, 1]} : vector<8x384xf32> to vector<8x128xf32>
    %137 = arith.mulf %133, %136 : vector<8x128xf32>
    %138 = arith.addf %135, %137 : vector<8x128xf32>
    %139 = math.tanh %138 : vector<8x128xf32>
    %140 = arith.subf %93, %139 : vector<8x128xf32>
    %141 = arith.mulf %134, %140 : vector<8x128xf32>
    %142 = arith.addf %139, %141 : vector<8x128xf32>
    %143 = arith.truncf %142 : vector<8x128xf32> to vector<8x128xbf16>
    %c0_48 = arith.constant 0 : index
    %c0_49 = arith.constant 0 : index
    %144 = vector.load %arg3[%c0_48, %c0_49] : memref<128x384xbf16, #tpu.memory_space<vmem>>, vector<128x384xbf16>
    %cst_50 = arith.constant dense<0.000000e+00> : vector<8x384xf32>
    %145 = tpu.matmul %143, %144, %cst_50 {dimension_numbers = #tpu.dot_dimension_numbers<[1], [0], [0], [1], [0, 0, 1, 1], [], []>} : vector<8x128xbf16>, vector<128x384xbf16>, vector<8x384xf32> -> vector<8x384xf32>
    %146 = arith.addf %145, %12 : vector<8x384xf32>
    %147 = vector.extract_strided_slice %146 {offsets = [0, 0], sizes = [8, 256], strides = [1, 1]} : vector<8x384xf32> to vector<8x256xf32>
    %148 = vector.extract_strided_slice %123 {offsets = [0, 0], sizes = [8, 256], strides = [1, 1]} : vector<8x384xf32> to vector<8x256xf32>
    %149 = arith.addf %147, %148 : vector<8x256xf32>
    %150 = arith.negf %149 : vector<8x256xf32>
    %151 = math.exp %150 : vector<8x256xf32>
    %cst_51 = arith.constant 1.000000e+00 : f32
    %152 = vector.broadcast %cst_51 : f32 to vector<8x256xf32>
    %153 = arith.addf %152, %151 : vector<8x256xf32>
    %154 = arith.divf %152, %153 : vector<8x256xf32>
    %155 = vector.extract_strided_slice %154 {offsets = [0, 0], sizes = [8, 128], strides = [1, 1]} : vector<8x256xf32> to vector<8x128xf32>
    %156 = vector.extract_strided_slice %154 {offsets = [0, 128], sizes = [8, 128], strides = [1, 1]} : vector<8x256xf32> to vector<8x128xf32>
    %157 = vector.extract_strided_slice %146 {offsets = [0, 256], sizes = [8, 128], strides = [1, 1]} : vector<8x384xf32> to vector<8x128xf32>
    %158 = vector.extract_strided_slice %123 {offsets = [0, 256], sizes = [8, 128], strides = [1, 1]} : vector<8x384xf32> to vector<8x128xf32>
    %159 = arith.mulf %155, %158 : vector<8x128xf32>
    %160 = arith.addf %157, %159 : vector<8x128xf32>
    %161 = math.tanh %160 : vector<8x128xf32>
    %162 = arith.subf %115, %161 : vector<8x128xf32>
    %163 = arith.mulf %156, %162 : vector<8x128xf32>
    %164 = arith.addf %161, %163 : vector<8x128xf32>
    %165 = arith.truncf %142 : vector<8x128xf32> to vector<8x128xbf16>
    %166 = arith.truncf %164 : vector<8x128xf32> to vector<8x128xbf16>
    %c0_52 = arith.constant 0 : index
    %c0_53 = arith.constant 0 : index
    %167 = vector.load %arg2[%c0_52, %c0_53] : memref<128x384xbf16, #tpu.memory_space<vmem>>, vector<128x384xbf16>
    %cst_54 = arith.constant dense<0.000000e+00> : vector<8x384xf32>
    %168 = tpu.matmul %165, %167, %cst_54 {dimension_numbers = #tpu.dot_dimension_numbers<[1], [0], [0], [1], [0, 0, 1, 1], [], []>} : vector<8x128xbf16>, vector<128x384xbf16>, vector<8x384xf32> -> vector<8x384xf32>
    %169 = arith.addf %168, %9 : vector<8x384xf32>
    %c0_55 = arith.constant 0 : index
    %c0_56 = arith.constant 0 : index
    %170 = vector.load %arg4[%c0_55, %c0_56] : memref<128x384xbf16, #tpu.memory_space<vmem>>, vector<128x384xbf16>
    %cst_57 = arith.constant dense<0.000000e+00> : vector<8x384xf32>
    %171 = tpu.matmul %166, %170, %cst_57 {dimension_numbers = #tpu.dot_dimension_numbers<[1], [0], [0], [1], [0, 0, 1, 1], [], []>} : vector<8x128xbf16>, vector<128x384xbf16>, vector<8x384xf32> -> vector<8x384xf32>
    %172 = arith.addf %171, %15 : vector<8x384xf32>
    %c24 = arith.constant 24 : index
    %c0_58 = arith.constant 0 : index
    %173 = vector.load %arg16[%c24, %c0_58] : memref<64x384xf32, #tpu.memory_space<vmem>>, vector<8x384xf32>
    %174 = vector.extract_strided_slice %173 {offsets = [0, 0], sizes = [8, 256], strides = [1, 1]} : vector<8x384xf32> to vector<8x256xf32>
    %175 = vector.extract_strided_slice %169 {offsets = [0, 0], sizes = [8, 256], strides = [1, 1]} : vector<8x384xf32> to vector<8x256xf32>
    %176 = arith.addf %174, %175 : vector<8x256xf32>
    %177 = arith.negf %176 : vector<8x256xf32>
    %178 = math.exp %177 : vector<8x256xf32>
    %cst_59 = arith.constant 1.000000e+00 : f32
    %179 = vector.broadcast %cst_59 : f32 to vector<8x256xf32>
    %180 = arith.addf %179, %178 : vector<8x256xf32>
    %181 = arith.divf %179, %180 : vector<8x256xf32>
    %182 = vector.extract_strided_slice %181 {offsets = [0, 0], sizes = [8, 128], strides = [1, 1]} : vector<8x256xf32> to vector<8x128xf32>
    %183 = vector.extract_strided_slice %181 {offsets = [0, 128], sizes = [8, 128], strides = [1, 1]} : vector<8x256xf32> to vector<8x128xf32>
    %184 = vector.extract_strided_slice %173 {offsets = [0, 256], sizes = [8, 128], strides = [1, 1]} : vector<8x384xf32> to vector<8x128xf32>
    %185 = vector.extract_strided_slice %169 {offsets = [0, 256], sizes = [8, 128], strides = [1, 1]} : vector<8x384xf32> to vector<8x128xf32>
    %186 = arith.mulf %182, %185 : vector<8x128xf32>
    %187 = arith.addf %184, %186 : vector<8x128xf32>
    %188 = math.tanh %187 : vector<8x128xf32>
    %189 = arith.subf %142, %188 : vector<8x128xf32>
    %190 = arith.mulf %183, %189 : vector<8x128xf32>
    %191 = arith.addf %188, %190 : vector<8x128xf32>
    %192 = arith.truncf %191 : vector<8x128xf32> to vector<8x128xbf16>
    %c0_60 = arith.constant 0 : index
    %c0_61 = arith.constant 0 : index
    %193 = vector.load %arg3[%c0_60, %c0_61] : memref<128x384xbf16, #tpu.memory_space<vmem>>, vector<128x384xbf16>
    %cst_62 = arith.constant dense<0.000000e+00> : vector<8x384xf32>
    %194 = tpu.matmul %192, %193, %cst_62 {dimension_numbers = #tpu.dot_dimension_numbers<[1], [0], [0], [1], [0, 0, 1, 1], [], []>} : vector<8x128xbf16>, vector<128x384xbf16>, vector<8x384xf32> -> vector<8x384xf32>
    %195 = arith.addf %194, %12 : vector<8x384xf32>
    %196 = vector.extract_strided_slice %195 {offsets = [0, 0], sizes = [8, 256], strides = [1, 1]} : vector<8x384xf32> to vector<8x256xf32>
    %197 = vector.extract_strided_slice %172 {offsets = [0, 0], sizes = [8, 256], strides = [1, 1]} : vector<8x384xf32> to vector<8x256xf32>
    %198 = arith.addf %196, %197 : vector<8x256xf32>
    %199 = arith.negf %198 : vector<8x256xf32>
    %200 = math.exp %199 : vector<8x256xf32>
    %cst_63 = arith.constant 1.000000e+00 : f32
    %201 = vector.broadcast %cst_63 : f32 to vector<8x256xf32>
    %202 = arith.addf %201, %200 : vector<8x256xf32>
    %203 = arith.divf %201, %202 : vector<8x256xf32>
    %204 = vector.extract_strided_slice %203 {offsets = [0, 0], sizes = [8, 128], strides = [1, 1]} : vector<8x256xf32> to vector<8x128xf32>
    %205 = vector.extract_strided_slice %203 {offsets = [0, 128], sizes = [8, 128], strides = [1, 1]} : vector<8x256xf32> to vector<8x128xf32>
    %206 = vector.extract_strided_slice %195 {offsets = [0, 256], sizes = [8, 128], strides = [1, 1]} : vector<8x384xf32> to vector<8x128xf32>
    %207 = vector.extract_strided_slice %172 {offsets = [0, 256], sizes = [8, 128], strides = [1, 1]} : vector<8x384xf32> to vector<8x128xf32>
    %208 = arith.mulf %204, %207 : vector<8x128xf32>
    %209 = arith.addf %206, %208 : vector<8x128xf32>
    %210 = math.tanh %209 : vector<8x128xf32>
    %211 = arith.subf %164, %210 : vector<8x128xf32>
    %212 = arith.mulf %205, %211 : vector<8x128xf32>
    %213 = arith.addf %210, %212 : vector<8x128xf32>
    %214 = arith.truncf %191 : vector<8x128xf32> to vector<8x128xbf16>
    %215 = arith.truncf %213 : vector<8x128xf32> to vector<8x128xbf16>
    %c0_64 = arith.constant 0 : index
    %c0_65 = arith.constant 0 : index
    %216 = vector.load %arg2[%c0_64, %c0_65] : memref<128x384xbf16, #tpu.memory_space<vmem>>, vector<128x384xbf16>
    %cst_66 = arith.constant dense<0.000000e+00> : vector<8x384xf32>
    %217 = tpu.matmul %214, %216, %cst_66 {dimension_numbers = #tpu.dot_dimension_numbers<[1], [0], [0], [1], [0, 0, 1, 1], [], []>} : vector<8x128xbf16>, vector<128x384xbf16>, vector<8x384xf32> -> vector<8x384xf32>
    %218 = arith.addf %217, %9 : vector<8x384xf32>
    %c0_67 = arith.constant 0 : index
    %c0_68 = arith.constant 0 : index
    %219 = vector.load %arg4[%c0_67, %c0_68] : memref<128x384xbf16, #tpu.memory_space<vmem>>, vector<128x384xbf16>
    %cst_69 = arith.constant dense<0.000000e+00> : vector<8x384xf32>
    %220 = tpu.matmul %215, %219, %cst_69 {dimension_numbers = #tpu.dot_dimension_numbers<[1], [0], [0], [1], [0, 0, 1, 1], [], []>} : vector<8x128xbf16>, vector<128x384xbf16>, vector<8x384xf32> -> vector<8x384xf32>
    %221 = arith.addf %220, %15 : vector<8x384xf32>
    %c32 = arith.constant 32 : index
    %c0_70 = arith.constant 0 : index
    %222 = vector.load %arg16[%c32, %c0_70] : memref<64x384xf32, #tpu.memory_space<vmem>>, vector<8x384xf32>
    %223 = vector.extract_strided_slice %222 {offsets = [0, 0], sizes = [8, 256], strides = [1, 1]} : vector<8x384xf32> to vector<8x256xf32>
    %224 = vector.extract_strided_slice %218 {offsets = [0, 0], sizes = [8, 256], strides = [1, 1]} : vector<8x384xf32> to vector<8x256xf32>
    %225 = arith.addf %223, %224 : vector<8x256xf32>
    %226 = arith.negf %225 : vector<8x256xf32>
    %227 = math.exp %226 : vector<8x256xf32>
    %cst_71 = arith.constant 1.000000e+00 : f32
    %228 = vector.broadcast %cst_71 : f32 to vector<8x256xf32>
    %229 = arith.addf %228, %227 : vector<8x256xf32>
    %230 = arith.divf %228, %229 : vector<8x256xf32>
    %231 = vector.extract_strided_slice %230 {offsets = [0, 0], sizes = [8, 128], strides = [1, 1]} : vector<8x256xf32> to vector<8x128xf32>
    %232 = vector.extract_strided_slice %230 {offsets = [0, 128], sizes = [8, 128], strides = [1, 1]} : vector<8x256xf32> to vector<8x128xf32>
    %233 = vector.extract_strided_slice %222 {offsets = [0, 256], sizes = [8, 128], strides = [1, 1]} : vector<8x384xf32> to vector<8x128xf32>
    %234 = vector.extract_strided_slice %218 {offsets = [0, 256], sizes = [8, 128], strides = [1, 1]} : vector<8x384xf32> to vector<8x128xf32>
    %235 = arith.mulf %231, %234 : vector<8x128xf32>
    %236 = arith.addf %233, %235 : vector<8x128xf32>
    %237 = math.tanh %236 : vector<8x128xf32>
    %238 = arith.subf %191, %237 : vector<8x128xf32>
    %239 = arith.mulf %232, %238 : vector<8x128xf32>
    %240 = arith.addf %237, %239 : vector<8x128xf32>
    %241 = arith.truncf %240 : vector<8x128xf32> to vector<8x128xbf16>
    %c0_72 = arith.constant 0 : index
    %c0_73 = arith.constant 0 : index
    %242 = vector.load %arg3[%c0_72, %c0_73] : memref<128x384xbf16, #tpu.memory_space<vmem>>, vector<128x384xbf16>
    %cst_74 = arith.constant dense<0.000000e+00> : vector<8x384xf32>
    %243 = tpu.matmul %241, %242, %cst_74 {dimension_numbers = #tpu.dot_dimension_numbers<[1], [0], [0], [1], [0, 0, 1, 1], [], []>} : vector<8x128xbf16>, vector<128x384xbf16>, vector<8x384xf32> -> vector<8x384xf32>
    %244 = arith.addf %243, %12 : vector<8x384xf32>
    %245 = vector.extract_strided_slice %244 {offsets = [0, 0], sizes = [8, 256], strides = [1, 1]} : vector<8x384xf32> to vector<8x256xf32>
    %246 = vector.extract_strided_slice %221 {offsets = [0, 0], sizes = [8, 256], strides = [1, 1]} : vector<8x384xf32> to vector<8x256xf32>
    %247 = arith.addf %245, %246 : vector<8x256xf32>
    %248 = arith.negf %247 : vector<8x256xf32>
    %249 = math.exp %248 : vector<8x256xf32>
    %cst_75 = arith.constant 1.000000e+00 : f32
    %250 = vector.broadcast %cst_75 : f32 to vector<8x256xf32>
    %251 = arith.addf %250, %249 : vector<8x256xf32>
    %252 = arith.divf %250, %251 : vector<8x256xf32>
    %253 = vector.extract_strided_slice %252 {offsets = [0, 0], sizes = [8, 128], strides = [1, 1]} : vector<8x256xf32> to vector<8x128xf32>
    %254 = vector.extract_strided_slice %252 {offsets = [0, 128], sizes = [8, 128], strides = [1, 1]} : vector<8x256xf32> to vector<8x128xf32>
    %255 = vector.extract_strided_slice %244 {offsets = [0, 256], sizes = [8, 128], strides = [1, 1]} : vector<8x384xf32> to vector<8x128xf32>
    %256 = vector.extract_strided_slice %221 {offsets = [0, 256], sizes = [8, 128], strides = [1, 1]} : vector<8x384xf32> to vector<8x128xf32>
    %257 = arith.mulf %253, %256 : vector<8x128xf32>
    %258 = arith.addf %255, %257 : vector<8x128xf32>
    %259 = math.tanh %258 : vector<8x128xf32>
    %260 = arith.subf %213, %259 : vector<8x128xf32>
    %261 = arith.mulf %254, %260 : vector<8x128xf32>
    %262 = arith.addf %259, %261 : vector<8x128xf32>
    %263 = arith.truncf %240 : vector<8x128xf32> to vector<8x128xbf16>
    %264 = arith.truncf %262 : vector<8x128xf32> to vector<8x128xbf16>
    %c0_76 = arith.constant 0 : index
    %c0_77 = arith.constant 0 : index
    %265 = vector.load %arg2[%c0_76, %c0_77] : memref<128x384xbf16, #tpu.memory_space<vmem>>, vector<128x384xbf16>
    %cst_78 = arith.constant dense<0.000000e+00> : vector<8x384xf32>
    %266 = tpu.matmul %263, %265, %cst_78 {dimension_numbers = #tpu.dot_dimension_numbers<[1], [0], [0], [1], [0, 0, 1, 1], [], []>} : vector<8x128xbf16>, vector<128x384xbf16>, vector<8x384xf32> -> vector<8x384xf32>
    %267 = arith.addf %266, %9 : vector<8x384xf32>
    %c0_79 = arith.constant 0 : index
    %c0_80 = arith.constant 0 : index
    %268 = vector.load %arg4[%c0_79, %c0_80] : memref<128x384xbf16, #tpu.memory_space<vmem>>, vector<128x384xbf16>
    %cst_81 = arith.constant dense<0.000000e+00> : vector<8x384xf32>
    %269 = tpu.matmul %264, %268, %cst_81 {dimension_numbers = #tpu.dot_dimension_numbers<[1], [0], [0], [1], [0, 0, 1, 1], [], []>} : vector<8x128xbf16>, vector<128x384xbf16>, vector<8x384xf32> -> vector<8x384xf32>
    %270 = arith.addf %269, %15 : vector<8x384xf32>
    %c40 = arith.constant 40 : index
    %c0_82 = arith.constant 0 : index
    %271 = vector.load %arg16[%c40, %c0_82] : memref<64x384xf32, #tpu.memory_space<vmem>>, vector<8x384xf32>
    %272 = vector.extract_strided_slice %271 {offsets = [0, 0], sizes = [8, 256], strides = [1, 1]} : vector<8x384xf32> to vector<8x256xf32>
    %273 = vector.extract_strided_slice %267 {offsets = [0, 0], sizes = [8, 256], strides = [1, 1]} : vector<8x384xf32> to vector<8x256xf32>
    %274 = arith.addf %272, %273 : vector<8x256xf32>
    %275 = arith.negf %274 : vector<8x256xf32>
    %276 = math.exp %275 : vector<8x256xf32>
    %cst_83 = arith.constant 1.000000e+00 : f32
    %277 = vector.broadcast %cst_83 : f32 to vector<8x256xf32>
    %278 = arith.addf %277, %276 : vector<8x256xf32>
    %279 = arith.divf %277, %278 : vector<8x256xf32>
    %280 = vector.extract_strided_slice %279 {offsets = [0, 0], sizes = [8, 128], strides = [1, 1]} : vector<8x256xf32> to vector<8x128xf32>
    %281 = vector.extract_strided_slice %279 {offsets = [0, 128], sizes = [8, 128], strides = [1, 1]} : vector<8x256xf32> to vector<8x128xf32>
    %282 = vector.extract_strided_slice %271 {offsets = [0, 256], sizes = [8, 128], strides = [1, 1]} : vector<8x384xf32> to vector<8x128xf32>
    %283 = vector.extract_strided_slice %267 {offsets = [0, 256], sizes = [8, 128], strides = [1, 1]} : vector<8x384xf32> to vector<8x128xf32>
    %284 = arith.mulf %280, %283 : vector<8x128xf32>
    %285 = arith.addf %282, %284 : vector<8x128xf32>
    %286 = math.tanh %285 : vector<8x128xf32>
    %287 = arith.subf %240, %286 : vector<8x128xf32>
    %288 = arith.mulf %281, %287 : vector<8x128xf32>
    %289 = arith.addf %286, %288 : vector<8x128xf32>
    %290 = arith.truncf %289 : vector<8x128xf32> to vector<8x128xbf16>
    %c0_84 = arith.constant 0 : index
    %c0_85 = arith.constant 0 : index
    %291 = vector.load %arg3[%c0_84, %c0_85] : memref<128x384xbf16, #tpu.memory_space<vmem>>, vector<128x384xbf16>
    %cst_86 = arith.constant dense<0.000000e+00> : vector<8x384xf32>
    %292 = tpu.matmul %290, %291, %cst_86 {dimension_numbers = #tpu.dot_dimension_numbers<[1], [0], [0], [1], [0, 0, 1, 1], [], []>} : vector<8x128xbf16>, vector<128x384xbf16>, vector<8x384xf32> -> vector<8x384xf32>
    %293 = arith.addf %292, %12 : vector<8x384xf32>
    %294 = vector.extract_strided_slice %293 {offsets = [0, 0], sizes = [8, 256], strides = [1, 1]} : vector<8x384xf32> to vector<8x256xf32>
    %295 = vector.extract_strided_slice %270 {offsets = [0, 0], sizes = [8, 256], strides = [1, 1]} : vector<8x384xf32> to vector<8x256xf32>
    %296 = arith.addf %294, %295 : vector<8x256xf32>
    %297 = arith.negf %296 : vector<8x256xf32>
    %298 = math.exp %297 : vector<8x256xf32>
    %cst_87 = arith.constant 1.000000e+00 : f32
    %299 = vector.broadcast %cst_87 : f32 to vector<8x256xf32>
    %300 = arith.addf %299, %298 : vector<8x256xf32>
    %301 = arith.divf %299, %300 : vector<8x256xf32>
    %302 = vector.extract_strided_slice %301 {offsets = [0, 0], sizes = [8, 128], strides = [1, 1]} : vector<8x256xf32> to vector<8x128xf32>
    %303 = vector.extract_strided_slice %301 {offsets = [0, 128], sizes = [8, 128], strides = [1, 1]} : vector<8x256xf32> to vector<8x128xf32>
    %304 = vector.extract_strided_slice %293 {offsets = [0, 256], sizes = [8, 128], strides = [1, 1]} : vector<8x384xf32> to vector<8x128xf32>
    %305 = vector.extract_strided_slice %270 {offsets = [0, 256], sizes = [8, 128], strides = [1, 1]} : vector<8x384xf32> to vector<8x128xf32>
    %306 = arith.mulf %302, %305 : vector<8x128xf32>
    %307 = arith.addf %304, %306 : vector<8x128xf32>
    %308 = math.tanh %307 : vector<8x128xf32>
    %309 = arith.subf %262, %308 : vector<8x128xf32>
    %310 = arith.mulf %303, %309 : vector<8x128xf32>
    %311 = arith.addf %308, %310 : vector<8x128xf32>
    %312 = arith.truncf %289 : vector<8x128xf32> to vector<8x128xbf16>
    %313 = arith.truncf %311 : vector<8x128xf32> to vector<8x128xbf16>
    %c0_88 = arith.constant 0 : index
    %c0_89 = arith.constant 0 : index
    %314 = vector.load %arg2[%c0_88, %c0_89] : memref<128x384xbf16, #tpu.memory_space<vmem>>, vector<128x384xbf16>
    %cst_90 = arith.constant dense<0.000000e+00> : vector<8x384xf32>
    %315 = tpu.matmul %312, %314, %cst_90 {dimension_numbers = #tpu.dot_dimension_numbers<[1], [0], [0], [1], [0, 0, 1, 1], [], []>} : vector<8x128xbf16>, vector<128x384xbf16>, vector<8x384xf32> -> vector<8x384xf32>
    %316 = arith.addf %315, %9 : vector<8x384xf32>
    %c0_91 = arith.constant 0 : index
    %c0_92 = arith.constant 0 : index
    %317 = vector.load %arg4[%c0_91, %c0_92] : memref<128x384xbf16, #tpu.memory_space<vmem>>, vector<128x384xbf16>
    %cst_93 = arith.constant dense<0.000000e+00> : vector<8x384xf32>
    %318 = tpu.matmul %313, %317, %cst_93 {dimension_numbers = #tpu.dot_dimension_numbers<[1], [0], [0], [1], [0, 0, 1, 1], [], []>} : vector<8x128xbf16>, vector<128x384xbf16>, vector<8x384xf32> -> vector<8x384xf32>
    %319 = arith.addf %318, %15 : vector<8x384xf32>
    %c48 = arith.constant 48 : index
    %c0_94 = arith.constant 0 : index
    %320 = vector.load %arg16[%c48, %c0_94] : memref<64x384xf32, #tpu.memory_space<vmem>>, vector<8x384xf32>
    %321 = vector.extract_strided_slice %320 {offsets = [0, 0], sizes = [8, 256], strides = [1, 1]} : vector<8x384xf32> to vector<8x256xf32>
    %322 = vector.extract_strided_slice %316 {offsets = [0, 0], sizes = [8, 256], strides = [1, 1]} : vector<8x384xf32> to vector<8x256xf32>
    %323 = arith.addf %321, %322 : vector<8x256xf32>
    %324 = arith.negf %323 : vector<8x256xf32>
    %325 = math.exp %324 : vector<8x256xf32>
    %cst_95 = arith.constant 1.000000e+00 : f32
    %326 = vector.broadcast %cst_95 : f32 to vector<8x256xf32>
    %327 = arith.addf %326, %325 : vector<8x256xf32>
    %328 = arith.divf %326, %327 : vector<8x256xf32>
    %329 = vector.extract_strided_slice %328 {offsets = [0, 0], sizes = [8, 128], strides = [1, 1]} : vector<8x256xf32> to vector<8x128xf32>
    %330 = vector.extract_strided_slice %328 {offsets = [0, 128], sizes = [8, 128], strides = [1, 1]} : vector<8x256xf32> to vector<8x128xf32>
    %331 = vector.extract_strided_slice %320 {offsets = [0, 256], sizes = [8, 128], strides = [1, 1]} : vector<8x384xf32> to vector<8x128xf32>
    %332 = vector.extract_strided_slice %316 {offsets = [0, 256], sizes = [8, 128], strides = [1, 1]} : vector<8x384xf32> to vector<8x128xf32>
    %333 = arith.mulf %329, %332 : vector<8x128xf32>
    %334 = arith.addf %331, %333 : vector<8x128xf32>
    %335 = math.tanh %334 : vector<8x128xf32>
    %336 = arith.subf %289, %335 : vector<8x128xf32>
    %337 = arith.mulf %330, %336 : vector<8x128xf32>
    %338 = arith.addf %335, %337 : vector<8x128xf32>
    %339 = arith.truncf %338 : vector<8x128xf32> to vector<8x128xbf16>
    %c0_96 = arith.constant 0 : index
    %c0_97 = arith.constant 0 : index
    %340 = vector.load %arg3[%c0_96, %c0_97] : memref<128x384xbf16, #tpu.memory_space<vmem>>, vector<128x384xbf16>
    %cst_98 = arith.constant dense<0.000000e+00> : vector<8x384xf32>
    %341 = tpu.matmul %339, %340, %cst_98 {dimension_numbers = #tpu.dot_dimension_numbers<[1], [0], [0], [1], [0, 0, 1, 1], [], []>} : vector<8x128xbf16>, vector<128x384xbf16>, vector<8x384xf32> -> vector<8x384xf32>
    %342 = arith.addf %341, %12 : vector<8x384xf32>
    %343 = vector.extract_strided_slice %342 {offsets = [0, 0], sizes = [8, 256], strides = [1, 1]} : vector<8x384xf32> to vector<8x256xf32>
    %344 = vector.extract_strided_slice %319 {offsets = [0, 0], sizes = [8, 256], strides = [1, 1]} : vector<8x384xf32> to vector<8x256xf32>
    %345 = arith.addf %343, %344 : vector<8x256xf32>
    %346 = arith.negf %345 : vector<8x256xf32>
    %347 = math.exp %346 : vector<8x256xf32>
    %cst_99 = arith.constant 1.000000e+00 : f32
    %348 = vector.broadcast %cst_99 : f32 to vector<8x256xf32>
    %349 = arith.addf %348, %347 : vector<8x256xf32>
    %350 = arith.divf %348, %349 : vector<8x256xf32>
    %351 = vector.extract_strided_slice %350 {offsets = [0, 0], sizes = [8, 128], strides = [1, 1]} : vector<8x256xf32> to vector<8x128xf32>
    %352 = vector.extract_strided_slice %350 {offsets = [0, 128], sizes = [8, 128], strides = [1, 1]} : vector<8x256xf32> to vector<8x128xf32>
    %353 = vector.extract_strided_slice %342 {offsets = [0, 256], sizes = [8, 128], strides = [1, 1]} : vector<8x384xf32> to vector<8x128xf32>
    %354 = vector.extract_strided_slice %319 {offsets = [0, 256], sizes = [8, 128], strides = [1, 1]} : vector<8x384xf32> to vector<8x128xf32>
    %355 = arith.mulf %351, %354 : vector<8x128xf32>
    %356 = arith.addf %353, %355 : vector<8x128xf32>
    %357 = math.tanh %356 : vector<8x128xf32>
    %358 = arith.subf %311, %357 : vector<8x128xf32>
    %359 = arith.mulf %352, %358 : vector<8x128xf32>
    %360 = arith.addf %357, %359 : vector<8x128xf32>
    %361 = arith.truncf %338 : vector<8x128xf32> to vector<8x128xbf16>
    %362 = arith.truncf %360 : vector<8x128xf32> to vector<8x128xbf16>
    %c0_100 = arith.constant 0 : index
    %c0_101 = arith.constant 0 : index
    %363 = vector.load %arg2[%c0_100, %c0_101] : memref<128x384xbf16, #tpu.memory_space<vmem>>, vector<128x384xbf16>
    %cst_102 = arith.constant dense<0.000000e+00> : vector<8x384xf32>
    %364 = tpu.matmul %361, %363, %cst_102 {dimension_numbers = #tpu.dot_dimension_numbers<[1], [0], [0], [1], [0, 0, 1, 1], [], []>} : vector<8x128xbf16>, vector<128x384xbf16>, vector<8x384xf32> -> vector<8x384xf32>
    %365 = arith.addf %364, %9 : vector<8x384xf32>
    %c0_103 = arith.constant 0 : index
    %c0_104 = arith.constant 0 : index
    %366 = vector.load %arg4[%c0_103, %c0_104] : memref<128x384xbf16, #tpu.memory_space<vmem>>, vector<128x384xbf16>
    %cst_105 = arith.constant dense<0.000000e+00> : vector<8x384xf32>
    %367 = tpu.matmul %362, %366, %cst_105 {dimension_numbers = #tpu.dot_dimension_numbers<[1], [0], [0], [1], [0, 0, 1, 1], [], []>} : vector<8x128xbf16>, vector<128x384xbf16>, vector<8x384xf32> -> vector<8x384xf32>
    %368 = arith.addf %367, %15 : vector<8x384xf32>
    %c56 = arith.constant 56 : index
    %c0_106 = arith.constant 0 : index
    %369 = vector.load %arg16[%c56, %c0_106] : memref<64x384xf32, #tpu.memory_space<vmem>>, vector<8x384xf32>
    %370 = vector.extract_strided_slice %369 {offsets = [0, 0], sizes = [8, 256], strides = [1, 1]} : vector<8x384xf32> to vector<8x256xf32>
    %371 = vector.extract_strided_slice %365 {offsets = [0, 0], sizes = [8, 256], strides = [1, 1]} : vector<8x384xf32> to vector<8x256xf32>
    %372 = arith.addf %370, %371 : vector<8x256xf32>
    %373 = arith.negf %372 : vector<8x256xf32>
    %374 = math.exp %373 : vector<8x256xf32>
    %cst_107 = arith.constant 1.000000e+00 : f32
    %375 = vector.broadcast %cst_107 : f32 to vector<8x256xf32>
    %376 = arith.addf %375, %374 : vector<8x256xf32>
    %377 = arith.divf %375, %376 : vector<8x256xf32>
    %378 = vector.extract_strided_slice %377 {offsets = [0, 0], sizes = [8, 128], strides = [1, 1]} : vector<8x256xf32> to vector<8x128xf32>
    %379 = vector.extract_strided_slice %377 {offsets = [0, 128], sizes = [8, 128], strides = [1, 1]} : vector<8x256xf32> to vector<8x128xf32>
    %380 = vector.extract_strided_slice %369 {offsets = [0, 256], sizes = [8, 128], strides = [1, 1]} : vector<8x384xf32> to vector<8x128xf32>
    %381 = vector.extract_strided_slice %365 {offsets = [0, 256], sizes = [8, 128], strides = [1, 1]} : vector<8x384xf32> to vector<8x128xf32>
    %382 = arith.mulf %378, %381 : vector<8x128xf32>
    %383 = arith.addf %380, %382 : vector<8x128xf32>
    %384 = math.tanh %383 : vector<8x128xf32>
    %385 = arith.subf %338, %384 : vector<8x128xf32>
    %386 = arith.mulf %379, %385 : vector<8x128xf32>
    %387 = arith.addf %384, %386 : vector<8x128xf32>
    %388 = arith.truncf %387 : vector<8x128xf32> to vector<8x128xbf16>
    %c0_108 = arith.constant 0 : index
    %c0_109 = arith.constant 0 : index
    %389 = vector.load %arg3[%c0_108, %c0_109] : memref<128x384xbf16, #tpu.memory_space<vmem>>, vector<128x384xbf16>
    %cst_110 = arith.constant dense<0.000000e+00> : vector<8x384xf32>
    %390 = tpu.matmul %388, %389, %cst_110 {dimension_numbers = #tpu.dot_dimension_numbers<[1], [0], [0], [1], [0, 0, 1, 1], [], []>} : vector<8x128xbf16>, vector<128x384xbf16>, vector<8x384xf32> -> vector<8x384xf32>
    %391 = arith.addf %390, %12 : vector<8x384xf32>
    %392 = vector.extract_strided_slice %391 {offsets = [0, 0], sizes = [8, 256], strides = [1, 1]} : vector<8x384xf32> to vector<8x256xf32>
    %393 = vector.extract_strided_slice %368 {offsets = [0, 0], sizes = [8, 256], strides = [1, 1]} : vector<8x384xf32> to vector<8x256xf32>
    %394 = arith.addf %392, %393 : vector<8x256xf32>
    %395 = arith.negf %394 : vector<8x256xf32>
    %396 = math.exp %395 : vector<8x256xf32>
    %cst_111 = arith.constant 1.000000e+00 : f32
    %397 = vector.broadcast %cst_111 : f32 to vector<8x256xf32>
    %398 = arith.addf %397, %396 : vector<8x256xf32>
    %399 = arith.divf %397, %398 : vector<8x256xf32>
    %400 = vector.extract_strided_slice %399 {offsets = [0, 0], sizes = [8, 128], strides = [1, 1]} : vector<8x256xf32> to vector<8x128xf32>
    %401 = vector.extract_strided_slice %399 {offsets = [0, 128], sizes = [8, 128], strides = [1, 1]} : vector<8x256xf32> to vector<8x128xf32>
    %402 = vector.extract_strided_slice %391 {offsets = [0, 256], sizes = [8, 128], strides = [1, 1]} : vector<8x384xf32> to vector<8x128xf32>
    %403 = vector.extract_strided_slice %368 {offsets = [0, 256], sizes = [8, 128], strides = [1, 1]} : vector<8x384xf32> to vector<8x128xf32>
    %404 = arith.mulf %400, %403 : vector<8x128xf32>
    %405 = arith.addf %402, %404 : vector<8x128xf32>
    %406 = math.tanh %405 : vector<8x128xf32>
    %407 = arith.subf %360, %406 : vector<8x128xf32>
    %408 = arith.mulf %401, %407 : vector<8x128xf32>
    %409 = arith.addf %406, %408 : vector<8x128xf32>
    %410 = arith.truncf %409 : vector<8x128xf32> to vector<8x128xbf16>
    %c0_112 = arith.constant 0 : index
    %c0_113 = arith.constant 0 : index
    %411 = vector.load %arg9[%c0_112, %c0_113] : memref<128x32xbf16, #tpu.memory_space<vmem>>, vector<128x32xbf16>
    %cst_114 = arith.constant dense<0.000000e+00> : vector<8x32xf32>
    %412 = tpu.matmul %410, %411, %cst_114 {dimension_numbers = #tpu.dot_dimension_numbers<[1], [0], [0], [1], [0, 0, 1, 1], [], []>} : vector<8x128xbf16>, vector<128x32xbf16>, vector<8x32xf32> -> vector<8x32xf32>
    %c0_115 = arith.constant 0 : index
    %c0_116 = arith.constant 0 : index
    %413 = vector.load %arg10[%c0_115, %c0_116] : memref<1x32xf32, #tpu.memory_space<vmem>>, vector<1x32xf32>
    %414 = vector.broadcast %413 : vector<1x32xf32> to vector<8x32xf32>
    %415 = arith.addf %412, %414 : vector<8x32xf32>
    %416 = arith.negf %415 : vector<8x32xf32>
    %417 = math.exp %416 : vector<8x32xf32>
    %cst_117 = arith.constant 1.000000e+00 : f32
    %418 = vector.broadcast %cst_117 : f32 to vector<8x32xf32>
    %419 = arith.addf %418, %417 : vector<8x32xf32>
    %420 = arith.divf %418, %419 : vector<8x32xf32>
    %421 = arith.mulf %415, %420 : vector<8x32xf32>
    %c0_118 = arith.constant 0 : index
    %c0_119 = arith.constant 0 : index
    %422 = vector.load %arg11[%c0_118, %c0_119] : memref<1x32xf32, #tpu.memory_space<vmem>>, vector<1x32xf32>
    %423 = vector.broadcast %422 : vector<1x32xf32> to vector<8x32xf32>
    %424 = arith.mulf %421, %423 : vector<8x32xf32>
    %c0_120 = arith.constant 0 : index
    %c0_121 = arith.constant 0 : index
    %425 = vector.load %arg12[%c0_120, %c0_121] : memref<1x32xf32, #tpu.memory_space<vmem>>, vector<1x32xf32>
    %426 = vector.broadcast %425 : vector<1x32xf32> to vector<8x32xf32>
    %427 = arith.addf %424, %426 : vector<8x32xf32>
    %428 = arith.truncf %427 : vector<8x32xf32> to vector<8x32xbf16>
    %c0_122 = arith.constant 0 : index
    %c0_123 = arith.constant 0 : index
    %429 = vector.load %arg13[%c0_122, %c0_123] : memref<32x4xbf16, #tpu.memory_space<vmem>>, vector<32x4xbf16>
    %cst_124 = arith.constant dense<0.000000e+00> : vector<8x4xf32>
    %430 = tpu.matmul %428, %429, %cst_124 {dimension_numbers = #tpu.dot_dimension_numbers<[1], [0], [0], [1], [0, 0, 1, 1], [], []>} : vector<8x32xbf16>, vector<32x4xbf16>, vector<8x4xf32> -> vector<8x4xf32>
    %c0_125 = arith.constant 0 : index
    %c0_126 = arith.constant 0 : index
    %431 = vector.load %arg14[%c0_125, %c0_126] : memref<1x4xf32, #tpu.memory_space<vmem>>, vector<1x4xf32>
    %432 = vector.broadcast %431 : vector<1x4xf32> to vector<8x4xf32>
    %433 = arith.addf %430, %432 : vector<8x4xf32>
    %c0_127 = arith.constant 0 : index
    %c0_128 = arith.constant 0 : index
    %434 = vector.load %arg15[%c0_127, %c0_128] : memref<8x4xf32, #tpu.memory_space<vmem>>, vector<8x4xf32>
    tpu.vector_store %arg15[%c0_127, %c0_128], %433 {strides = array<i32>} : memref<8x4xf32, #tpu.memory_space<vmem>>, vector<8x4xf32>,
    return
  }
}

</mosaic_0001>

<bundles_post_ra>
// kernel: tpu_custom_call.1
= control target key start
LH: loop header
LB: loop body
LE: loop exit
PB: predicated region body
PF: predicated region fallthrough
CT: control target
= control target key end

     0   :  { %20 = vsyncpa [#allocation4], 0  ;;  %s6501_s0 = inlined_call_operand.vmem [shape: bf16[64,16], index: 0, kind: input, shape index: {}]   ;;  %s6502_s1 = inlined_call_operand.vmem [shape: bf16[16,384], index: 1, kind: input, shape index: {}]   ;;  %s6503_s2 = inlined_call_operand.hbm [shape: bf16[128,384], index: 2, kind: input, shape index: {}]   ;;  %s6504_s3 = inlined_call_operand.hbm [shape: bf16[128,384], index: 3, kind: input, shape index: {}]   ;;  %s6505_s4 = inlined_call_operand.hbm [shape: bf16[128,384], index: 4, kind: input, shape index: {}]   ;;  %s6506_s5 = inlined_call_operand.vmem [shape: f32[1,384], index: 5, kind: input, shape index: {}]   ;;  %s6507_s6 = inlined_call_operand.vmem [shape: f32[1,384], index: 6, kind: input, shape index: {}]   ;;  %s6508_s7 = inlined_call_operand.vmem [shape: f32[1,384], index: 7, kind: input, shape index: {}]   ;;  %s6509_s8 = inlined_call_operand.vmem [shape: f32[1,384], index: 8, kind: input, shape index: {}]   ;;  %s6510_s9 = inlined_call_operand.vmem [shape: bf16[128,32], index: 9, kind: input, shape index: {}]   ;;  %s6511_s10 = inlined_call_operand.vmem [shape: f32[1,32], index: 10, kind: input, shape index: {}]   ;;  %s6512_s11 = inlined_call_operand.vmem [shape: f32[1,32], index: 11, kind: input, shape index: {}]   ;;  %s6513_s12 = inlined_call_operand.vmem [shape: f32[1,32], index: 12, kind: input, shape index: {}]   ;;  %s6514_s13 = inlined_call_operand.vmem [shape: bf16[32,4], index: 13, kind: input, shape index: {}]   ;;  %s6515_s14 = inlined_call_operand.vmem [shape: f32[1,4], index: 14, kind: input, shape index: {}]   ;;  %s6516_s15 = inlined_call_operand.vmem [shape: f32[8,4], index: 15, kind: output, shape index: {}]  }
   0x1   :  { %21 = vsyncpa [#allocation6], 0  ;;  %s4757_s18 = smov [#allocation5]   ;;  %s4758_s20 = smov [#allocation3]  }
   0x2   :  { %s43_s19 = sshll.u32 %s4757_s18, 4  ;;  %s31_s21 = sshll.u32 %s4758_s20, 4  ;;  %s44_s19 = int_to_ptr.vmem [resolvable:$true] %s43_s19  ;;  %s32_s21 = int_to_ptr.vmem [resolvable:$true] %s31_s21 }
   0x3   :  { %s4701_s22 = scalar_lea.vmem %s44_s19, 3072  ;;  %p4706_p1 = scmp.lt.s32.totalorder %s44_s19, %s44_s19 }
   0x4   :  { %p4702_p0 = scmp.ne.s32.totalorder %s44_s19, %s4701_s22  ;;  %p4707_p2 = scmp.lt.s32.totalorder %s4701_s22, %s4701_s22 }
   0x6   :  { %p4708_p3 = por %p4707_p2, %p4706_p1 }
   0x8   :  { %p4709_p4 = pnand %p4708_p3, %p4702_p0 }
   0xa   :  { %4712 = shalt.err (!%p4709_p4)
}
   0xb   :  { %s4759_s23 = smov 192   ;;  %s4760_s24 = smov 12  }
   0xc   :  { %49 = dma.hbm_to_vmem [thread:$0]  %s6504_s3, 3072, %s44_s19, [#allocation6], %s4759_s23, %s4759_s23, %s4760_s24  }
   0xd   :  { %s4721_s27 = scalar_lea.vmem %s32_s21, 3072  ;;  %p4726_p6 = scmp.lt.s32.totalorder %s32_s21, %s32_s21 }
   0xe   :  { %p4722_p5 = scmp.ne.s32.totalorder %s32_s21, %s4721_s27  ;;  %p4727_p7 = scmp.lt.s32.totalorder %s4721_s27, %s4721_s27 }
  0x10   :  { %p4728_p8 = por %p4727_p7, %p4726_p6 }
  0x12   :  { %p4729_p9 = pnand %p4728_p8, %p4722_p5 }
  0x14   :  { %4732 = shalt.err (!%p4729_p9)
}
  0x15   :  { %37 = dma.hbm_to_vmem [thread:$0]  %s6503_s2, 3072, %s32_s21, [#allocation4], %s4759_s23, %s4759_s23, %s4760_s24  }
  0x16   :  { %s4761_s30 = smov [#allocation7]  }
  0x17   :  { %s55_s16 = sshll.u32 %s4761_s30, 4  ;;  %s56_s16 = int_to_ptr.vmem [resolvable:$true] %s55_s16 }
  0x18   :  { %s4741_s17 = scalar_lea.vmem %s56_s16, 3072  ;;  %p4746_p11 = scmp.lt.s32.totalorder %s56_s16, %s56_s16 }
  0x19   :  { %p4742_p10 = scmp.ne.s32.totalorder %s56_s16, %s4741_s17  ;;  %p4747_p12 = scmp.lt.s32.totalorder %s4741_s17, %s4741_s17 }
  0x1b   :  { %p4748_p13 = por %p4747_p12, %p4746_p11 }
  0x1d   :  { %p4749_p0 = pnand %p4748_p13, %p4742_p10 }
  0x1f   :  { %4752 = shalt.err (!%p4749_p0)
}
  0x20   :  { %61 = dma.hbm_to_vmem [thread:$0]  %s6505_s4, 3072, %s56_s16, [#allocation6], %s4759_s23, %s4759_s23, %s4760_s24  }
  0x21   :  { %4753 = dma.done.wait [#allocation4], 3072  }
  0x22   :  { %4754 = vsyncadd [#allocation4], 4294964224 }
  0x23   :  { %4755 = dma.done.wait [#allocation6], 6144  }
  0x24   :  { %4756 = vsyncadd [#allocation6], 4294961152  ;;  %v6517_v0 = vmov 0   ;;  %v4271_v1 = vld [vmem:[%s6502_s1 + $0x4] ss:$12 sps:$4 sm:$0xff]   ;;  %vm157_vm0 = vcmask 130048  }
  0x25   :  { %202 = vmatprep.mubr.bf16.mxu0 %v6517_v0  ;;  %v4273_v2 = vld [vmem:[%s6502_s1] ss:$12 sps:$4 sm:$0xff]   ;;  %184 = vmatprep.subr.bf16.mxu0 %v4271_v1  ;;  %v4866_v5 = vld [vmem:[#allocation3 + $0xa8] ss:$12 sps:$4 sm:$0xff]   ;;  %v4874_v7 = vld [vmem:[#allocation3 + $0x90] ss:$12 sps:$4 sm:$0xff]  }
  0x26   :  { %v4274_v3 = vld [vmem:[%s6501_s0] sm:$0xff]   ;;  %185 = vmatpush1.bf16.msra.mxu0 %v4273_v2  ;;  %v4864_v4 = vld [vmem:[#allocation3 + $0xac] ss:$12 sps:$4 sm:$0xff]   ;;  %v4878_v8 = vld [vmem:[#allocation3 + $0x7c] ss:$12 sps:$4 sm:$0xff]   ;;  %v6557_v18 = vmov 0.0  }
  0x27   :  { %v4868_v6 = vld [vmem:[#allocation3 + $0x94] ss:$12 sps:$4 sm:$0xff]   ;;  %3747 = vmatprep.mubr.msk.bf16.mxu1 %vm157_vm0, %v4274_v3  ;;  %543 = vmatprep.subr.bf16.mxu0 %v4864_v4  ;;  %v4281_v9 = vld [vmem:[%s6501_s0 + $0x8] sm:$0xff]   ;;  %v4884_v10 = vld [vmem:[#allocation3 + $0x78] ss:$12 sps:$4 sm:$0xff]   ;;  %vm4764_vm1 = vmmov 0  }
  0x28   :  { %v4887_v11 = vld [vmem:[#allocation3 + $0x64] ss:$12 sps:$4 sm:$0xff]   ;;  %v4891_v12 = vld [vmem:[#allocation3 + $0x60] ss:$12 sps:$4 sm:$0xff]   ;;  %v4298_v13 = vld [vmem:[%s6502_s1 + $0x8] ss:$12 sps:$4 sm:$0xff]  }
  0x29   :  { %3384 = vmatmul.mubr.msk.bf16.vlgmr.msra.gmra.mxu0 %vm157_vm0, %v4274_v3  ;;  %v4898_v14 = vld [vmem:[#allocation3 + $0x4c] ss:$12 sps:$4 sm:$0xff]   ;;  %v4288_v15 = vld [vmem:[%s6501_s0 + $0x10] sm:$0xff]   ;;  %3745 = vmatprep.subr.bf16.mxu1 %v4298_v13  ;;  %v4925_v23 = vld [vmem:[#allocation3 + $0x1c] ss:$12 sps:$4 sm:$0xff]   ;;  %vm3325_vm2 = vcmask 261120  }
  0x2a   :  { %544 = vmatpush1.bf16.msra.mxu0 %v4866_v5  ;;  %212 = vmatprep.mubr.bf16.mxu0 %v6517_v0  ;;  %v4903_v16 = vld [vmem:[#allocation3 + $0xb0] ss:$12 sps:$4 sm:$0xff]   ;;  %v4906_v17 = vld [vmem:[#allocation3 + $0x48] ss:$12 sps:$4 sm:$0xff]   ;;  %v4915_v20 = vld [vmem:[#allocation3 + $0x98] ss:$12 sps:$4 sm:$0xff]  }
  0x2b   :  { %545 = vmatprep.subr.bf16.mxu0 %v4868_v6  ;;  %3746 = vmatpush3.bf16.msra.mxu1 %v4298_v13  ;;  %v4910_v19 = vld [vmem:[#allocation3 + $0x34] ss:$12 sps:$4 sm:$0xff]   ;;  %v4918_v21 = vld [vmem:[#allocation3 + $0x30] ss:$12 sps:$4 sm:$0xff]   ;;  %v4928_v24 = vld [vmem:[#allocation3 + $0x18] ss:$12 sps:$4 sm:$0xff]  }
  0x2c   :  { %3755 = vmatprep.subr.bf16.mxu1 %v6557_v18  ;;  %v4295_v22 = vld [vmem:[%s6501_s0 + $0x18] sm:$0xff]   ;;  %v4930_v25 = vld [vmem:[#allocation3 + $0x80] ss:$12 sps:$4 sm:$0xff]   ;;  %v4933_v26 = vld [vmem:[#allocation3 + $0x4] ss:$12 sps:$4 sm:$0xff]   ;;  %vm3369_vm3 = vcmask 31744  }
  0x2d   :  { %v4939_v27 = vld [vmem:[#allocation3 + $0x68] ss:$12 sps:$4 sm:$0xff]   ;;  %v4941_v28 = vld [vmem:[#allocation3] ss:$12 sps:$4 sm:$0xff]   ;;  %v4950_v29 = vld [vmem:[#allocation3 + $0x50] ss:$12 sps:$4 sm:$0xff]  }
  0x2e   :  { %546 = vmatpush1.bf16.msra.mxu0 %v4874_v7  ;;  %3748 = vmatmul.mubr.msk.bf16.vlgmr.msra.gmra.mxu1 %vm157_vm0, %v4281_v9  ;;  %v4957_v30 = vld [vmem:[#allocation3 + $0x38] ss:$12 sps:$4 sm:$0xff]   ;;  %v4963_v31 = vld [vmem:[#allocation3 + $0x20] ss:$12 sps:$4 sm:$0xff]   ;;  %v4967_v32 = vld [vmem:[#allocation3 + $0x8] ss:$12 sps:$4 sm:$0xff]  }
  0x2f   :  { %547 = vmatprep.subr.bf16.mxu0 %v4878_v8  ;;  %3756 = vmatpush3.bf16.msra.mxu1 %v4903_v16  ;;  %v4976_v33 = vld [vmem:[#allocation7 + $0xac] ss:$12 sps:$4 sm:$0xff]   ;;  %v4978_v34 = vld [vmem:[#allocation7 + $0xa8] ss:$12 sps:$4 sm:$0xff]   ;;  %v4984_v36 = vld [vmem:[#allocation7 + $0x90] ss:$12 sps:$4 sm:$0xff]  }
  0x30   :  { %3757 = vmatprep.subr.bf16.mxu1 %v6557_v18  ;;  %3751 = vmatprep.mubr.msk.bf16.mxu1 %vm157_vm0, %v4288_v15  ;;  %v4982_v35 = vld [vmem:[#allocation7 + $0x94] ss:$12 sps:$4 sm:$0xff]   ;;  %v4987_v37 = vld [vmem:[#allocation7 + $0xb0] ss:$12 sps:$4 sm:$0xff]   ;;  %v4994_v39 = vld [vmem:[#allocation7 + $0x78] ss:$12 sps:$4 sm:$0xff]  }
  0x31   :  { %3385 = vmatmul.mubr.msk.bf16.gmra.mxu0 %vm157_vm0, %v4281_v9  ;;  %v4991_v38 = vld [vmem:[#allocation7 + $0x7c] ss:$12 sps:$4 sm:$0xff]   ;;  %v4997_v40 = vld [vmem:[#allocation7 + $0x98] ss:$12 sps:$4 sm:$0xff]   ;;  %v5004_v42 = vld [vmem:[#allocation7 + $0x60] ss:$12 sps:$4 sm:$0xff]  }
  0x32   :  { %548 = vmatpush1.bf16.msra.mxu0 %v4884_v10  ;;  %222 = vmatprep.mubr.bf16.mxu0 %v6517_v0  ;;  %v5001_v41 = vld [vmem:[#allocation7 + $0x64] ss:$12 sps:$4 sm:$0xff]   ;;  %v5007_v43 = vld [vmem:[#allocation7 + $0x80] ss:$12 sps:$4 sm:$0xff]   ;;  %v5014_v45 = vld [vmem:[#allocation7 + $0x48] ss:$12 sps:$4 sm:$0xff]  }
  0x33   :  { %549 = vmatprep.subr.bf16.mxu0 %v4887_v11  ;;  %3758 = vmatpush3.bf16.msra.mxu1 %v4915_v20  ;;  %v5011_v44 = vld [vmem:[#allocation7 + $0x4c] ss:$12 sps:$4 sm:$0xff]   ;;  %v5017_v46 = vld [vmem:[#allocation7 + $0x68] ss:$12 sps:$4 sm:$0xff]   ;;  %v5024_v48 = vld [vmem:[#allocation7 + $0x30] ss:$12 sps:$4 sm:$0xff]  }
  0x34   :  { %3759 = vmatprep.subr.bf16.mxu1 %v6557_v18  ;;  %v5021_v47 = vld [vmem:[#allocation7 + $0x34] ss:$12 sps:$4 sm:$0xff]   ;;  %6717 = vst [vmem:[#allocation10_spill] sm:$0xff] %v5024_v48  ;;  %v5027_v49 = vld [vmem:[#allocation7 + $0x50] ss:$12 sps:$4 sm:$0xff]  }
  0x35   :  { %v5031_v50 = vld [vmem:[#allocation7 + $0x1c] ss:$12 sps:$4 sm:$0xff]   ;;  %v5034_v51 = vld [vmem:[#allocation7 + $0x18] ss:$12 sps:$4 sm:$0xff]   ;;  %v5044_v54 = vld [vmem:[#allocation7] ss:$12 sps:$4 sm:$0xff]  }
  0x36   :  { %550 = vmatpush1.bf16.msra.mxu0 %v4891_v12  ;;  %3752 = vmatmul.mubr.msk.bf16.gmra.mxu1 %vm157_vm0, %v4295_v22  ;;  %6718 = vst [vmem:[#allocation11_spill] sm:$0xff] %v5031_v50  ;;  %6719 = vst [vmem:[#allocation12_spill] sm:$0xff] %v5034_v51  ;;  %v5037_v52 = vld [vmem:[#allocation7 + $0x38] ss:$12 sps:$4 sm:$0xff]   ;;  %v5047_v55 = vld [vmem:[#allocation7 + $0x20] ss:$12 sps:$4 sm:$0xff]  }
  0x37   :  { %551 = vmatprep.subr.bf16.mxu0 %v4898_v14  ;;  %3760 = vmatpush3.bf16.msra.mxu1 %v4930_v25  ;;  %6720 = vst [vmem:[#allocation13_spill] sm:$0xff] %v5037_v52  ;;  %v5041_v53 = vld [vmem:[#allocation7 + $0x4] ss:$12 sps:$4 sm:$0xff]   ;;  %6722 = vst [vmem:[#allocation15_spill] sm:$0xff] %v5044_v54  ;;  %v5053_v56 = vld [vmem:[#allocation7 + $0x8] ss:$12 sps:$4 sm:$0xff]  }
  0x38   :  { %3761 = vmatprep.subr.bf16.mxu1 %v6557_v18  ;;  %3771 = vmatprep.mubr.msk.bf16.mxu1 %vm4764_vm1, %v6557_v18  ;;  %6721 = vst [vmem:[#allocation14_spill] sm:$0xff] %v5041_v53  ;;  %6723 = vst [vmem:[#allocation16_spill] sm:$0xff] %v5047_v55  ;;  %v5057_v57 = vld [vmem:[#allocation5 + $0xac] ss:$12 sps:$4 sm:$0xff]   ;;  %v5060_v58 = vld [vmem:[#allocation5 + $0xa8] ss:$12 sps:$4 sm:$0xff]  }
  0x39   :  { %3386 = vmatmul.mubr.msk.bf16.gmra.mxu0 %vm157_vm0, %v4288_v15  ;;  %6724 = vst [vmem:[#allocation17_spill] sm:$0xff] %v5053_v56  ;;  %6725 = vst [vmem:[#allocation18_spill] sm:$0xff] %v5057_v57  ;;  %v5062_v59 = vld [vmem:[#allocation5 + $0xb0] ss:$12 sps:$4 sm:$0xff]   ;;  %v5068_v60 = vld [vmem:[#allocation5 + $0x94] ss:$12 sps:$4 sm:$0xff]  }
  0x3a   :  { %552 = vmatpush1.bf16.msra.mxu0 %v4906_v17  ;;  %232 = vmatprep.mubr.bf16.mxu0 %v6517_v0  ;;  %6726 = vst [vmem:[#allocation19_spill] sm:$0xff] %v5060_v58  ;;  %6727 = vst [vmem:[#allocation20_spill] sm:$0xff] %v5062_v59  ;;  %v5073_v61 = vld [vmem:[#allocation5 + $0x90] ss:$12 sps:$4 sm:$0xff]   ;;  %v5075_v62 = vld [vmem:[#allocation5 + $0x98] ss:$12 sps:$4 sm:$0xff]  }
  0x3b   :  { %553 = vmatprep.subr.bf16.mxu0 %v4910_v19  ;;  %3762 = vmatpush3.bf16.msra.mxu1 %v4939_v27  ;;  %6728 = vst [vmem:[#allocation21_spill] sm:$0xff] %v5068_v60  ;;  %6729 = vst [vmem:[#allocation22_spill] sm:$0xff] %v5073_v61  ;;  %v5080_v63 = vld [vmem:[#allocation5 + $0x7c] ss:$12 sps:$4 sm:$0xff]   ;;  %v5083_v1 = vld [vmem:[#allocation5 + $0x78] ss:$12 sps:$4 sm:$0xff]  }
  0x3c   :  { %3763 = vmatprep.subr.bf16.mxu1 %v6557_v18  ;;  %6730 = vst [vmem:[#allocation23_spill] sm:$0xff] %v5075_v62  ;;  %6731 = vst [vmem:[#allocation24_spill] sm:$0xff] %v5080_v63  ;;  %v5085_v2 = vld [vmem:[#allocation5 + $0x80] ss:$12 sps:$4 sm:$0xff]   ;;  %v5090_v3 = vld [vmem:[#allocation5 + $0x64] ss:$12 sps:$4 sm:$0xff]  }
  0x3d   :  { %6732 = vst [vmem:[#allocation25_spill] sm:$0xff] %v5083_v1  ;;  %6733 = vst [vmem:[#allocation26_spill] sm:$0xff] %v5085_v2  ;;  %v5093_v9 = vld [vmem:[#allocation5 + $0x60] ss:$12 sps:$4 sm:$0xff]   ;;  %v5095_v13 = vld [vmem:[#allocation5 + $0x68] ss:$12 sps:$4 sm:$0xff]  }
  0x3e   :  { %554 = vmatpush1.bf16.msra.mxu0 %v4918_v21  ;;  %6734 = vst [vmem:[#allocation27_spill] sm:$0xff] %v5090_v3  ;;  %6735 = vst [vmem:[#allocation28_spill] sm:$0xff] %v5093_v9  ;;  %v5097_v15 = vld [vmem:[#allocation5 + $0x4c] ss:$12 sps:$4 sm:$0xff]  }
  0x3f   :  { %555 = vmatprep.subr.bf16.mxu0 %v4925_v23  ;;  %3764 = vmatpush3.bf16.msra.mxu1 %v4950_v29  ;;  %6736 = vst [vmem:[#allocation29_spill] sm:$0xff] %v5095_v13  ;;  %6737 = vst [vmem:[#allocation30_spill] sm:$0xff] %v5097_v15 }
  0x40   :  { %3765 = vmatprep.subr.bf16.mxu1 %v6557_v18 }
  0x41   :  { %3387 = vmatmul.mubr.msk.bf16.gmra.mxu0 %vm157_vm0, %v4295_v22  ;;  %v5102_v22 = vld [vmem:[#allocation5 + $0x48] ss:$12 sps:$4 sm:$0xff]  }
  0x42   :  { %556 = vmatpush1.bf16.msra.mxu0 %v4928_v24  ;;  %575 = vmatprep.mubr.bf16.mxu0 %v6517_v0  ;;  %6738 = vst [vmem:[#allocation31_spill] sm:$0xff] %v5102_v22 }
  0x43   :  { %557 = vmatprep.subr.bf16.mxu0 %v4933_v26  ;;  %3766 = vmatpush3.bf16.msra.mxu1 %v4957_v30 }
  0x44   :  { %3767 = vmatprep.subr.bf16.mxu1 %v6557_v18 }
  0x46   :  { %558 = vmatpush1.bf16.msra.mxu0 %v4941_v28 }
  0x47   :  { %3768 = vmatpush3.bf16.msra.mxu1 %v4963_v31  ;;  %784 = vmatprep.subr.bf16.mxu0 %v4976_v33 }
  0x48   :  { %3769 = vmatprep.subr.bf16.mxu1 %v6557_v18 }
  0x49   :  { %576 = vmatmul.mubr.bf16.vlgmr.msra.gmra.mxu0 %v6517_v0 }
  0x4a   :  { %816 = vmatprep.mubr.bf16.mxu0 %v6517_v0  ;;  %785 = vmatpush1.bf16.msra.mxu0 %v4978_v34 }
  0x4b   :  { %3770 = vmatpush3.bf16.msra.mxu1 %v4967_v32  ;;  %786 = vmatprep.subr.bf16.mxu0 %v4982_v35 }
  0x4c   :  { %3775 = vmatprep.subr.bf16.mxu1 %v6557_v18 }
  0x4e   :  { %3772 = vmatmul.mubr.bf16.vlgmr.msra.gmra.mxu1 %v6517_v0  ;;  %787 = vmatpush1.bf16.msra.mxu0 %v4984_v36 }
  0x4f   :  { %3791 = vmatprep.mubr.msk.bf16.mxu1 %vm4764_vm1, %v6557_v18  ;;  %3776 = vmatpush3.bf16.msra.mxu1 %v4987_v37 }
  0x50   :  { %3777 = vmatprep.subr.bf16.mxu1 %v6557_v18  ;;  %788 = vmatprep.subr.bf16.mxu0 %v4991_v38 }
  0x52   :  { %789 = vmatpush1.bf16.msra.mxu0 %v4994_v39 }
  0x53   :  { %3778 = vmatpush3.bf16.msra.mxu1 %v4997_v40  ;;  %790 = vmatprep.subr.bf16.mxu0 %v5001_v41 }
  0x54   :  { %3779 = vmatprep.subr.bf16.mxu1 %v6557_v18 }
  0x56   :  { %791 = vmatpush1.bf16.msra.mxu0 %v5004_v42 }
  0x57   :  { %3780 = vmatpush3.bf16.msra.mxu1 %v5007_v43  ;;  %792 = vmatprep.subr.bf16.mxu0 %v5011_v44 }
  0x58   :  { %3781 = vmatprep.subr.bf16.mxu1 %v6557_v18 }
  0x5a   :  { %793 = vmatpush1.bf16.msra.mxu0 %v5014_v45 }
  0x5b   :  { %3782 = vmatpush3.bf16.msra.mxu1 %v5017_v46  ;;  %794 = vmatprep.subr.bf16.mxu0 %v5021_v47 }
  0x5c   :  { %3783 = vmatprep.subr.bf16.mxu1 %v6557_v18 }
  0x5e   :  { %795 = vmatpush1.bf16.msra.mxu0 %v5024_v48 }
  0x5f   :  { %3784 = vmatpush3.bf16.msra.mxu1 %v5027_v49  ;;  %796 = vmatprep.subr.bf16.mxu0 %v5031_v50 }
  0x60   :  { %3785 = vmatprep.subr.bf16.mxu1 %v6557_v18 }
  0x62   :  { %797 = vmatpush1.bf16.msra.mxu0 %v5034_v51 }
  0x63   :  { %3786 = vmatpush3.bf16.msra.mxu1 %v5037_v52  ;;  %798 = vmatprep.subr.bf16.mxu0 %v5041_v53 }
  0x64   :  { %3787 = vmatprep.subr.bf16.mxu1 %v6557_v18 }
  0x66   :  { %799 = vmatpush1.bf16.msra.mxu0 %v5044_v54 }
  0x67   :  { %3788 = vmatpush3.bf16.msra.mxu1 %v5047_v55  ;;  %1049 = vmatprep.subr.bf16.mxu0 %v5057_v57 }
  0x68   :  { %3789 = vmatprep.subr.bf16.mxu1 %v6557_v18 }
  0x69   :  { %817 = vmatmul.mubr.bf16.vlgmr.msra.gmra.mxu0 %v6517_v0 }
  0x6a   :  { %1081 = vmatprep.mubr.bf16.mxu0 %v6517_v0  ;;  %1050 = vmatpush1.bf16.msra.mxu0 %v5060_v58 }
  0x6b   :  { %3790 = vmatpush3.bf16.msra.mxu1 %v5053_v56  ;;  %1051 = vmatprep.subr.bf16.mxu0 %v5068_v60 }
  0x6c   :  { %3795 = vmatprep.subr.bf16.mxu1 %v6557_v18 }
  0x6e   :  { %3792 = vmatmul.mubr.bf16.vlgmr.msra.gmra.mxu1 %v6517_v0  ;;  %1052 = vmatpush1.bf16.msra.mxu0 %v5073_v61  ;;  %v5104_v0 = vld [vmem:[#allocation5 + $0x50] ss:$12 sps:$4 sm:$0xff]  }
  0x6f   :  { %3796 = vmatpush3.bf16.msra.mxu1 %v5062_v59  ;;  %3811 = vmatprep.mubr.msk.bf16.mxu1 %vm4764_vm1, %v6557_v18  ;;  %6739 = vst [vmem:[#allocation32_spill] sm:$0xff] %v5104_v0 }
  0x70   :  { %3797 = vmatprep.subr.bf16.mxu1 %v6557_v18  ;;  %1053 = vmatprep.subr.bf16.mxu0 %v5080_v63 }
  0x72   :  { %1054 = vmatpush1.bf16.msra.mxu0 %v5083_v1  ;;  %v5112_v1 = vld [vmem:[#allocation5 + $0x30] ss:$12 sps:$4 sm:$0xff]  }
  0x73   :  { %3798 = vmatpush3.bf16.msra.mxu1 %v5075_v62  ;;  %1055 = vmatprep.subr.bf16.mxu0 %v5090_v3  ;;  %6741 = vst [vmem:[#allocation34_spill] sm:$0xff] %v5112_v1  ;;  %v5114_v3 = vld [vmem:[#allocation5 + $0x38] ss:$12 sps:$4 sm:$0xff]  }
  0x74   :  { %3799 = vmatprep.subr.bf16.mxu1 %v6557_v18  ;;  %6742 = vst [vmem:[#allocation35_spill] sm:$0xff] %v5114_v3 }
  0x76   :  { %1056 = vmatpush1.bf16.msra.mxu0 %v5093_v9  ;;  %v5124_v9 = vld [vmem:[#allocation5 + $0x20] ss:$12 sps:$4 sm:$0xff]  }
  0x77   :  { %3800 = vmatpush3.bf16.msra.mxu1 %v5085_v2  ;;  %1057 = vmatprep.subr.bf16.mxu0 %v5097_v15  ;;  %v5108_v2 = vld [vmem:[#allocation5 + $0x34] ss:$12 sps:$4 sm:$0xff]   ;;  %v5122_v15 = vld [vmem:[#allocation5 + $0x18] ss:$12 sps:$4 sm:$0xff]   ;;  %6745 = vst [vmem:[#allocation38_spill] sm:$0xff] %v5124_v9 }
  0x78   :  { %3801 = vmatprep.subr.bf16.mxu1 %v6557_v18  ;;  %6740 = vst [vmem:[#allocation33_spill] sm:$0xff] %v5108_v2  ;;  %6744 = vst [vmem:[#allocation37_spill] sm:$0xff] %v5122_v15 }
  0x7a   :  { %1058 = vmatpush1.bf16.msra.mxu0 %v5102_v22  ;;  %v5134_v22 = vld [vmem:[#allocation5 + $0x8] ss:$12 sps:$4 sm:$0xff]  }
  0x7b   :  { %3802 = vmatpush3.bf16.msra.mxu1 %v5095_v13  ;;  %1059 = vmatprep.subr.bf16.mxu0 %v5108_v2  ;;  %v5118_v13 = vld [vmem:[#allocation5 + $0x1c] ss:$12 sps:$4 sm:$0xff]   ;;  %v5132_v2 = vld [vmem:[#allocation5] ss:$12 sps:$4 sm:$0xff]   ;;  %6748 = vst [vmem:[#allocation41_spill] sm:$0xff] %v5134_v22 }
  0x7c   :  { %3803 = vmatprep.subr.bf16.mxu1 %v6557_v18  ;;  %6743 = vst [vmem:[#allocation36_spill] sm:$0xff] %v5118_v13  ;;  %6747 = vst [vmem:[#allocation40_spill] sm:$0xff] %v5132_v2 }
  0x7e   :  { %1060 = vmatpush1.bf16.msra.mxu0 %v5112_v1 }
  0x7f   :  { %3804 = vmatpush3.bf16.msra.mxu1 %v5104_v0  ;;  %1061 = vmatprep.subr.bf16.mxu0 %v5118_v13  ;;  %v5128_v0 = vld [vmem:[#allocation5 + $0x4] ss:$12 sps:$4 sm:$0xff]   ;;  %v106_v13 = vlaneseq }
  0x80   :  { %3805 = vmatprep.subr.bf16.mxu1 %v6557_v18  ;;  %6746 = vst [vmem:[#allocation39_spill] sm:$0xff] %v5128_v0 }
  0x82   :  { %1062 = vmatpush1.bf16.msra.mxu0 %v5122_v15  ;;  %v107_v15 = vshrl.u32 %v106_v13, 7 }
  0x83   :  { %3806 = vmatpush3.bf16.msra.mxu1 %v5114_v3  ;;  %1063 = vmatprep.subr.bf16.mxu0 %v5128_v0 }
  0x84   :  { %3807 = vmatprep.subr.bf16.mxu1 %v6557_v18  ;;  %v5142_v3 = vsub.s32 0, %v107_v15  ;;  %v5154_v61 = vsub.s32 2, %v107_v15 }
  0x86   :  { %1064 = vmatpush1.bf16.msra.mxu0 %v5132_v2  ;;  %6749 = vst [vmem:[#allocation42_spill] sm:$0xff] %v5142_v3  ;;  %v5148_v2 = vsub.s32 1, %v107_v15 }
  0x87   :  { %3808 = vmatpush3.bf16.msra.mxu1 %v5124_v9  ;;  %1151 = vmatprep.subr.bf16.mxu0 %v4864_v4  ;;  %v104_v9 = vld [vmem:[%s6506_s5] sm:$0x7] }
  0x88   :  { %3809 = vmatprep.subr.bf16.mxu1 %v6557_v18  ;;  %v109_v63 = vrot.slane %v104_v9, %v5142_v3  ;;  %v5157_v13 = vrot.slane %v104_v9, %v5148_v2  ;;  %v5165_v56 = vrot.slane %v104_v9, %v5154_v61 }
  0x8b   :  { %3810 = vmatpush3.bf16.msra.mxu1 %v5134_v22 }
  0x8c   :  { %3815 = vmatprep.subr.bf16.mxu1 %v6557_v18 }
  0xe9   :  { %v204_v1 = vpop.f32.mrf.mxu0 }
  0xeb   :  { %v206_v0 = vpop.f32.mrf.mxu0 }
  0xed   :  { %v208_v62 = vpop.f32.mrf.mxu0 }
  0xee   :  { %v5150_v22 = vadd.f32 %v208_v62, %v109_v63  ;;  %v3749_v15 = vpop.f32.mrf.mxu1 }
  0xef   :  { %v5152_v4 = vpop.f32.mrf.mxu0  ;;  %v5173_v53 = vadd.f32 %v3749_v15, %v5165_v56 }
  0xf0   :  { %6750 = vst [vmem:[#allocation43_spill] sm:$0xff] %v5150_v22  ;;  %6751 = vst [vmem:[#allocation44_spill] sm:$0xff] %v5152_v4 }
  0xf1   :  { %v214_v18 = vpop.f32.mrf.mxu0  ;;  %6756 = vst [vmem:[#allocation49_spill] sm:$0xff] %v5173_v53 }
  0xf2   :  { %v5159_v60 = vadd.f32 %v214_v18, %v109_v63 }
  0xf3   :  { %v216_v59 = vpop.f32.mrf.mxu0 }
  0xf4   :  { %6752 = vst [vmem:[#allocation45_spill] sm:$0xff] %v5159_v60  ;;  %v5162_v58 = vadd.f32 %v216_v59, %v5157_v13  ;;  %v277_v60 = vpop.f32.mrf.mxu1 }
  0xf5   :  { %v218_v57 = vpop.f32.mrf.mxu0 }
  0xf6   :  { %6753 = vst [vmem:[#allocation46_spill] sm:$0xff] %v5162_v58  ;;  %v5167_v62 = vadd.f32 %v218_v57, %v109_v63  ;;  %v3750_v9 = vpop.f32.mrf.mxu1 }
  0xf7   :  { %v220_v22 = vpop.f32.mrf.mxu0  ;;  %v5181_v57 = vadd.f32 %v3750_v9, %v5165_v56 }
  0xf8   :  { %6754 = vst [vmem:[#allocation47_spill] sm:$0xff] %v5167_v62  ;;  %v5170_v4 = vadd.f32 %v220_v22, %v5157_v13  ;;  %v280_v22 = vpop.f32.mrf.mxu1 }
  0xf9   :  { %v224_v54 = vpop.f32.mrf.mxu0  ;;  %6759 = vst [vmem:[#allocation52_spill] sm:$0xff] %v5181_v57  ;;  %v5186_v51 = vadd.f32 %v280_v22, %v5165_v56 }
  0xfa   :  { %6755 = vst [vmem:[#allocation48_spill] sm:$0xff] %v5170_v4  ;;  %v5175_v18 = vadd.f32 %v224_v54, %v109_v63  ;;  %v3753_v15 = vpop.f32.mrf.mxu1 }
  0xfb   :  { %v226_v59 = vpop.f32.mrf.mxu0  ;;  %6761 = vst [vmem:[#allocation54_spill] sm:$0xff] %v5186_v51 }
  0xfc   :  { %6757 = vst [vmem:[#allocation50_spill] sm:$0xff] %v5175_v18  ;;  %v5178_v58 = vadd.f32 %v226_v59, %v5157_v13  ;;  %v5192_v59 = vadd.f32 %v3753_v15, %v5165_v56  ;;  %v293_v53 = vpop.f32.mrf.mxu1 }
  0xfd   :  { %v228_v55 = vpop.f32.mrf.mxu0 }
  0xfe   :  { %6758 = vst [vmem:[#allocation51_spill] sm:$0xff] %v5178_v58  ;;  %v5183_v62 = vadd.f32 %v228_v55, %v109_v63  ;;  %6763 = vst [vmem:[#allocation56_spill] sm:$0xff] %v5192_v59  ;;  %v332_v55 = vld [vmem:[%s6507_s6] sm:$0x7] }
  0xff   :  { %v230_v4 = vpop.f32.mrf.mxu0 }
 0x100   :  { %6760 = vst [vmem:[#allocation53_spill] sm:$0xff] %v5183_v62  ;;  %v5189_v54 = vadd.f32 %v230_v4, %v5157_v13  ;;  %v5200_v62 = vadd.f32 %v293_v53, %v5165_v56  ;;  %v3754_v4 = vpop.f32.mrf.mxu1 }
 0x101   :  { %v234_v18 = vpop.f32.mrf.mxu0  ;;  %v5206_v57 = vadd.f32 %v3754_v4, %v5165_v56 }
 0x102   :  { %6762 = vst [vmem:[#allocation55_spill] sm:$0xff] %v5189_v54  ;;  %v5194_v58 = vadd.f32 %v234_v18, %v109_v63  ;;  %6765 = vst [vmem:[#allocation58_spill] sm:$0xff] %v5200_v62  ;;  %v5211_v18 = vrot.slane %v332_v55, %v5142_v3  ;;  %v296_v59 = vpop.f32.mrf.mxu1 }
 0x103   :  { %v236_v9 = vpop.f32.mrf.mxu0  ;;  %6767 = vst [vmem:[#allocation60_spill] sm:$0xff] %v5206_v57  ;;  %v5214_v51 = vadd.f32 %v296_v59, %v5165_v56  ;;  %v207_v59 = vadd.f32 %v206_v0, %v5157_v13 }
 0x104   :  { %6764 = vst [vmem:[#allocation57_spill] sm:$0xff] %v5194_v58  ;;  %v5203_v22 = vadd.f32 %v236_v9, %v5157_v13  ;;  %6769 = vst [vmem:[#allocation62_spill] sm:$0xff] %v5211_v18 }
 0x105   :  { %v238_v54 = vpop.f32.mrf.mxu0  ;;  %6770 = vst [vmem:[#allocation63_spill] sm:$0xff] %v5214_v51 }
 0x106   :  { %6766 = vst [vmem:[#allocation59_spill] sm:$0xff] %v5203_v22  ;;  %v5208_v15 = vadd.f32 %v238_v54, %v109_v63  ;;  %v205_v22 = vadd.f32 %v204_v1, %v109_v63 }
 0x107   :  { %v240_v58 = vpop.f32.mrf.mxu0 }
 0x108   :  { %6768 = vst [vmem:[#allocation61_spill] sm:$0xff] %v5208_v15  ;;  %v5217_v53 = vadd.f32 %v240_v58, %v5157_v13  ;;  %v5221_v15 = vrot.slane %v332_v55, %v5148_v2 }
 0x109   :  { %v577_v9 = vpop.f32.mrf.mxu0 }
 0x10a   :  { %6771 = vst [vmem:[#allocation64_spill] sm:$0xff] %v5217_v53  ;;  %v578_v62 = vadd.f32 %v577_v9, %v5211_v18 }
 0x10b   :  { %v579_v50 = vpop.f32.mrf.mxu0 }
 0x10c   :  { %v868_v4 = vadd.f32 %v578_v62, %v205_v22  ;;  %v580_v52 = vadd.f32 %v579_v50, %v5221_v15  ;;  %v5226_v62 = vrot.slane %v332_v55, %v5154_v61  ;;  %v278_v50 = vadd.f32 %v277_v60, %v5165_v56 }
 0x10d   :  { %v581_v57 = vpop.f32.mrf.mxu0  ;;  %v6772_v56 = vmov 0.0   ;;  %v6773_v60 = vmov 0  }
 0x10e   :  { %v3440_v54 = vmul.f32 -1.442695, %v868_v4  ;;  %v869_v51 = vadd.f32 %v580_v52, %v207_v59  ;;  %v618_v58 = vpop.f32.mrf.mxu1  ;;  %v6783_v59 = vld [vmem:[#allocation42_spill] sm:$0xff] }
 0x10f   :  { %v582_v3 = vpop.f32.mrf.mxu0 }
 0x110   :  { %4385 = vpow2.f32 %v3440_v54  ;;  %v3773_v53 = vpop.f32.mrf.mxu1  ;;  %v3441_v48 = vmul.f32 -1.442695, %v869_v51  ;;  %v619_v3 = vadd.f32 %v618_v58, %v5226_v62 }
 0x112   :  { %v621_v63 = vpop.f32.mrf.mxu1  ;;  %4387 = vpow2.f32 %v3441_v48 }
 0x114   :  { %v3774_v18 = vpop.f32.mrf.mxu1 }
 0x11d   :  { %v4386_v1 = vpop.eup %4385 }
 0x11e   :  { %v876_v9 = vadd.f32 1.0, %v4386_v1 }
 0x11f   :  { %v4388_v57 = vpop.eup %4387 }
 0x120   :  { %4389 = vrcp.f32 %v876_v9  ;;  %v877_v52 = vadd.f32 1.0, %v4388_v57 }
 0x12d   :  { %v4390_v22 = vpop.eup %4389 }
 0x12e   :  { %v882_v0 = vmul.f32 %v4390_v22, %v619_v3 }
 0x130   :  { %v883_v4 = vadd.f32 %v882_v0, %v278_v50 }
 0x132   :  { %4391 = vtanh.f32 %v883_v4 }
 0x133   :  { %4393 = vrcp.f32 %v877_v52 }
 0x13f   :  { %v4392_v51 = vpop.eup %4391 }
 0x140   :  { %v885_v53 = vsub.f32 0.0, %v4392_v51  ;;  %v4394_v54 = vpop.eup %4393 }
 0x142   :  { %v886_v18 = vmul.f32 %v4394_v54, %v885_v53 }
 0x144   :  { %v5230_v48 = vadd.f32 %v4392_v51, %v886_v18 }
 0x146   :  { %v888_v55 = vpack.c.bf16 %v5230_v48, %v5230_v48 }
 0x148   :  { %1082 = vmatmul.mubr.bf16.vlgmr.msra.gmra.mxu0 %v888_v55  ;;  %3812 = vmatmul.mubr.bf16.vlgmr.msra.gmra.mxu1 %v888_v55 }
 0x149   :  { %1152 = vmatpush1.bf16.msra.mxu0 %v4866_v5  ;;  %3816 = vmatpush3.bf16.msra.mxu1 %v4903_v16  ;;  %v818_v5 = vpop.f32.mrf.mxu0  ;;  %v6774_v16 = vld [vmem:[#allocation10_spill] sm:$0xff] }
 0x14a   :  { %1153 = vmatprep.subr.bf16.mxu0 %v4868_v6  ;;  %3817 = vmatprep.subr.bf16.mxu1 %v6772_v56 }
 0x14b   :  { %1183 = vmatprep.mubr.bf16.mxu0 %v6773_v60  ;;  %3831 = vmatprep.mubr.msk.bf16.mxu1 %vm4764_vm1, %v6772_v56  ;;  %v5265_v6 = vpop.f32.mrf.mxu0 }
 0x14d   :  { %1154 = vmatpush1.bf16.msra.mxu0 %v4874_v7  ;;  %3818 = vmatpush3.bf16.msra.mxu1 %v4915_v20  ;;  %v822_v7 = vpop.f32.mrf.mxu0  ;;  %v6777_v20 = vld [vmem:[#allocation12_spill] sm:$0xff] }
 0x14e   :  { %1155 = vmatprep.subr.bf16.mxu0 %v4878_v8  ;;  %3819 = vmatprep.subr.bf16.mxu1 %v6772_v56  ;;  %v5271_v8 = vpop.f32.mrf.mxu1 }
 0x151   :  { %1156 = vmatpush1.bf16.msra.mxu0 %v4884_v10  ;;  %3820 = vmatpush3.bf16.msra.mxu1 %v4930_v25  ;;  %v823_v10 = vpop.f32.mrf.mxu0  ;;  %v6781_v25 = vld [vmem:[#allocation17_spill] sm:$0xff] }
 0x152   :  { %1157 = vmatprep.subr.bf16.mxu0 %v4887_v11  ;;  %3821 = vmatprep.subr.bf16.mxu1 %v6772_v56  ;;  %v3793_v11 = vpop.f32.mrf.mxu1 }
 0x155   :  { %1158 = vmatpush1.bf16.msra.mxu0 %v4891_v12  ;;  %3822 = vmatpush3.bf16.msra.mxu1 %v4939_v27  ;;  %v862_v12 = vpop.f32.mrf.mxu1  ;;  %v366_v27 = vld [vmem:[%s6509_s8] sm:$0x7] }
 0x156   :  { %1159 = vmatprep.subr.bf16.mxu0 %v4898_v14  ;;  %3823 = vmatprep.subr.bf16.mxu1 %v6772_v56  ;;  %v5315_v58 = vrot.slane %v366_v27, %v6783_v59 }
 0x157   :  { %v3794_v14 = vpop.f32.mrf.mxu1 }
 0x158   :  { %v819_v3 = vadd.f32 %v818_v5, %v5315_v58 }
 0x159   :  { %1160 = vmatpush1.bf16.msra.mxu0 %v4906_v17  ;;  %3824 = vmatpush3.bf16.msra.mxu1 %v4950_v29  ;;  %v6775_v17 = vld [vmem:[#allocation13_spill] sm:$0xff] }
 0x15a   :  { %1161 = vmatprep.subr.bf16.mxu0 %v4910_v19  ;;  %3825 = vmatprep.subr.bf16.mxu1 %v6772_v56  ;;  %v6776_v19 = vld [vmem:[#allocation11_spill] sm:$0xff] }
 0x15d   :  { %1162 = vmatpush1.bf16.msra.mxu0 %v4918_v21  ;;  %3826 = vmatpush3.bf16.msra.mxu1 %v4957_v30  ;;  %v6778_v21 = vld [vmem:[#allocation16_spill] sm:$0xff] }
 0x15e   :  { %1163 = vmatprep.subr.bf16.mxu0 %v4925_v23  ;;  %3827 = vmatprep.subr.bf16.mxu1 %v6772_v56  ;;  %v6779_v23 = vld [vmem:[#allocation14_spill] sm:$0xff] }
 0x161   :  { %1164 = vmatpush1.bf16.msra.mxu0 %v4928_v24  ;;  %3828 = vmatpush3.bf16.msra.mxu1 %v4963_v31  ;;  %v6780_v24 = vld [vmem:[#allocation15_spill] sm:$0xff] }
 0x162   :  { %1165 = vmatprep.subr.bf16.mxu0 %v4933_v26  ;;  %3829 = vmatprep.subr.bf16.mxu1 %v6772_v56  ;;  %v6782_v26 = vld [vmem:[#allocation18_spill] sm:$0xff] }
 0x165   :  { %1166 = vmatpush1.bf16.msra.mxu0 %v4941_v28  ;;  %3830 = vmatpush3.bf16.msra.mxu1 %v4967_v32  ;;  %v349_v28 = vld [vmem:[%s6508_s7] sm:$0x7] }
 0x166   :  { %1232 = vmatprep.subr.bf16.mxu0 %v4976_v33  ;;  %3835 = vmatprep.subr.bf16.mxu1 %v6772_v56  ;;  %v5318_v63 = vrot.slane %v349_v28, %v6783_v59  ;;  %v5323_v53 = vrot.slane %v349_v28, %v5148_v2  ;;  %v5332_v59 = vrot.slane %v366_v27, %v5154_v61 }
 0x168   :  { %1184 = vmatmul.mubr.bf16.vlgmr.msra.gmra.mxu0 %v888_v55  ;;  %3832 = vmatmul.mubr.bf16.vlgmr.msra.gmra.mxu1 %v888_v55  ;;  %v5326_v55 = vrot.slane %v366_v27, %v5148_v2  ;;  %6785 = vst [vmem:[#allocation13_spill] sm:$0xff] %v5332_v59  ;;  %v6786_v2 = vld [vmem:[#allocation62_spill] sm:$0xff] }
 0x169   :  { %1233 = vmatpush1.bf16.msra.mxu0 %v4978_v34  ;;  %3836 = vmatpush3.bf16.msra.mxu1 %v4987_v37 }
 0x16a   :  { %1234 = vmatprep.subr.bf16.mxu0 %v4982_v35  ;;  %3837 = vmatprep.subr.bf16.mxu1 %v6772_v56  ;;  %6784 = vst [vmem:[#allocation10_spill] sm:$0xff] %v5326_v55  ;;  %v821_v5 = vadd.f32 %v5265_v6, %v5326_v55  ;;  %v860_v6 = vadd.f32 %v5271_v8, %v5332_v59  ;;  %v6788_v8 = vld [vmem:[#allocation44_spill] sm:$0xff] }
 0x16b   :  { %1264 = vmatprep.mubr.bf16.mxu0 %v6773_v60  ;;  %3851 = vmatprep.mubr.msk.bf16.mxu1 %vm4764_vm1, %v6772_v56 }
 0x16d   :  { %1235 = vmatpush1.bf16.msra.mxu0 %v4984_v36  ;;  %3838 = vmatpush3.bf16.msra.mxu1 %v4997_v40 }
 0x16e   :  { %1236 = vmatprep.subr.bf16.mxu0 %v4991_v38  ;;  %3839 = vmatprep.subr.bf16.mxu1 %v6772_v56 }
 0x171   :  { %1237 = vmatpush1.bf16.msra.mxu0 %v4994_v39  ;;  %3840 = vmatpush3.bf16.msra.mxu1 %v5007_v43 }
 0x172   :  { %1238 = vmatprep.subr.bf16.mxu0 %v5001_v41  ;;  %3841 = vmatprep.subr.bf16.mxu1 %v6772_v56 }
 0x175   :  { %1239 = vmatpush1.bf16.msra.mxu0 %v5004_v42  ;;  %3842 = vmatpush3.bf16.msra.mxu1 %v5017_v46 }
 0x176   :  { %1240 = vmatprep.subr.bf16.mxu0 %v5011_v44  ;;  %3843 = vmatprep.subr.bf16.mxu1 %v6772_v56 }
 0x179   :  { %1241 = vmatpush1.bf16.msra.mxu0 %v5014_v45  ;;  %3844 = vmatpush3.bf16.msra.mxu1 %v5027_v49 }
 0x17a   :  { %1242 = vmatprep.subr.bf16.mxu0 %v5021_v47  ;;  %3845 = vmatprep.subr.bf16.mxu1 %v6772_v56 }
 0x17d   :  { %1243 = vmatpush1.bf16.msra.mxu0 %v6774_v16  ;;  %3846 = vmatpush3.bf16.msra.mxu1 %v6775_v17 }
 0x17e   :  { %1244 = vmatprep.subr.bf16.mxu0 %v6776_v19  ;;  %3847 = vmatprep.subr.bf16.mxu1 %v6772_v56 }
 0x181   :  { %1245 = vmatpush1.bf16.msra.mxu0 %v6777_v20  ;;  %3848 = vmatpush3.bf16.msra.mxu1 %v6778_v21 }
 0x182   :  { %1246 = vmatprep.subr.bf16.mxu0 %v6779_v23  ;;  %3849 = vmatprep.subr.bf16.mxu1 %v6772_v56 }
 0x185   :  { %1247 = vmatpush1.bf16.msra.mxu0 %v6780_v24  ;;  %3850 = vmatpush3.bf16.msra.mxu1 %v6781_v25 }
 0x186   :  { %1337 = vmatprep.subr.bf16.mxu0 %v6782_v26  ;;  %3855 = vmatprep.subr.bf16.mxu1 %v6772_v56 }
 0x208   :  { %v1083_v1 = vpop.f32.mrf.mxu0  ;;  %v1124_v9 = vpop.f32.mrf.mxu1 }
 0x209   :  { %v1084_v57 = vadd.f32 %v1083_v1, %v5318_v63 }
 0x20a   :  { %v1085_v22 = vpop.f32.mrf.mxu0  ;;  %v3813_v50 = vpop.f32.mrf.mxu1 }
 0x20b   :  { %v1130_v0 = vadd.f32 %v1084_v57, %v819_v3  ;;  %v1086_v7 = vadd.f32 %v1085_v22, %v5323_v53  ;;  %v5335_v57 = vrot.slane %v349_v28, %v5154_v61 }
 0x20c   :  { %v1087_v52 = vpop.f32.mrf.mxu0  ;;  %v1127_v4 = vpop.f32.mrf.mxu1 }
 0x20d   :  { %v3466_v51 = vmul.f32 -1.442695, %v1130_v0  ;;  %v1131_v10 = vadd.f32 %v1086_v7, %v821_v5  ;;  %v6787_v4 = vld [vmem:[#allocation43_spill] sm:$0xff]  ;;  %v1125_v27 = vadd.f32 %v1124_v9, %v5335_v57 }
 0x20e   :  { %v1088_v54 = vpop.f32.mrf.mxu0  ;;  %v3814_v18 = vpop.f32.mrf.mxu1 }
 0x20f   :  { %4395 = vpow2.f32 %v3466_v51  ;;  %v3467_v11 = vmul.f32 -1.442695, %v1131_v10 }
 0x211   :  { %4397 = vpow2.f32 %v3467_v11 }
 0x21c   :  { %v4396_v12 = vpop.eup %4395 }
 0x21d   :  { %v1138_v14 = vadd.f32 1.0, %v4396_v12 }
 0x21e   :  { %v4398_v52 = vpop.eup %4397 }
 0x21f   :  { %4399 = vrcp.f32 %v1138_v14  ;;  %v1139_v12 = vadd.f32 1.0, %v4398_v52 }
 0x228   :  { %v1185_v1 = vpop.f32.mrf.mxu0  ;;  %v1226_v3 = vpop.f32.mrf.mxu1 }
 0x229   :  { %v1186_v50 = vadd.f32 %v1185_v1, %v6786_v2  ;;  %v211_v1 = vadd.f32 %v6788_v8, %v5157_v13  ;;  %v6790_v13 = vld [vmem:[#allocation20_spill] sm:$0xff]  ;;  %v6795_v8 = vld [vmem:[#allocation54_spill] sm:$0xff] }
 0x22a   :  { %v1187_v22 = vpop.f32.mrf.mxu0  ;;  %v3833_v0 = vpop.f32.mrf.mxu1 }
 0x22b   :  { %v1316_v51 = vadd.f32 %v1186_v50, %v6787_v4  ;;  %v1188_v14 = vadd.f32 %v1187_v22, %v5221_v15  ;;  %v6789_v22 = vld [vmem:[#allocation19_spill] sm:$0xff] }
 0x22c   :  { %v4400_v54 = vpop.eup %4399  ;;  %v1189_v18 = vpop.f32.mrf.mxu0 }
 0x22d   :  { %v1229_v7 = vpop.f32.mrf.mxu1  ;;  %v1144_v5 = vmul.f32 %v4400_v54, %v860_v6  ;;  %v3468_v10 = vmul.f32 -1.442695, %v1316_v51  ;;  %v1317_v50 = vadd.f32 %v1188_v14, %v211_v1  ;;  %v6794_v14 = vld [vmem:[#allocation24_spill] sm:$0xff] }
 0x22e   :  { %v1190_v11 = vpop.f32.mrf.mxu0 }
 0x22f   :  { %v3834_v61 = vpop.f32.mrf.mxu1  ;;  %v1145_v28 = vadd.f32 %v1144_v5, %v1125_v27  ;;  %4401 = vpow2.f32 %v3468_v10  ;;  %v3469_v0 = vmul.f32 -1.442695, %v1317_v50  ;;  %v6791_v27 = vld [vmem:[#allocation21_spill] sm:$0xff]  ;;  %v1227_v10 = vadd.f32 %v1226_v3, %v5226_v62  ;;  %v6799_v3 = vld [vmem:[#allocation28_spill] sm:$0xff] }
 0x230   :  { %v6792_v61 = vld [vmem:[#allocation22_spill] sm:$0xff] }
 0x231   :  { %4403 = vtanh.f32 %v1145_v28  ;;  %v6793_v28 = vld [vmem:[#allocation23_spill] sm:$0xff] }
 0x232   :  { %4405 = vrcp.f32 %v1139_v12 }
 0x233   :  { %4407 = vpow2.f32 %v3469_v0  ;;  %v6796_v0 = vld [vmem:[#allocation25_spill] sm:$0xff] }
 0x23c   :  { %v4402_v4 = vpop.eup %4401 }
 0x23d   :  { %v1324_v18 = vadd.f32 1.0, %v4402_v4  ;;  %v6797_v4 = vld [vmem:[#allocation26_spill] sm:$0xff] }
 0x23e   :  { %v4404_v7 = vpop.eup %4403 }
 0x23f   :  { %4409 = vrcp.f32 %v1324_v18  ;;  %v1147_v9 = vsub.f32 0.0, %v4404_v7  ;;  %v4406_v6 = vpop.eup %4405  ;;  %v6798_v18 = vld [vmem:[#allocation27_spill] sm:$0xff] }
 0x240   :  { %v4408_v5 = vpop.eup %4407 }
 0x241   :  { %v1148_v51 = vmul.f32 %v4406_v6, %v1147_v9  ;;  %v1325_v50 = vadd.f32 1.0, %v4408_v5  ;;  %v6801_v9 = vld [vmem:[#allocation30_spill] sm:$0xff]  ;;  %v6802_v6 = vld [vmem:[#allocation31_spill] sm:$0xff] }
 0x242   :  { %v6805_v5 = vld [vmem:[#allocation34_spill] sm:$0xff] }
 0x243   :  { %v5345_v54 = vadd.f32 %v4404_v7, %v1148_v51  ;;  %v6800_v7 = vld [vmem:[#allocation29_spill] sm:$0xff]  ;;  %v6803_v51 = vld [vmem:[#allocation32_spill] sm:$0xff] }
 0x245   :  { %v1150_v52 = vpack.c.bf16 %v5345_v54, %v5345_v54 }
 0x247   :  { %1265 = vmatmul.mubr.bf16.vlgmr.msra.gmra.mxu0 %v1150_v52  ;;  %3852 = vmatmul.mubr.bf16.vlgmr.msra.gmra.mxu1 %v1150_v52  ;;  %v6804_v52 = vld [vmem:[#allocation33_spill] sm:$0xff] }
 0x248   :  { %1338 = vmatpush1.bf16.msra.mxu0 %v6789_v22  ;;  %3856 = vmatpush3.bf16.msra.mxu1 %v6790_v13 }
 0x249   :  { %1339 = vmatprep.subr.bf16.mxu0 %v6791_v27  ;;  %3857 = vmatprep.subr.bf16.mxu1 %v6772_v56 }
 0x24a   :  { %1369 = vmatprep.mubr.bf16.mxu0 %v6773_v60  ;;  %3871 = vmatprep.mubr.msk.bf16.mxu1 %vm4764_vm1, %v6772_v56 }
 0x24c   :  { %v4410_v11 = vpop.eup %4409  ;;  %1340 = vmatpush1.bf16.msra.mxu0 %v6792_v61  ;;  %3858 = vmatpush3.bf16.msra.mxu1 %v6793_v28 }
 0x24d   :  { %v1330_v12 = vmul.f32 %v4410_v11, %v1227_v10  ;;  %1341 = vmatprep.subr.bf16.mxu0 %v6794_v14  ;;  %3859 = vmatprep.subr.bf16.mxu1 %v6772_v56  ;;  %v6806_v10 = vld [vmem:[#allocation35_spill] sm:$0xff]  ;;  %v6807_v11 = vld [vmem:[#allocation36_spill] sm:$0xff] }
 0x24f   :  { %v1331_v1 = vadd.f32 %v1330_v12, %v6795_v8 }
 0x250   :  { %1342 = vmatpush1.bf16.msra.mxu0 %v6796_v0  ;;  %3860 = vmatpush3.bf16.msra.mxu1 %v6797_v4 }
 0x251   :  { %4411 = vtanh.f32 %v1331_v1  ;;  %1343 = vmatprep.subr.bf16.mxu0 %v6798_v18  ;;  %3861 = vmatprep.subr.bf16.mxu1 %v6772_v56 }
 0x252   :  { %4413 = vrcp.f32 %v1325_v50  ;;  %v6808_v50 = vld [vmem:[#allocation37_spill] sm:$0xff] }
 0x254   :  { %1344 = vmatpush1.bf16.msra.mxu0 %v6799_v3  ;;  %3862 = vmatpush3.bf16.msra.mxu1 %v6800_v7 }
 0x255   :  { %1345 = vmatprep.subr.bf16.mxu0 %v6801_v9  ;;  %3863 = vmatprep.subr.bf16.mxu1 %v6772_v56 }
 0x258   :  { %1346 = vmatpush1.bf16.msra.mxu0 %v6802_v6  ;;  %3864 = vmatpush3.bf16.msra.mxu1 %v6803_v51  ;;  %v6809_v6 = vld [vmem:[#allocation38_spill] sm:$0xff]  ;;  %v6810_v51 = vld [vmem:[#allocation39_spill] sm:$0xff] }
 0x259   :  { %1347 = vmatprep.subr.bf16.mxu0 %v6804_v52  ;;  %3865 = vmatprep.subr.bf16.mxu1 %v6772_v56 }
 0x25c   :  { %1348 = vmatpush1.bf16.msra.mxu0 %v6805_v5  ;;  %3866 = vmatpush3.bf16.msra.mxu1 %v6806_v10  ;;  %v6811_v10 = vld [vmem:[#allocation40_spill] sm:$0xff] }
 0x25d   :  { %1349 = vmatprep.subr.bf16.mxu0 %v6807_v11  ;;  %3867 = vmatprep.subr.bf16.mxu1 %v6772_v56  ;;  %v6812_v11 = vld [vmem:[#allocation41_spill] sm:$0xff] }
 0x25e   :  { %v4412_v12 = vpop.eup %4411 }
 0x25f   :  { %v1333_v8 = vsub.f32 %v5230_v48, %v4412_v12  ;;  %v4414_v1 = vpop.eup %4413  ;;  %v5389_v48 = vld [vmem:[#allocation3 + $0xac] ss:$12 sps:$4 sm:$0xff]  }
 0x260   :  { %1350 = vmatpush1.bf16.msra.mxu0 %v6808_v50  ;;  %3868 = vmatpush3.bf16.msra.mxu1 %v6809_v6  ;;  %6813 = vst [vmem:[#allocation11_spill] sm:$0xff] %v5389_v48 }
 0x261   :  { %1351 = vmatprep.subr.bf16.mxu0 %v6810_v51  ;;  %3869 = vmatprep.subr.bf16.mxu1 %v6772_v56  ;;  %v1334_v52 = vmul.f32 %v4414_v1, %v1333_v8  ;;  %v5393_v51 = vld [vmem:[#allocation3 + $0xa8] ss:$12 sps:$4 sm:$0xff]   ;;  %v5406_v8 = vld [vmem:[#allocation3 + $0x90] ss:$12 sps:$4 sm:$0xff]   ;;  %v5409_v1 = vld [vmem:[#allocation3 + $0x98] ss:$12 sps:$4 sm:$0xff]  }
 0x262   :  { %6814 = vst [vmem:[#allocation12_spill] sm:$0xff] %v5393_v51  ;;  %6817 = vst [vmem:[#allocation15_spill] sm:$0xff] %v5406_v8 }
 0x263   :  { %v5383_v5 = vadd.f32 %v4412_v12, %v1334_v52  ;;  %v5396_v52 = vld [vmem:[#allocation3 + $0xb0] ss:$12 sps:$4 sm:$0xff]   ;;  %v5399_v12 = vld [vmem:[#allocation3 + $0x94] ss:$12 sps:$4 sm:$0xff]   ;;  %6818 = vst [vmem:[#allocation17_spill] sm:$0xff] %v5409_v1 }
 0x264   :  { %1352 = vmatpush1.bf16.msra.mxu0 %v6811_v10  ;;  %3870 = vmatpush3.bf16.msra.mxu1 %v6812_v11  ;;  %6815 = vst [vmem:[#allocation16_spill] sm:$0xff] %v5396_v52  ;;  %6816 = vst [vmem:[#allocation14_spill] sm:$0xff] %v5399_v12 }
 0x265   :  { %v1336_v9 = vpack.c.bf16 %v5383_v5, %v5383_v5  ;;  %1439 = vmatprep.subr.bf16.mxu0 %v5389_v48  ;;  %3875 = vmatprep.subr.bf16.mxu1 %v6772_v56  ;;  %v5422_v48 = vld [vmem:[#allocation3 + $0x64] ss:$12 sps:$4 sm:$0xff]  }
 0x266   :  { %6821 = vst [vmem:[#allocation62_spill] sm:$0xff] %v5422_v48 }
 0x267   :  { %1370 = vmatmul.mubr.bf16.vlgmr.msra.gmra.mxu0 %v1336_v9  ;;  %3872 = vmatmul.mubr.bf16.vlgmr.msra.gmra.mxu1 %v1336_v9 }
 0x268   :  { %1440 = vmatpush1.bf16.msra.mxu0 %v5393_v51  ;;  %3876 = vmatpush3.bf16.msra.mxu1 %v5396_v52  ;;  %v5412_v52 = vld [vmem:[#allocation3 + $0x7c] ss:$12 sps:$4 sm:$0xff]   ;;  %v5419_v51 = vld [vmem:[#allocation3 + $0x80] ss:$12 sps:$4 sm:$0xff]  }
 0x269   :  { %1441 = vmatprep.subr.bf16.mxu0 %v5399_v12  ;;  %3877 = vmatprep.subr.bf16.mxu1 %v6772_v56  ;;  %6819 = vst [vmem:[#allocation18_spill] sm:$0xff] %v5412_v52  ;;  %v5416_v12 = vld [vmem:[#allocation3 + $0x78] ss:$12 sps:$4 sm:$0xff]   ;;  %6820 = vst [vmem:[#allocation42_spill] sm:$0xff] %v5419_v51 }
 0x26a   :  { %1471 = vmatprep.mubr.bf16.mxu0 %v6773_v60  ;;  %3891 = vmatprep.mubr.msk.bf16.mxu1 %vm4764_vm1, %v6772_v56 }
 0x26c   :  { %1442 = vmatpush1.bf16.msra.mxu0 %v5406_v8  ;;  %3878 = vmatpush3.bf16.msra.mxu1 %v5409_v1  ;;  %v5426_v1 = vld [vmem:[#allocation3 + $0x60] ss:$12 sps:$4 sm:$0xff]  }
 0x26d   :  { %1443 = vmatprep.subr.bf16.mxu0 %v5412_v52  ;;  %3879 = vmatprep.subr.bf16.mxu1 %v6772_v56  ;;  %6822 = vst [vmem:[#allocation43_spill] sm:$0xff] %v5426_v1  ;;  %v5429_v52 = vld [vmem:[#allocation3 + $0x68] ss:$12 sps:$4 sm:$0xff]   ;;  %v5432_v8 = vld [vmem:[#allocation3 + $0x4c] ss:$12 sps:$4 sm:$0xff]  }
 0x26e   :  { %6823 = vst [vmem:[#allocation44_spill] sm:$0xff] %v5432_v8 }
 0x270   :  { %1444 = vmatpush1.bf16.msra.mxu0 %v5416_v12  ;;  %3880 = vmatpush3.bf16.msra.mxu1 %v5419_v51  ;;  %v5436_v51 = vld [vmem:[#allocation3 + $0x48] ss:$12 sps:$4 sm:$0xff]  }
 0x271   :  { %1445 = vmatprep.subr.bf16.mxu0 %v5422_v48  ;;  %3881 = vmatprep.subr.bf16.mxu1 %v6772_v56  ;;  %6824 = vst [vmem:[#allocation19_spill] sm:$0xff] %v5436_v51  ;;  %v5440_v48 = vld [vmem:[#allocation3 + $0x34] ss:$12 sps:$4 sm:$0xff]  }
 0x274   :  { %1446 = vmatpush1.bf16.msra.mxu0 %v5426_v1  ;;  %3882 = vmatpush3.bf16.msra.mxu1 %v5429_v52  ;;  %v5444_v1 = vld [vmem:[#allocation3 + $0x30] ss:$12 sps:$4 sm:$0xff]  }
 0x275   :  { %1447 = vmatprep.subr.bf16.mxu0 %v5432_v8  ;;  %3883 = vmatprep.subr.bf16.mxu1 %v6772_v56  ;;  %6825 = vst [vmem:[#allocation20_spill] sm:$0xff] %v5444_v1  ;;  %v5448_v8 = vld [vmem:[#allocation3 + $0x1c] ss:$12 sps:$4 sm:$0xff]  }
 0x278   :  { %1448 = vmatpush1.bf16.msra.mxu0 %v5436_v51  ;;  %3884 = vmatpush3.bf16.msra.mxu1 %v4950_v29  ;;  %v5452_v51 = vld [vmem:[#allocation3 + $0x18] ss:$12 sps:$4 sm:$0xff]  }
 0x279   :  { %1449 = vmatprep.subr.bf16.mxu0 %v5440_v48  ;;  %3885 = vmatprep.subr.bf16.mxu1 %v6772_v56  ;;  %v5456_v29 = vld [vmem:[#allocation3 + $0x4] ss:$12 sps:$4 sm:$0xff]  }
 0x27c   :  { %1450 = vmatpush1.bf16.msra.mxu0 %v5444_v1  ;;  %3886 = vmatpush3.bf16.msra.mxu1 %v4957_v30  ;;  %v5460_v1 = vld [vmem:[#allocation3] ss:$12 sps:$4 sm:$0xff]  }
 0x27d   :  { %1451 = vmatprep.subr.bf16.mxu0 %v5448_v8  ;;  %3887 = vmatprep.subr.bf16.mxu1 %v6772_v56 }
 0x280   :  { %1452 = vmatpush1.bf16.msra.mxu0 %v5452_v51  ;;  %3888 = vmatpush3.bf16.msra.mxu1 %v4963_v31 }
 0x281   :  { %1453 = vmatprep.subr.bf16.mxu0 %v5456_v29  ;;  %3889 = vmatprep.subr.bf16.mxu1 %v6772_v56 }
 0x284   :  { %1454 = vmatpush1.bf16.msra.mxu0 %v5460_v1  ;;  %3890 = vmatpush3.bf16.msra.mxu1 %v4967_v32 }
 0x285   :  { %1520 = vmatprep.subr.bf16.mxu0 %v4976_v33  ;;  %3895 = vmatprep.subr.bf16.mxu1 %v6772_v56 }
 0x287   :  { %1472 = vmatmul.mubr.bf16.vlgmr.msra.gmra.mxu0 %v1336_v9  ;;  %3892 = vmatmul.mubr.bf16.vlgmr.msra.gmra.mxu1 %v1336_v9 }
 0x288   :  { %1521 = vmatpush1.bf16.msra.mxu0 %v4978_v34  ;;  %3896 = vmatpush3.bf16.msra.mxu1 %v4987_v37 }
 0x289   :  { %1522 = vmatprep.subr.bf16.mxu0 %v4982_v35  ;;  %3897 = vmatprep.subr.bf16.mxu1 %v6772_v56 }
 0x28a   :  { %1552 = vmatprep.mubr.bf16.mxu0 %v6773_v60  ;;  %3911 = vmatprep.mubr.msk.bf16.mxu1 %vm4764_vm1, %v6772_v56 }
 0x28c   :  { %1523 = vmatpush1.bf16.msra.mxu0 %v4984_v36  ;;  %3898 = vmatpush3.bf16.msra.mxu1 %v4997_v40 }
 0x28d   :  { %1524 = vmatprep.subr.bf16.mxu0 %v4991_v38  ;;  %3899 = vmatprep.subr.bf16.mxu1 %v6772_v56 }
 0x290   :  { %1525 = vmatpush1.bf16.msra.mxu0 %v4994_v39  ;;  %3900 = vmatpush3.bf16.msra.mxu1 %v5007_v43 }
 0x291   :  { %1526 = vmatprep.subr.bf16.mxu0 %v5001_v41  ;;  %3901 = vmatprep.subr.bf16.mxu1 %v6772_v56 }
 0x294   :  { %1527 = vmatpush1.bf16.msra.mxu0 %v5004_v42  ;;  %3902 = vmatpush3.bf16.msra.mxu1 %v5017_v46 }
 0x295   :  { %1528 = vmatprep.subr.bf16.mxu0 %v5011_v44  ;;  %3903 = vmatprep.subr.bf16.mxu1 %v6772_v56 }
 0x298   :  { %1529 = vmatpush1.bf16.msra.mxu0 %v5014_v45  ;;  %3904 = vmatpush3.bf16.msra.mxu1 %v5027_v49 }
 0x299   :  { %1530 = vmatprep.subr.bf16.mxu0 %v5021_v47  ;;  %3905 = vmatprep.subr.bf16.mxu1 %v6772_v56 }
 0x29c   :  { %1531 = vmatpush1.bf16.msra.mxu0 %v6774_v16  ;;  %3906 = vmatpush3.bf16.msra.mxu1 %v6775_v17 }
 0x29d   :  { %1532 = vmatprep.subr.bf16.mxu0 %v6776_v19  ;;  %3907 = vmatprep.subr.bf16.mxu1 %v6772_v56 }
 0x2a0   :  { %1533 = vmatpush1.bf16.msra.mxu0 %v6777_v20  ;;  %3908 = vmatpush3.bf16.msra.mxu1 %v6778_v21 }
 0x2a1   :  { %1534 = vmatprep.subr.bf16.mxu0 %v6779_v23  ;;  %3909 = vmatprep.subr.bf16.mxu1 %v6772_v56 }
 0x2a4   :  { %1535 = vmatpush1.bf16.msra.mxu0 %v6780_v24  ;;  %3910 = vmatpush3.bf16.msra.mxu1 %v6781_v25 }
 0x2a5   :  { %1625 = vmatprep.subr.bf16.mxu0 %v6782_v26  ;;  %3915 = vmatprep.subr.bf16.mxu1 %v6772_v56 }
 0x307   :  { %v1266_v30 = vpop.f32.mrf.mxu0  ;;  %v1307_v31 = vpop.f32.mrf.mxu1 }
 0x308   :  { %v1267_v40 = vadd.f32 %v1266_v30, %v5315_v58 }
 0x309   :  { %v1268_v32 = vpop.f32.mrf.mxu0  ;;  %v3853_v33 = vpop.f32.mrf.mxu1 }
 0x30a   :  { %v1269_v19 = vadd.f32 %v1268_v32, %v5326_v55 }
 0x30b   :  { %v1270_v34 = vpop.f32.mrf.mxu0  ;;  %v1310_v35 = vpop.f32.mrf.mxu1 }
 0x30c   :  { %v1308_v35 = vadd.f32 %v1307_v31, %v5332_v59 }
 0x30d   :  { %v1271_v36 = vpop.f32.mrf.mxu0  ;;  %v3854_v37 = vpop.f32.mrf.mxu1 }
 0x30e   :  { %v6826_v36 = vld [vmem:[#allocation45_spill] sm:$0xff] }
 0x327   :  { %v1371_v38 = vpop.f32.mrf.mxu0  ;;  %v1412_v39 = vpop.f32.mrf.mxu1 }
 0x328   :  { %v1372_v41 = vadd.f32 %v1371_v38, %v5318_v63 }
 0x329   :  { %v1373_v42 = vpop.f32.mrf.mxu0  ;;  %v3873_v43 = vpop.f32.mrf.mxu1 }
 0x32a   :  { %v1418_v44 = vadd.f32 %v1372_v41, %v1267_v40  ;;  %v1374_v17 = vadd.f32 %v1373_v42, %v5323_v53  ;;  %v1413_v41 = vadd.f32 %v1412_v39, %v5335_v57 }
 0x32b   :  { %v1375_v45 = vpop.f32.mrf.mxu0  ;;  %v1415_v46 = vpop.f32.mrf.mxu1 }
 0x32c   :  { %v3470_v47 = vmul.f32 -1.442695, %v1418_v44  ;;  %v1419_v20 = vadd.f32 %v1374_v17, %v1269_v19 }
 0x32d   :  { %v1376_v49 = vpop.f32.mrf.mxu0  ;;  %v3874_v16 = vpop.f32.mrf.mxu1 }
 0x32e   :  { %4415 = vpow2.f32 %v3470_v47  ;;  %v3471_v21 = vmul.f32 -1.442695, %v1419_v20  ;;  %v6827_v16 = vld [vmem:[#allocation46_spill] sm:$0xff] }
 0x330   :  { %4417 = vpow2.f32 %v3471_v21 }
 0x33b   :  { %v4416_v23 = vpop.eup %4415 }
 0x33c   :  { %v1426_v24 = vadd.f32 1.0, %v4416_v23 }
 0x33d   :  { %v4418_v34 = vpop.eup %4417 }
 0x33e   :  { %4419 = vrcp.f32 %v1426_v24  ;;  %v1427_v47 = vadd.f32 1.0, %v4418_v34 }
 0x347   :  { %v1473_v25 = vpop.f32.mrf.mxu0  ;;  %v1514_v26 = vpop.f32.mrf.mxu1 }
 0x348   :  { %v1474_v9 = vadd.f32 %v1473_v25, %v6786_v2 }
 0x349   :  { %v1475_v30 = vpop.f32.mrf.mxu0  ;;  %v3893_v33 = vpop.f32.mrf.mxu1 }
 0x34a   :  { %v1604_v37 = vadd.f32 %v1474_v9, %v6826_v36  ;;  %v1476_v49 = vadd.f32 %v1475_v30, %v5221_v15  ;;  %v1515_v30 = vadd.f32 %v1514_v26, %v5226_v62  ;;  %v6835_v26 = vld [vmem:[#allocation36_spill] sm:$0xff]  ;;  %v6836_v36 = vld [vmem:[#allocation39_spill] sm:$0xff] }
 0x34b   :  { %v4420_v38 = vpop.eup %4419  ;;  %v1477_v40 = vpop.f32.mrf.mxu0 }
 0x34c   :  { %v1517_v32 = vpop.f32.mrf.mxu1  ;;  %v1432_v42 = vmul.f32 %v4420_v38, %v1308_v35  ;;  %v3472_v43 = vmul.f32 -1.442695, %v1604_v37  ;;  %v1605_v31 = vadd.f32 %v1476_v49, %v6827_v16  ;;  %v6837_v40 = vld [vmem:[#allocation11_spill] sm:$0xff]  ;;  %v6849_v49 = vld [vmem:[#allocation20_spill] sm:$0xff]  ;;  %v5584_v16 = vld [vmem:[#allocation3 + $0x38] ss:$12 sps:$4 sm:$0xff]  }
 0x34d   :  { %v1478_v44 = vpop.f32.mrf.mxu0  ;;  %v6840_v32 = vld [vmem:[#allocation14_spill] sm:$0xff] }
 0x34e   :  { %v3894_v45 = vpop.f32.mrf.mxu1  ;;  %v1433_v46 = vadd.f32 %v1432_v42, %v1413_v41  ;;  %4421 = vpow2.f32 %v3472_v43  ;;  %v3473_v17 = vmul.f32 -1.442695, %v1605_v31  ;;  %v6843_v41 = vld [vmem:[#allocation18_spill] sm:$0xff]  ;;  %v6846_v44 = vld [vmem:[#allocation43_spill] sm:$0xff] }
 0x34f   :  { %v6844_v42 = vld [vmem:[#allocation42_spill] sm:$0xff]  ;;  %v6847_v45 = vld [vmem:[#allocation44_spill] sm:$0xff] }
 0x350   :  { %4423 = vtanh.f32 %v1433_v46  ;;  %v6845_v43 = vld [vmem:[#allocation62_spill] sm:$0xff]  ;;  %v6848_v46 = vld [vmem:[#allocation19_spill] sm:$0xff] }
 0x351   :  { %4425 = vrcp.f32 %v1427_v47  ;;  %v5578_v47 = vld [vmem:[#allocation3 + $0x50] ss:$12 sps:$4 sm:$0xff]   ;;  %v5590_v31 = vld [vmem:[#allocation3 + $0x20] ss:$12 sps:$4 sm:$0xff]  }
 0x352   :  { %4427 = vpow2.f32 %v3473_v17  ;;  %v5596_v17 = vld [vmem:[#allocation3 + $0x8] ss:$12 sps:$4 sm:$0xff]  }
 0x35b   :  { %v4422_v19 = vpop.eup %4421 }
 0x35c   :  { %v1612_v20 = vadd.f32 1.0, %v4422_v19  ;;  %v5599_v19 = vld [vmem:[#allocation7 + $0xac] ss:$12 sps:$4 sm:$0xff]  }
 0x35d   :  { %v4424_v21 = vpop.eup %4423 }
 0x35e   :  { %4429 = vrcp.f32 %v1612_v20  ;;  %v1435_v39 = vsub.f32 %v5345_v54, %v4424_v21  ;;  %v4426_v23 = vpop.eup %4425  ;;  %v5603_v20 = vld [vmem:[#allocation7 + $0xa8] ss:$12 sps:$4 sm:$0xff]  }
 0x35f   :  { %v4428_v54 = vpop.eup %4427 }
 0x360   :  { %v1436_v24 = vmul.f32 %v4426_v23, %v1435_v39  ;;  %v1613_v34 = vadd.f32 1.0, %v4428_v54  ;;  %v5609_v39 = vld [vmem:[#allocation7 + $0x94] ss:$12 sps:$4 sm:$0xff]   ;;  %v5616_v23 = vld [vmem:[#allocation7 + $0x90] ss:$12 sps:$4 sm:$0xff]  }
 0x361   :  { %v5626_v54 = vld [vmem:[#allocation7 + $0x78] ss:$12 sps:$4 sm:$0xff]  }
 0x362   :  { %v5512_v25 = vadd.f32 %v4424_v21, %v1436_v24  ;;  %v5606_v21 = vld [vmem:[#allocation7 + $0xb0] ss:$12 sps:$4 sm:$0xff]   ;;  %v5619_v24 = vld [vmem:[#allocation7 + $0x98] ss:$12 sps:$4 sm:$0xff]   ;;  %6851 = vst [vmem:[#allocation22_spill] sm:$0xff] %v5626_v54 }
 0x364   :  { %v1438_v9 = vpack.c.bf16 %v5512_v25, %v5512_v25 }
 0x366   :  { %1553 = vmatmul.mubr.bf16.vlgmr.msra.gmra.mxu0 %v1438_v9  ;;  %3912 = vmatmul.mubr.bf16.vlgmr.msra.gmra.mxu1 %v1438_v9  ;;  %v5622_v9 = vld [vmem:[#allocation7 + $0x7c] ss:$12 sps:$4 sm:$0xff]  }
 0x367   :  { %1626 = vmatpush1.bf16.msra.mxu0 %v6789_v22  ;;  %3916 = vmatpush3.bf16.msra.mxu1 %v6790_v13  ;;  %v6828_v13 = vld [vmem:[#allocation49_spill] sm:$0xff]  ;;  %6850 = vst [vmem:[#allocation21_spill] sm:$0xff] %v5622_v9 }
 0x368   :  { %1627 = vmatprep.subr.bf16.mxu0 %v6791_v27  ;;  %3917 = vmatprep.subr.bf16.mxu1 %v6772_v56 }
 0x369   :  { %1657 = vmatprep.mubr.bf16.mxu0 %v6773_v60  ;;  %3931 = vmatprep.mubr.msk.bf16.mxu1 %vm4764_vm1, %v6772_v56 }
 0x36b   :  { %v4430_v33 = vpop.eup %4429  ;;  %1628 = vmatpush1.bf16.msra.mxu0 %v6792_v61  ;;  %3918 = vmatpush3.bf16.msra.mxu1 %v6793_v28  ;;  %v6829_v61 = vld [vmem:[#allocation30_spill] sm:$0xff]  ;;  %v6830_v28 = vld [vmem:[#allocation31_spill] sm:$0xff] }
 0x36c   :  { %v1618_v22 = vmul.f32 %v4430_v33, %v1515_v30  ;;  %1629 = vmatprep.subr.bf16.mxu0 %v6794_v14  ;;  %3919 = vmatprep.subr.bf16.mxu1 %v6772_v56  ;;  %v6831_v14 = vld [vmem:[#allocation32_spill] sm:$0xff]  ;;  %v5629_v30 = vld [vmem:[#allocation7 + $0x80] ss:$12 sps:$4 sm:$0xff]  }
 0x36d   :  { %6852 = vst [vmem:[#allocation23_spill] sm:$0xff] %v5629_v30  ;;  %v5632_v33 = vld [vmem:[#allocation7 + $0x64] ss:$12 sps:$4 sm:$0xff]  }
 0x36e   :  { %v1619_v27 = vadd.f32 %v1618_v22, %v6828_v13  ;;  %6853 = vst [vmem:[#allocation24_spill] sm:$0xff] %v5632_v33  ;;  %v5636_v22 = vld [vmem:[#allocation7 + $0x60] ss:$12 sps:$4 sm:$0xff]   ;;  %v5639_v13 = vld [vmem:[#allocation7 + $0x68] ss:$12 sps:$4 sm:$0xff]  }
 0x36f   :  { %1630 = vmatpush1.bf16.msra.mxu0 %v6796_v0  ;;  %3920 = vmatpush3.bf16.msra.mxu1 %v6797_v4  ;;  %v6832_v0 = vld [vmem:[#allocation33_spill] sm:$0xff]  ;;  %v6833_v4 = vld [vmem:[#allocation34_spill] sm:$0xff]  ;;  %6854 = vst [vmem:[#allocation54_spill] sm:$0xff] %v5636_v22  ;;  %6855 = vst [vmem:[#allocation25_spill] sm:$0xff] %v5639_v13 }
 0x370   :  { %4431 = vtanh.f32 %v1619_v27  ;;  %1631 = vmatprep.subr.bf16.mxu0 %v6798_v18  ;;  %3921 = vmatprep.subr.bf16.mxu1 %v6772_v56  ;;  %v6834_v18 = vld [vmem:[#allocation35_spill] sm:$0xff] }
 0x371   :  { %4433 = vrcp.f32 %v1613_v34  ;;  %v5642_v27 = vld [vmem:[#allocation7 + $0x4c] ss:$12 sps:$4 sm:$0xff]   ;;  %v5646_v34 = vld [vmem:[#allocation7 + $0x48] ss:$12 sps:$4 sm:$0xff]  }
 0x372   :  { %6856 = vst [vmem:[#allocation26_spill] sm:$0xff] %v5642_v27  ;;  %6857 = vst [vmem:[#allocation27_spill] sm:$0xff] %v5646_v34 }
 0x373   :  { %1632 = vmatpush1.bf16.msra.mxu0 %v6799_v3  ;;  %3922 = vmatpush3.bf16.msra.mxu1 %v6800_v7 }
 0x374   :  { %1633 = vmatprep.subr.bf16.mxu0 %v6829_v61  ;;  %3923 = vmatprep.subr.bf16.mxu1 %v6772_v56  ;;  %v5649_v61 = vld [vmem:[#allocation7 + $0x50] ss:$12 sps:$4 sm:$0xff]  }
 0x375   :  { %6858 = vst [vmem:[#allocation28_spill] sm:$0xff] %v5649_v61 }
 0x377   :  { %1634 = vmatpush1.bf16.msra.mxu0 %v6830_v28  ;;  %3924 = vmatpush3.bf16.msra.mxu1 %v6831_v14  ;;  %v5652_v28 = vld [vmem:[#allocation7 + $0x34] ss:$12 sps:$4 sm:$0xff]   ;;  %v5656_v14 = vld [vmem:[#allocation7 + $0x30] ss:$12 sps:$4 sm:$0xff]  }
 0x378   :  { %1635 = vmatprep.subr.bf16.mxu0 %v6832_v0  ;;  %3925 = vmatprep.subr.bf16.mxu1 %v6772_v56  ;;  %6859 = vst [vmem:[#allocation29_spill] sm:$0xff] %v5652_v28  ;;  %6860 = vst [vmem:[#allocation37_spill] sm:$0xff] %v5656_v14  ;;  %v5659_v0 = vld [vmem:[#allocation7 + $0x38] ss:$12 sps:$4 sm:$0xff]  }
 0x379   :  { %6861 = vst [vmem:[#allocation38_spill] sm:$0xff] %v5659_v0 }
 0x37b   :  { %1636 = vmatpush1.bf16.msra.mxu0 %v6833_v4  ;;  %3926 = vmatpush3.bf16.msra.mxu1 %v6834_v18  ;;  %v5662_v4 = vld [vmem:[#allocation7 + $0x1c] ss:$12 sps:$4 sm:$0xff]   ;;  %v5666_v18 = vld [vmem:[#allocation7 + $0x18] ss:$12 sps:$4 sm:$0xff]  }
 0x37c   :  { %1637 = vmatprep.subr.bf16.mxu0 %v6835_v26  ;;  %3927 = vmatprep.subr.bf16.mxu1 %v6772_v56  ;;  %6862 = vst [vmem:[#allocation40_spill] sm:$0xff] %v5662_v4  ;;  %6863 = vst [vmem:[#allocation41_spill] sm:$0xff] %v5666_v18  ;;  %v5669_v26 = vld [vmem:[#allocation7 + $0x20] ss:$12 sps:$4 sm:$0xff]  }
 0x37d   :  { %v4432_v3 = vpop.eup %4431  ;;  %6864 = vst [vmem:[#allocation45_spill] sm:$0xff] %v5669_v26 }
 0x37e   :  { %v1621_v7 = vsub.f32 %v5383_v5, %v4432_v3  ;;  %v4434_v35 = vpop.eup %4433 }
 0x37f   :  { %1638 = vmatpush1.bf16.msra.mxu0 %v6808_v50  ;;  %3928 = vmatpush3.bf16.msra.mxu1 %v6809_v6  ;;  %v6838_v6 = vld [vmem:[#allocation12_spill] sm:$0xff] }
 0x380   :  { %1639 = vmatprep.subr.bf16.mxu0 %v6836_v36  ;;  %3929 = vmatprep.subr.bf16.mxu1 %v6772_v56  ;;  %v1622_v37 = vmul.f32 %v4434_v35, %v1621_v7  ;;  %v6839_v50 = vld [vmem:[#allocation16_spill] sm:$0xff]  ;;  %v5676_v7 = vld [vmem:[#allocation7] ss:$12 sps:$4 sm:$0xff]  }
 0x381   :  { %6866 = vst [vmem:[#allocation49_spill] sm:$0xff] %v5676_v7  ;;  %v5679_v35 = vld [vmem:[#allocation7 + $0x8] ss:$12 sps:$4 sm:$0xff]   ;;  %v5682_v36 = vld [vmem:[#allocation5 + $0xac] ss:$12 sps:$4 sm:$0xff]  }
 0x382   :  { %v5550_v38 = vadd.f32 %v4432_v3, %v1622_v37  ;;  %v5672_v3 = vld [vmem:[#allocation7 + $0x4] ss:$12 sps:$4 sm:$0xff]   ;;  %6867 = vst [vmem:[#allocation30_spill] sm:$0xff] %v5679_v35  ;;  %6868 = vst [vmem:[#allocation31_spill] sm:$0xff] %v5682_v36 }
 0x383   :  { %1640 = vmatpush1.bf16.msra.mxu0 %v6811_v10  ;;  %3930 = vmatpush3.bf16.msra.mxu1 %v6812_v11  ;;  %v6841_v10 = vld [vmem:[#allocation15_spill] sm:$0xff]  ;;  %v6842_v11 = vld [vmem:[#allocation17_spill] sm:$0xff]  ;;  %6865 = vst [vmem:[#allocation46_spill] sm:$0xff] %v5672_v3 }
 0x384   :  { %1727 = vmatprep.subr.bf16.mxu0 %v6837_v40  ;;  %3935 = vmatprep.subr.bf16.mxu1 %v6772_v56  ;;  %v1624_v5 = vpack.c.bf16 %v5550_v38, %v5550_v38 }
 0x386   :  { %1658 = vmatmul.mubr.bf16.vlgmr.msra.gmra.mxu0 %v1624_v5  ;;  %3932 = vmatmul.mubr.bf16.vlgmr.msra.gmra.mxu1 %v1624_v5 }
 0x387   :  { %1728 = vmatpush1.bf16.msra.mxu0 %v6838_v6  ;;  %3936 = vmatpush3.bf16.msra.mxu1 %v6839_v50 }
 0x388   :  { %1729 = vmatprep.subr.bf16.mxu0 %v6840_v32  ;;  %3937 = vmatprep.subr.bf16.mxu1 %v6772_v56 }
 0x389   :  { %1759 = vmatprep.mubr.bf16.mxu0 %v6773_v60  ;;  %3951 = vmatprep.mubr.msk.bf16.mxu1 %vm4764_vm1, %v6772_v56 }
 0x38b   :  { %1730 = vmatpush1.bf16.msra.mxu0 %v6841_v10  ;;  %3938 = vmatpush3.bf16.msra.mxu1 %v6842_v11 }
 0x38c   :  { %1731 = vmatprep.subr.bf16.mxu0 %v6843_v41  ;;  %3939 = vmatprep.subr.bf16.mxu1 %v6772_v56 }
 0x38f   :  { %1732 = vmatpush1.bf16.msra.mxu0 %v5416_v12  ;;  %3940 = vmatpush3.bf16.msra.mxu1 %v6844_v42 }
 0x390   :  { %1733 = vmatprep.subr.bf16.mxu0 %v6845_v43  ;;  %3941 = vmatprep.subr.bf16.mxu1 %v6772_v56 }
 0x393   :  { %1734 = vmatpush1.bf16.msra.mxu0 %v6846_v44  ;;  %3942 = vmatpush3.bf16.msra.mxu1 %v5429_v52 }
 0x394   :  { %1735 = vmatprep.subr.bf16.mxu0 %v6847_v45  ;;  %3943 = vmatprep.subr.bf16.mxu1 %v6772_v56 }
 0x397   :  { %1736 = vmatpush1.bf16.msra.mxu0 %v6848_v46  ;;  %3944 = vmatpush3.bf16.msra.mxu1 %v5578_v47 }
 0x398   :  { %1737 = vmatprep.subr.bf16.mxu0 %v5440_v48  ;;  %3945 = vmatprep.subr.bf16.mxu1 %v6772_v56 }
 0x39b   :  { %1738 = vmatpush1.bf16.msra.mxu0 %v6849_v49  ;;  %3946 = vmatpush3.bf16.msra.mxu1 %v5584_v16 }
 0x39c   :  { %1739 = vmatprep.subr.bf16.mxu0 %v5448_v8  ;;  %3947 = vmatprep.subr.bf16.mxu1 %v6772_v56 }
 0x39f   :  { %1740 = vmatpush1.bf16.msra.mxu0 %v5452_v51  ;;  %3948 = vmatpush3.bf16.msra.mxu1 %v5590_v31 }
 0x3a0   :  { %1741 = vmatprep.subr.bf16.mxu0 %v5456_v29  ;;  %3949 = vmatprep.subr.bf16.mxu1 %v6772_v56 }
 0x3a3   :  { %1742 = vmatpush1.bf16.msra.mxu0 %v5460_v1  ;;  %3950 = vmatpush3.bf16.msra.mxu1 %v5596_v17 }
 0x3a4   :  { %1808 = vmatprep.subr.bf16.mxu0 %v5599_v19  ;;  %3955 = vmatprep.subr.bf16.mxu1 %v6772_v56 }
 0x3a6   :  { %1760 = vmatmul.mubr.bf16.vlgmr.msra.gmra.mxu0 %v1624_v5  ;;  %3952 = vmatmul.mubr.bf16.vlgmr.msra.gmra.mxu1 %v1624_v5 }
 0x3a7   :  { %1809 = vmatpush1.bf16.msra.mxu0 %v5603_v20  ;;  %3956 = vmatpush3.bf16.msra.mxu1 %v5606_v21 }
 0x3a8   :  { %1810 = vmatprep.subr.bf16.mxu0 %v5609_v39  ;;  %3957 = vmatprep.subr.bf16.mxu1 %v6772_v56 }
 0x3a9   :  { %1840 = vmatprep.mubr.bf16.mxu0 %v6773_v60  ;;  %3971 = vmatprep.mubr.msk.bf16.mxu1 %vm4764_vm1, %v6772_v56 }
 0x3ab   :  { %1811 = vmatpush1.bf16.msra.mxu0 %v5616_v23  ;;  %3958 = vmatpush3.bf16.msra.mxu1 %v5619_v24 }
 0x3ac   :  { %1812 = vmatprep.subr.bf16.mxu0 %v5622_v9  ;;  %3959 = vmatprep.subr.bf16.mxu1 %v6772_v56 }
 0x3af   :  { %1813 = vmatpush1.bf16.msra.mxu0 %v5626_v54  ;;  %3960 = vmatpush3.bf16.msra.mxu1 %v5629_v30 }
 0x3b0   :  { %1814 = vmatprep.subr.bf16.mxu0 %v5632_v33  ;;  %3961 = vmatprep.subr.bf16.mxu1 %v6772_v56 }
 0x3b3   :  { %1815 = vmatpush1.bf16.msra.mxu0 %v5636_v22  ;;  %3962 = vmatpush3.bf16.msra.mxu1 %v5639_v13 }
 0x3b4   :  { %1816 = vmatprep.subr.bf16.mxu0 %v5642_v27  ;;  %3963 = vmatprep.subr.bf16.mxu1 %v6772_v56 }
 0x3b7   :  { %1817 = vmatpush1.bf16.msra.mxu0 %v5646_v34  ;;  %3964 = vmatpush3.bf16.msra.mxu1 %v5649_v61 }
 0x3b8   :  { %1818 = vmatprep.subr.bf16.mxu0 %v5652_v28  ;;  %3965 = vmatprep.subr.bf16.mxu1 %v6772_v56 }
 0x3bb   :  { %1819 = vmatpush1.bf16.msra.mxu0 %v5656_v14  ;;  %3966 = vmatpush3.bf16.msra.mxu1 %v5659_v0 }
 0x3bc   :  { %1820 = vmatprep.subr.bf16.mxu0 %v5662_v4  ;;  %3967 = vmatprep.subr.bf16.mxu1 %v6772_v56 }
 0x3bf   :  { %1821 = vmatpush1.bf16.msra.mxu0 %v5666_v18  ;;  %3968 = vmatpush3.bf16.msra.mxu1 %v5669_v26 }
 0x3c0   :  { %1822 = vmatprep.subr.bf16.mxu0 %v5672_v3  ;;  %3969 = vmatprep.subr.bf16.mxu1 %v6772_v56 }
 0x3c3   :  { %1823 = vmatpush1.bf16.msra.mxu0 %v5676_v7  ;;  %3970 = vmatpush3.bf16.msra.mxu1 %v5679_v35 }
 0x3c4   :  { %1913 = vmatprep.subr.bf16.mxu0 %v5682_v36  ;;  %3975 = vmatprep.subr.bf16.mxu1 %v6772_v56 }
 0x426   :  { %v1554_v37 = vpop.f32.mrf.mxu0  ;;  %v1595_v5 = vpop.f32.mrf.mxu1 }
 0x427   :  { %v1555_v61 = vadd.f32 %v1554_v37, %v5315_v58 }
 0x428   :  { %v1556_v26 = vpop.f32.mrf.mxu0  ;;  %v3913_v3 = vpop.f32.mrf.mxu1 }
 0x42a   :  { %v1558_v18 = vpop.f32.mrf.mxu0  ;;  %v1598_v4 = vpop.f32.mrf.mxu1 }
 0x42c   :  { %v1559_v0 = vpop.f32.mrf.mxu0  ;;  %v3914_v14 = vpop.f32.mrf.mxu1 }
 0x42d   :  { %v1557_v0 = vadd.f32 %v1556_v26, %v5326_v55 }
 0x446   :  { %v1659_v28 = vpop.f32.mrf.mxu0  ;;  %v1700_v7 = vpop.f32.mrf.mxu1 }
 0x447   :  { %v1660_v35 = vadd.f32 %v1659_v28, %v5318_v63 }
 0x448   :  { %v1661_v34 = vpop.f32.mrf.mxu0  ;;  %v3933_v27 = vpop.f32.mrf.mxu1 }
 0x449   :  { %v1706_v13 = vadd.f32 %v1660_v35, %v1555_v61  ;;  %v1662_v18 = vadd.f32 %v1661_v34, %v5323_v53 }
 0x44a   :  { %v1663_v36 = vpop.f32.mrf.mxu0  ;;  %v1703_v22 = vpop.f32.mrf.mxu1 }
 0x44b   :  { %v3474_v33 = vmul.f32 -1.442695, %v1706_v13  ;;  %v1707_v14 = vadd.f32 %v1662_v18, %v1557_v0  ;;  %v1701_v36 = vadd.f32 %v1700_v7, %v5335_v57 }
 0x44c   :  { %v1664_v30 = vpop.f32.mrf.mxu0  ;;  %v3934_v54 = vpop.f32.mrf.mxu1 }
 0x44d   :  { %4435 = vpow2.f32 %v3474_v33  ;;  %v3475_v4 = vmul.f32 -1.442695, %v1707_v14  ;;  %v1596_v54 = vadd.f32 %v1595_v5, %v5332_v59  ;;  %v6869_v30 = vld [vmem:[#allocation47_spill] sm:$0xff] }
 0x44f   :  { %4437 = vpow2.f32 %v3475_v4 }
 0x45a   :  { %v4436_v3 = vpop.eup %4435 }
 0x45b   :  { %v1714_v9 = vadd.f32 1.0, %v4436_v3 }
 0x45c   :  { %v4438_v13 = vpop.eup %4437 }
 0x45d   :  { %4439 = vrcp.f32 %v1714_v9  ;;  %v1715_v3 = vadd.f32 1.0, %v4438_v13 }
 0x466   :  { %v1761_v28 = vpop.f32.mrf.mxu0  ;;  %v1802_v37 = vpop.f32.mrf.mxu1 }
 0x467   :  { %v1762_v27 = vadd.f32 %v1761_v28, %v6786_v2 }
 0x468   :  { %v1763_v61 = vpop.f32.mrf.mxu0  ;;  %v3953_v22 = vpop.f32.mrf.mxu1 }
 0x469   :  { %v1892_v33 = vadd.f32 %v1762_v27, %v6869_v30  ;;  %v1764_v28 = vadd.f32 %v1763_v61, %v5221_v15  ;;  %v6870_v22 = vld [vmem:[#allocation48_spill] sm:$0xff] }
 0x46a   :  { %v4440_v34 = vpop.eup %4439  ;;  %v1765_v35 = vpop.f32.mrf.mxu0  ;;  %v5701_v61 = vld [vmem:[#allocation5 + $0xa8] ss:$12 sps:$4 sm:$0xff]  }
 0x46b   :  { %v1805_v26 = vpop.f32.mrf.mxu1  ;;  %v1720_v18 = vmul.f32 %v4440_v34, %v1596_v54  ;;  %v3476_v0 = vmul.f32 -1.442695, %v1892_v33  ;;  %v1893_v5 = vadd.f32 %v1764_v28, %v6870_v22 }
 0x46c   :  { %v1766_v14 = vpop.f32.mrf.mxu0  ;;  %v5704_v26 = vld [vmem:[#allocation5 + $0xb0] ss:$12 sps:$4 sm:$0xff]  }
 0x46d   :  { %v3954_v9 = vpop.f32.mrf.mxu1  ;;  %v1721_v4 = vadd.f32 %v1720_v18, %v1701_v36  ;;  %4441 = vpow2.f32 %v3476_v0  ;;  %v3477_v59 = vmul.f32 -1.442695, %v1893_v5  ;;  %v1803_v36 = vadd.f32 %v1802_v37, %v5226_v62  ;;  %v5715_v0 = vld [vmem:[#allocation5 + $0x90] ss:$12 sps:$4 sm:$0xff]   ;;  %v5718_v14 = vld [vmem:[#allocation5 + $0x98] ss:$12 sps:$4 sm:$0xff]  }
 0x46e   :  { %v5726_v37 = vld [vmem:[#allocation5 + $0x78] ss:$12 sps:$4 sm:$0xff]   ;;  %v5729_v5 = vld [vmem:[#allocation5 + $0x80] ss:$12 sps:$4 sm:$0xff]  }
 0x46f   :  { %4443 = vtanh.f32 %v1721_v4  ;;  %v5721_v4 = vld [vmem:[#allocation5 + $0x7c] ss:$12 sps:$4 sm:$0xff]  }
 0x470   :  { %4445 = vrcp.f32 %v1715_v3  ;;  %v6871_v3 = vld [vmem:[#allocation52_spill] sm:$0xff] }
 0x471   :  { %4447 = vpow2.f32 %v3477_v59  ;;  %v5707_v59 = vld [vmem:[#allocation5 + $0x94] ss:$12 sps:$4 sm:$0xff]  }
 0x47a   :  { %v4442_v27 = vpop.eup %4441 }
 0x47b   :  { %v1900_v30 = vadd.f32 1.0, %v4442_v27  ;;  %v5732_v27 = vld [vmem:[#allocation5 + $0x64] ss:$12 sps:$4 sm:$0xff]  }
 0x47c   :  { %v4444_v35 = vpop.eup %4443 }
 0x47d   :  { %4449 = vrcp.f32 %v1900_v30  ;;  %v1723_v7 = vsub.f32 %v5512_v25, %v4444_v35  ;;  %v4446_v54 = vpop.eup %4445  ;;  %v5736_v30 = vld [vmem:[#allocation5 + $0x60] ss:$12 sps:$4 sm:$0xff]  }
 0x47e   :  { %v4448_v25 = vpop.eup %4447 }
 0x47f   :  { %v1724_v33 = vmul.f32 %v4446_v54, %v1723_v7  ;;  %v1901_v22 = vadd.f32 1.0, %v4448_v25  ;;  %v5742_v7 = vld [vmem:[#allocation5 + $0x4c] ss:$12 sps:$4 sm:$0xff]   ;;  %v5746_v54 = vld [vmem:[#allocation5 + $0x48] ss:$12 sps:$4 sm:$0xff]  }
 0x480   :  { %v5756_v25 = vld [vmem:[#allocation5 + $0x30] ss:$12 sps:$4 sm:$0xff]  }
 0x481   :  { %v5697_v34 = vadd.f32 %v4444_v35, %v1724_v33  ;;  %v5739_v35 = vld [vmem:[#allocation5 + $0x68] ss:$12 sps:$4 sm:$0xff]   ;;  %v5749_v33 = vld [vmem:[#allocation5 + $0x50] ss:$12 sps:$4 sm:$0xff]   ;;  %6874 = vst [vmem:[#allocation34_spill] sm:$0xff] %v5756_v25 }
 0x482   :  { %6872 = vst [vmem:[#allocation32_spill] sm:$0xff] %v5749_v33 }
 0x483   :  { %v1726_v13 = vpack.c.bf16 %v5697_v34, %v5697_v34 }
 0x485   :  { %1841 = vmatmul.mubr.bf16.vlgmr.msra.gmra.mxu0 %v1726_v13  ;;  %3972 = vmatmul.mubr.bf16.vlgmr.msra.gmra.mxu1 %v1726_v13  ;;  %v5752_v13 = vld [vmem:[#allocation5 + $0x34] ss:$12 sps:$4 sm:$0xff]  }
 0x486   :  { %1914 = vmatpush1.bf16.msra.mxu0 %v5701_v61  ;;  %3976 = vmatpush3.bf16.msra.mxu1 %v5704_v26  ;;  %6873 = vst [vmem:[#allocation33_spill] sm:$0xff] %v5752_v13 }
 0x487   :  { %1915 = vmatprep.subr.bf16.mxu0 %v5707_v59  ;;  %3977 = vmatprep.subr.bf16.mxu1 %v6772_v56 }
 0x488   :  { %1945 = vmatprep.mubr.bf16.mxu0 %v6773_v60  ;;  %3991 = vmatprep.mubr.msk.bf16.mxu1 %vm4764_vm1, %v6772_v56 }
 0x48a   :  { %v4450_v18 = vpop.eup %4449  ;;  %1916 = vmatpush1.bf16.msra.mxu0 %v5715_v0  ;;  %3978 = vmatpush3.bf16.msra.mxu1 %v5718_v14 }
 0x48b   :  { %v1906_v9 = vmul.f32 %v4450_v18, %v1803_v36  ;;  %1917 = vmatprep.subr.bf16.mxu0 %v5721_v4  ;;  %3979 = vmatprep.subr.bf16.mxu1 %v6772_v56  ;;  %v5759_v36 = vld [vmem:[#allocation5 + $0x38] ss:$12 sps:$4 sm:$0xff]   ;;  %v5762_v18 = vld [vmem:[#allocation5 + $0x1c] ss:$12 sps:$4 sm:$0xff]  }
 0x48c   :  { %6875 = vst [vmem:[#allocation35_spill] sm:$0xff] %v5759_v36  ;;  %6876 = vst [vmem:[#allocation36_spill] sm:$0xff] %v5762_v18 }
 0x48d   :  { %v1907_v28 = vadd.f32 %v1906_v9, %v6871_v3 }
 0x48e   :  { %1918 = vmatpush1.bf16.msra.mxu0 %v5726_v37  ;;  %3980 = vmatpush3.bf16.msra.mxu1 %v5729_v5 }
 0x48f   :  { %4451 = vtanh.f32 %v1907_v28  ;;  %1919 = vmatprep.subr.bf16.mxu0 %v5732_v27  ;;  %3981 = vmatprep.subr.bf16.mxu1 %v6772_v56 }
 0x490   :  { %4453 = vrcp.f32 %v1901_v22  ;;  %v5767_v22 = vld [vmem:[#allocation5 + $0x18] ss:$12 sps:$4 sm:$0xff]  }
 0x492   :  { %1920 = vmatpush1.bf16.msra.mxu0 %v5736_v30  ;;  %3982 = vmatpush3.bf16.msra.mxu1 %v5739_v35 }
 0x493   :  { %1921 = vmatprep.subr.bf16.mxu0 %v5742_v7  ;;  %3983 = vmatprep.subr.bf16.mxu1 %v6772_v56 }
 0x496   :  { %1922 = vmatpush1.bf16.msra.mxu0 %v5746_v54  ;;  %3984 = vmatpush3.bf16.msra.mxu1 %v5749_v33  ;;  %v5779_v33 = vld [vmem:[#allocation5] ss:$12 sps:$4 sm:$0xff]  }
 0x497   :  { %1923 = vmatprep.subr.bf16.mxu0 %v5752_v13  ;;  %3985 = vmatprep.subr.bf16.mxu1 %v6772_v56  ;;  %v5770_v13 = vld [vmem:[#allocation5 + $0x20] ss:$12 sps:$4 sm:$0xff]  }
 0x498   :  { %6877 = vst [vmem:[#allocation39_spill] sm:$0xff] %v5770_v13 }
 0x49a   :  { %1924 = vmatpush1.bf16.msra.mxu0 %v5756_v25  ;;  %3986 = vmatpush3.bf16.msra.mxu1 %v5759_v36  ;;  %v5773_v25 = vld [vmem:[#allocation5 + $0x4] ss:$12 sps:$4 sm:$0xff]  }
 0x49b   :  { %1925 = vmatprep.subr.bf16.mxu0 %v5762_v18  ;;  %3987 = vmatprep.subr.bf16.mxu1 %v6772_v56 }
 0x49c   :  { %v4452_v9 = vpop.eup %4451 }
 0x49d   :  { %v1909_v3 = vsub.f32 %v5550_v38, %v4452_v9  ;;  %v4454_v28 = vpop.eup %4453  ;;  %v5782_v38 = vld [vmem:[#allocation5 + $0x8] ss:$12 sps:$4 sm:$0xff]  }
 0x49e   :  { %1926 = vmatpush1.bf16.msra.mxu0 %v5767_v22  ;;  %3988 = vmatpush3.bf16.msra.mxu1 %v5770_v13 }
 0x49f   :  { %1927 = vmatprep.subr.bf16.mxu0 %v5773_v25  ;;  %3989 = vmatprep.subr.bf16.mxu1 %v6772_v56  ;;  %v1910_v18 = vmul.f32 %v4454_v28, %v1909_v3 }
 0x4a1   :  { %v5777_v36 = vadd.f32 %v4452_v9, %v1910_v18 }
 0x4a2   :  { %1928 = vmatpush1.bf16.msra.mxu0 %v5779_v33  ;;  %3990 = vmatpush3.bf16.msra.mxu1 %v5782_v38 }
 0x4a3   :  { %v1912_v13 = vpack.c.bf16 %v5777_v36, %v5777_v36  ;;  %2015 = vmatprep.subr.bf16.mxu0 %v6837_v40  ;;  %3995 = vmatprep.subr.bf16.mxu1 %v6772_v56  ;;  %v6885_v40 = vld [vmem:[#allocation27_spill] sm:$0xff] }
 0x4a5   :  { %1946 = vmatmul.mubr.bf16.vlgmr.msra.gmra.mxu0 %v1912_v13  ;;  %3992 = vmatmul.mubr.bf16.vlgmr.msra.gmra.mxu1 %v1912_v13 }
 0x4a6   :  { %2016 = vmatpush1.bf16.msra.mxu0 %v6838_v6  ;;  %3996 = vmatpush3.bf16.msra.mxu1 %v6839_v50  ;;  %v6886_v6 = vld [vmem:[#allocation28_spill] sm:$0xff]  ;;  %v6887_v50 = vld [vmem:[#allocation29_spill] sm:$0xff] }
 0x4a7   :  { %2017 = vmatprep.subr.bf16.mxu0 %v6840_v32  ;;  %3997 = vmatprep.subr.bf16.mxu1 %v6772_v56  ;;  %v6888_v32 = vld [vmem:[#allocation37_spill] sm:$0xff] }
 0x4a8   :  { %2047 = vmatprep.mubr.bf16.mxu0 %v6773_v60  ;;  %4011 = vmatprep.mubr.msk.bf16.mxu1 %vm4764_vm1, %v6772_v56 }
 0x4aa   :  { %2018 = vmatpush1.bf16.msra.mxu0 %v6841_v10  ;;  %3998 = vmatpush3.bf16.msra.mxu1 %v6842_v11  ;;  %v6889_v10 = vld [vmem:[#allocation38_spill] sm:$0xff]  ;;  %v6890_v11 = vld [vmem:[#allocation40_spill] sm:$0xff] }
 0x4ab   :  { %2019 = vmatprep.subr.bf16.mxu0 %v6843_v41  ;;  %3999 = vmatprep.subr.bf16.mxu1 %v6772_v56  ;;  %v6891_v41 = vld [vmem:[#allocation41_spill] sm:$0xff] }
 0x4ae   :  { %2020 = vmatpush1.bf16.msra.mxu0 %v5416_v12  ;;  %4000 = vmatpush3.bf16.msra.mxu1 %v6844_v42  ;;  %v6881_v12 = vld [vmem:[#allocation24_spill] sm:$0xff]  ;;  %v6892_v42 = vld [vmem:[#allocation45_spill] sm:$0xff] }
 0x4af   :  { %2021 = vmatprep.subr.bf16.mxu0 %v6845_v43  ;;  %4001 = vmatprep.subr.bf16.mxu1 %v6772_v56  ;;  %v6893_v43 = vld [vmem:[#allocation46_spill] sm:$0xff] }
 0x4b2   :  { %2022 = vmatpush1.bf16.msra.mxu0 %v6846_v44  ;;  %4002 = vmatpush3.bf16.msra.mxu1 %v5429_v52  ;;  %v6880_v52 = vld [vmem:[#allocation23_spill] sm:$0xff]  ;;  %v6894_v44 = vld [vmem:[#allocation49_spill] sm:$0xff] }
 0x4b3   :  { %2023 = vmatprep.subr.bf16.mxu0 %v6847_v45  ;;  %4003 = vmatprep.subr.bf16.mxu1 %v6772_v56  ;;  %v6895_v45 = vld [vmem:[#allocation30_spill] sm:$0xff] }
 0x4b6   :  { %2024 = vmatpush1.bf16.msra.mxu0 %v6848_v46  ;;  %4004 = vmatpush3.bf16.msra.mxu1 %v5578_v47  ;;  %v6896_v46 = vld [vmem:[#allocation31_spill] sm:$0xff] }
 0x4b7   :  { %2025 = vmatprep.subr.bf16.mxu0 %v5440_v48  ;;  %4005 = vmatprep.subr.bf16.mxu1 %v6772_v56  ;;  %v6879_v48 = vld [vmem:[#allocation22_spill] sm:$0xff] }
 0x4ba   :  { %2026 = vmatpush1.bf16.msra.mxu0 %v6849_v49  ;;  %4006 = vmatpush3.bf16.msra.mxu1 %v5584_v16 }
 0x4bb   :  { %2027 = vmatprep.subr.bf16.mxu0 %v5448_v8  ;;  %4007 = vmatprep.subr.bf16.mxu1 %v6772_v56  ;;  %v6882_v8 = vld [vmem:[#allocation54_spill] sm:$0xff] }
 0x4be   :  { %2028 = vmatpush1.bf16.msra.mxu0 %v5452_v51  ;;  %4008 = vmatpush3.bf16.msra.mxu1 %v5590_v31  ;;  %v6878_v51 = vld [vmem:[#allocation21_spill] sm:$0xff] }
 0x4bf   :  { %2029 = vmatprep.subr.bf16.mxu0 %v5456_v29  ;;  %4009 = vmatprep.subr.bf16.mxu1 %v6772_v56  ;;  %v6884_v29 = vld [vmem:[#allocation26_spill] sm:$0xff] }
 0x4c2   :  { %2030 = vmatpush1.bf16.msra.mxu0 %v5460_v1  ;;  %4010 = vmatpush3.bf16.msra.mxu1 %v5596_v17  ;;  %v6883_v1 = vld [vmem:[#allocation25_spill] sm:$0xff] }
 0x4c3   :  { %2096 = vmatprep.subr.bf16.mxu0 %v5599_v19  ;;  %4015 = vmatprep.subr.bf16.mxu1 %v6772_v56 }
 0x4c5   :  { %2048 = vmatmul.mubr.bf16.vlgmr.msra.gmra.mxu0 %v1912_v13  ;;  %4012 = vmatmul.mubr.bf16.vlgmr.msra.gmra.mxu1 %v1912_v13 }
 0x4c6   :  { %2097 = vmatpush1.bf16.msra.mxu0 %v5603_v20  ;;  %4016 = vmatpush3.bf16.msra.mxu1 %v5606_v21 }
 0x4c7   :  { %2098 = vmatprep.subr.bf16.mxu0 %v5609_v39  ;;  %4017 = vmatprep.subr.bf16.mxu1 %v6772_v56 }
 0x4c8   :  { %2128 = vmatprep.mubr.bf16.mxu0 %v6773_v60  ;;  %4031 = vmatprep.mubr.msk.bf16.mxu1 %vm4764_vm1, %v6772_v56 }
 0x4ca   :  { %2099 = vmatpush1.bf16.msra.mxu0 %v5616_v23  ;;  %4018 = vmatpush3.bf16.msra.mxu1 %v5619_v24 }
 0x4cb   :  { %2100 = vmatprep.subr.bf16.mxu0 %v6878_v51  ;;  %4019 = vmatprep.subr.bf16.mxu1 %v6772_v56 }
 0x4ce   :  { %2101 = vmatpush1.bf16.msra.mxu0 %v6879_v48  ;;  %4020 = vmatpush3.bf16.msra.mxu1 %v6880_v52 }
 0x4cf   :  { %2102 = vmatprep.subr.bf16.mxu0 %v6881_v12  ;;  %4021 = vmatprep.subr.bf16.mxu1 %v6772_v56 }
 0x4d2   :  { %2103 = vmatpush1.bf16.msra.mxu0 %v6882_v8  ;;  %4022 = vmatpush3.bf16.msra.mxu1 %v6883_v1 }
 0x4d3   :  { %2104 = vmatprep.subr.bf16.mxu0 %v6884_v29  ;;  %4023 = vmatprep.subr.bf16.mxu1 %v6772_v56 }
 0x4d6   :  { %2105 = vmatpush1.bf16.msra.mxu0 %v6885_v40  ;;  %4024 = vmatpush3.bf16.msra.mxu1 %v6886_v6 }
 0x4d7   :  { %2106 = vmatprep.subr.bf16.mxu0 %v6887_v50  ;;  %4025 = vmatprep.subr.bf16.mxu1 %v6772_v56 }
 0x4da   :  { %2107 = vmatpush1.bf16.msra.mxu0 %v6888_v32  ;;  %4026 = vmatpush3.bf16.msra.mxu1 %v6889_v10 }
 0x4db   :  { %2108 = vmatprep.subr.bf16.mxu0 %v6890_v11  ;;  %4027 = vmatprep.subr.bf16.mxu1 %v6772_v56 }
 0x4de   :  { %2109 = vmatpush1.bf16.msra.mxu0 %v6891_v41  ;;  %4028 = vmatpush3.bf16.msra.mxu1 %v6892_v42 }
 0x4df   :  { %2110 = vmatprep.subr.bf16.mxu0 %v6893_v43  ;;  %4029 = vmatprep.subr.bf16.mxu1 %v6772_v56 }
 0x4e2   :  { %2111 = vmatpush1.bf16.msra.mxu0 %v6894_v44  ;;  %4030 = vmatpush3.bf16.msra.mxu1 %v6895_v45 }
 0x4e3   :  { %2201 = vmatprep.subr.bf16.mxu0 %v6896_v46  ;;  %4035 = vmatprep.subr.bf16.mxu1 %v6772_v56 }
 0x545   :  { %v1842_v49 = vpop.f32.mrf.mxu0  ;;  %v1883_v13 = vpop.f32.mrf.mxu1 }
 0x546   :  { %v1843_v10 = vadd.f32 %v1842_v49, %v5315_v58 }
 0x547   :  { %v1844_v18 = vpop.f32.mrf.mxu0  ;;  %v3973_v9 = vpop.f32.mrf.mxu1 }
 0x549   :  { %v1846_v3 = vpop.f32.mrf.mxu0  ;;  %v1886_v28 = vpop.f32.mrf.mxu1 }
 0x54b   :  { %v1847_v41 = vpop.f32.mrf.mxu0  ;;  %v3974_v42 = vpop.f32.mrf.mxu1 }
 0x54c   :  { %v1845_v41 = vadd.f32 %v1844_v18, %v5326_v55 }
 0x565   :  { %v1947_v11 = vpop.f32.mrf.mxu0  ;;  %v1988_v43 = vpop.f32.mrf.mxu1 }
 0x566   :  { %v1948_v44 = vadd.f32 %v1947_v11, %v5318_v63 }
 0x567   :  { %v1949_v32 = vpop.f32.mrf.mxu0  ;;  %v3993_v45 = vpop.f32.mrf.mxu1 }
 0x568   :  { %v1994_v50 = vadd.f32 %v1948_v44, %v1843_v10  ;;  %v1950_v9 = vadd.f32 %v1949_v32, %v5323_v53 }
 0x569   :  { %v1951_v46 = vpop.f32.mrf.mxu0  ;;  %v1991_v6 = vpop.f32.mrf.mxu1 }
 0x56a   :  { %v3478_v40 = vmul.f32 -1.442695, %v1994_v50  ;;  %v1995_v42 = vadd.f32 %v1950_v9, %v1845_v41  ;;  %v1989_v9 = vadd.f32 %v1988_v43, %v5335_v57 }
 0x56b   :  { %v1952_v29 = vpop.f32.mrf.mxu0  ;;  %v3994_v1 = vpop.f32.mrf.mxu1 }
 0x56c   :  { %4455 = vpow2.f32 %v3478_v40  ;;  %v3479_v3 = vmul.f32 -1.442695, %v1995_v42  ;;  %v6897_v29 = vld [vmem:[#allocation13_spill] sm:$0xff]  ;;  %v6898_v40 = vld [vmem:[#allocation50_spill] sm:$0xff] }
 0x56d   :  { %v1884_v1 = vadd.f32 %v1883_v13, %v6897_v29 }
 0x56e   :  { %4457 = vpow2.f32 %v3479_v3 }
 0x579   :  { %v4456_v28 = vpop.eup %4455 }
 0x57a   :  { %v2002_v8 = vadd.f32 1.0, %v4456_v28 }
 0x57b   :  { %v4458_v50 = vpop.eup %4457 }
 0x57c   :  { %4459 = vrcp.f32 %v2002_v8  ;;  %v2003_v55 = vadd.f32 1.0, %v4458_v50 }
 0x585   :  { %v2049_v11 = vpop.f32.mrf.mxu0  ;;  %v2090_v49 = vpop.f32.mrf.mxu1 }
 0x586   :  { %v2050_v10 = vadd.f32 %v2049_v11, %v6786_v2 }
 0x587   :  { %v2051_v44 = vpop.f32.mrf.mxu0  ;;  %v4013_v6 = vpop.f32.mrf.mxu1 }
 0x588   :  { %v2180_v45 = vadd.f32 %v2050_v10, %v6898_v40  ;;  %v2052_v11 = vadd.f32 %v2051_v44, %v5221_v15  ;;  %v6899_v6 = vld [vmem:[#allocation51_spill] sm:$0xff] }
 0x589   :  { %v4460_v32 = vpop.eup %4459  ;;  %v2053_v46 = vpop.f32.mrf.mxu0 }
 0x58a   :  { %v2093_v18 = vpop.f32.mrf.mxu1  ;;  %v2008_v41 = vmul.f32 %v4460_v32, %v1884_v1  ;;  %v3480_v42 = vmul.f32 -1.442695, %v2180_v45  ;;  %v2181_v13 = vadd.f32 %v2052_v11, %v6899_v6 }
 0x58b   :  { %v2054_v3 = vpop.f32.mrf.mxu0  ;;  %v6900_v18 = vld [vmem:[#allocation58_spill] sm:$0xff] }
 0x58c   :  { %v4014_v8 = vpop.f32.mrf.mxu1  ;;  %v2009_v28 = vadd.f32 %v2008_v41, %v1989_v9  ;;  %4461 = vpow2.f32 %v3480_v42  ;;  %v3481_v29 = vmul.f32 -1.442695, %v2181_v13  ;;  %v6902_v42 = vld [vmem:[#allocation33_spill] sm:$0xff]  ;;  %v6903_v3 = vld [vmem:[#allocation34_spill] sm:$0xff] }
 0x58d   :  { %v6904_v8 = vld [vmem:[#allocation35_spill] sm:$0xff] }
 0x58e   :  { %4463 = vtanh.f32 %v2009_v28  ;;  %v6905_v28 = vld [vmem:[#allocation36_spill] sm:$0xff] }
 0x58f   :  { %4465 = vrcp.f32 %v2003_v55 }
 0x590   :  { %4467 = vpow2.f32 %v3481_v29 }
 0x599   :  { %v4462_v10 = vpop.eup %4461 }
 0x59a   :  { %v2188_v40 = vadd.f32 1.0, %v4462_v10  ;;  %v6906_v10 = vld [vmem:[#allocation39_spill] sm:$0xff] }
 0x59b   :  { %v4464_v46 = vpop.eup %4463 }
 0x59c   :  { %4469 = vrcp.f32 %v2188_v40  ;;  %v2011_v43 = vsub.f32 %v5697_v34, %v4464_v46  ;;  %v4466_v1 = vpop.eup %4465  ;;  %v2091_v34 = vadd.f32 %v2090_v49, %v5226_v62  ;;  %v6901_v49 = vld [vmem:[#allocation32_spill] sm:$0xff] }
 0x59d   :  { %v4468_v55 = vpop.eup %4467 }
 0x59e   :  { %v2012_v45 = vmul.f32 %v4466_v1, %v2011_v43  ;;  %v2189_v41 = vadd.f32 1.0, %v4468_v55  ;;  %v5912_v43 = vld [vmem:[#allocation3 + $0xac] ss:$12 sps:$4 sm:$0xff]   ;;  %v5918_v1 = vld [vmem:[#allocation3 + $0xa8] ss:$12 sps:$4 sm:$0xff]  }
 0x59f   :  { %v5931_v55 = vld [vmem:[#allocation3 + $0x90] ss:$12 sps:$4 sm:$0xff]  }
 0x5a0   :  { %v5870_v32 = vadd.f32 %v4464_v46, %v2012_v45  ;;  %v5921_v45 = vld [vmem:[#allocation3 + $0xb0] ss:$12 sps:$4 sm:$0xff]  }
 0x5a2   :  { %v2014_v50 = vpack.c.bf16 %v5870_v32, %v5870_v32 }
 0x5a4   :  { %2129 = vmatmul.mubr.bf16.vlgmr.msra.gmra.mxu0 %v2014_v50  ;;  %4032 = vmatmul.mubr.bf16.vlgmr.msra.gmra.mxu1 %v2014_v50  ;;  %v5924_v50 = vld [vmem:[#allocation3 + $0x94] ss:$12 sps:$4 sm:$0xff]  }
 0x5a5   :  { %2202 = vmatpush1.bf16.msra.mxu0 %v5701_v61  ;;  %4036 = vmatpush3.bf16.msra.mxu1 %v5704_v26 }
 0x5a6   :  { %2203 = vmatprep.subr.bf16.mxu0 %v5707_v59  ;;  %4037 = vmatprep.subr.bf16.mxu1 %v6772_v56 }
 0x5a7   :  { %2233 = vmatprep.mubr.bf16.mxu0 %v6773_v60  ;;  %4051 = vmatprep.mubr.msk.bf16.mxu1 %vm4764_vm1, %v6772_v56 }
 0x5a9   :  { %v4470_v44 = vpop.eup %4469  ;;  %2204 = vmatpush1.bf16.msra.mxu0 %v5715_v0  ;;  %4038 = vmatpush3.bf16.msra.mxu1 %v5718_v14 }
 0x5aa   :  { %v2194_v29 = vmul.f32 %v4470_v44, %v2091_v34  ;;  %2205 = vmatprep.subr.bf16.mxu0 %v5721_v4  ;;  %4039 = vmatprep.subr.bf16.mxu1 %v6772_v56  ;;  %v5934_v34 = vld [vmem:[#allocation3 + $0x98] ss:$12 sps:$4 sm:$0xff]   ;;  %v5937_v44 = vld [vmem:[#allocation3 + $0x7c] ss:$12 sps:$4 sm:$0xff]  }
 0x5ac   :  { %v2195_v9 = vadd.f32 %v2194_v29, %v6900_v18  ;;  %v5941_v29 = vld [vmem:[#allocation3 + $0x78] ss:$12 sps:$4 sm:$0xff]   ;;  %v5944_v18 = vld [vmem:[#allocation3 + $0x80] ss:$12 sps:$4 sm:$0xff]  }
 0x5ad   :  { %2206 = vmatpush1.bf16.msra.mxu0 %v5726_v37  ;;  %4040 = vmatpush3.bf16.msra.mxu1 %v5729_v5  ;;  %6907 = vst [vmem:[#allocation11_spill] sm:$0xff] %v5944_v18 }
 0x5ae   :  { %4471 = vtanh.f32 %v2195_v9  ;;  %2207 = vmatprep.subr.bf16.mxu0 %v5732_v27  ;;  %4041 = vmatprep.subr.bf16.mxu1 %v6772_v56  ;;  %v5947_v9 = vld [vmem:[#allocation3 + $0x64] ss:$12 sps:$4 sm:$0xff]  }
 0x5af   :  { %4473 = vrcp.f32 %v2189_v41  ;;  %6908 = vst [vmem:[#allocation12_spill] sm:$0xff] %v5947_v9  ;;  %v5951_v41 = vld [vmem:[#allocation3 + $0x60] ss:$12 sps:$4 sm:$0xff]  }
 0x5b0   :  { %6909 = vst [vmem:[#allocation16_spill] sm:$0xff] %v5951_v41 }
 0x5b1   :  { %2208 = vmatpush1.bf16.msra.mxu0 %v5736_v30  ;;  %4042 = vmatpush3.bf16.msra.mxu1 %v5739_v35 }
 0x5b2   :  { %2209 = vmatprep.subr.bf16.mxu0 %v5742_v7  ;;  %4043 = vmatprep.subr.bf16.mxu1 %v6772_v56 }
 0x5b5   :  { %2210 = vmatpush1.bf16.msra.mxu0 %v5746_v54  ;;  %4044 = vmatpush3.bf16.msra.mxu1 %v6901_v49 }
 0x5b6   :  { %2211 = vmatprep.subr.bf16.mxu0 %v6902_v42  ;;  %4045 = vmatprep.subr.bf16.mxu1 %v6772_v56 }
 0x5b9   :  { %2212 = vmatpush1.bf16.msra.mxu0 %v6903_v3  ;;  %4046 = vmatpush3.bf16.msra.mxu1 %v6904_v8 }
 0x5ba   :  { %2213 = vmatprep.subr.bf16.mxu0 %v6905_v28  ;;  %4047 = vmatprep.subr.bf16.mxu1 %v6772_v56 }
 0x5bb   :  { %v4472_v11 = vpop.eup %4471 }
 0x5bc   :  { %v2197_v6 = vsub.f32 %v5777_v36, %v4472_v11  ;;  %v4474_v13 = vpop.eup %4473 }
 0x5bd   :  { %2214 = vmatpush1.bf16.msra.mxu0 %v5767_v22  ;;  %4048 = vmatpush3.bf16.msra.mxu1 %v6906_v10 }
 0x5be   :  { %2215 = vmatprep.subr.bf16.mxu0 %v5773_v25  ;;  %4049 = vmatprep.subr.bf16.mxu1 %v6772_v56  ;;  %v2198_v40 = vmul.f32 %v4474_v13, %v2197_v6  ;;  %v5957_v6 = vld [vmem:[#allocation3 + $0x4c] ss:$12 sps:$4 sm:$0xff]   ;;  %v5961_v13 = vld [vmem:[#allocation3 + $0x48] ss:$12 sps:$4 sm:$0xff]  }
 0x5bf   :  { %6911 = vst [vmem:[#allocation15_spill] sm:$0xff] %v5957_v6  ;;  %6912 = vst [vmem:[#allocation17_spill] sm:$0xff] %v5961_v13 }
 0x5c0   :  { %v5908_v46 = vadd.f32 %v4472_v11, %v2198_v40  ;;  %v5954_v11 = vld [vmem:[#allocation3 + $0x68] ss:$12 sps:$4 sm:$0xff]  }
 0x5c1   :  { %2216 = vmatpush1.bf16.msra.mxu0 %v5779_v33  ;;  %4050 = vmatpush3.bf16.msra.mxu1 %v5782_v38  ;;  %6910 = vst [vmem:[#allocation14_spill] sm:$0xff] %v5954_v11  ;;  %v5965_v40 = vld [vmem:[#allocation3 + $0x34] ss:$12 sps:$4 sm:$0xff]  }
 0x5c2   :  { %2303 = vmatprep.subr.bf16.mxu0 %v5912_v43  ;;  %4055 = vmatprep.subr.bf16.mxu1 %v6772_v56  ;;  %v2200_v36 = vpack.c.bf16 %v5908_v46, %v5908_v46  ;;  %6913 = vst [vmem:[#allocation18_spill] sm:$0xff] %v5965_v40 }
 0x5c4   :  { %2234 = vmatmul.mubr.bf16.vlgmr.msra.gmra.mxu0 %v2200_v36  ;;  %4052 = vmatmul.mubr.bf16.vlgmr.msra.gmra.mxu1 %v2200_v36 }
 0x5c5   :  { %2304 = vmatpush1.bf16.msra.mxu0 %v5918_v1  ;;  %4056 = vmatpush3.bf16.msra.mxu1 %v5921_v45 }
 0x5c6   :  { %2305 = vmatprep.subr.bf16.mxu0 %v5924_v50  ;;  %4057 = vmatprep.subr.bf16.mxu1 %v6772_v56 }
 0x5c7   :  { %2335 = vmatprep.mubr.bf16.mxu0 %v6773_v60  ;;  %4071 = vmatprep.mubr.msk.bf16.mxu1 %vm4764_vm1, %v6772_v56 }
 0x5c9   :  { %2306 = vmatpush1.bf16.msra.mxu0 %v5931_v55  ;;  %4058 = vmatpush3.bf16.msra.mxu1 %v5934_v34 }
 0x5ca   :  { %2307 = vmatprep.subr.bf16.mxu0 %v5937_v44  ;;  %4059 = vmatprep.subr.bf16.mxu1 %v6772_v56 }
 0x5cd   :  { %2308 = vmatpush1.bf16.msra.mxu0 %v5941_v29  ;;  %4060 = vmatpush3.bf16.msra.mxu1 %v5944_v18 }
 0x5ce   :  { %2309 = vmatprep.subr.bf16.mxu0 %v5947_v9  ;;  %4061 = vmatprep.subr.bf16.mxu1 %v6772_v56 }
 0x5d1   :  { %2310 = vmatpush1.bf16.msra.mxu0 %v5951_v41  ;;  %4062 = vmatpush3.bf16.msra.mxu1 %v5954_v11  ;;  %v5969_v41 = vld [vmem:[#allocation3 + $0x30] ss:$12 sps:$4 sm:$0xff]  }
 0x5d2   :  { %2311 = vmatprep.subr.bf16.mxu0 %v5957_v6  ;;  %4063 = vmatprep.subr.bf16.mxu1 %v6772_v56  ;;  %6914 = vst [vmem:[#allocation42_spill] sm:$0xff] %v5969_v41  ;;  %v5973_v6 = vld [vmem:[#allocation3 + $0x1c] ss:$12 sps:$4 sm:$0xff]  }
 0x5d3   :  { %6915 = vst [vmem:[#allocation62_spill] sm:$0xff] %v5973_v6 }
 0x5d5   :  { %2312 = vmatpush1.bf16.msra.mxu0 %v5961_v13  ;;  %4064 = vmatpush3.bf16.msra.mxu1 %v5578_v47  ;;  %v5977_v13 = vld [vmem:[#allocation3 + $0x18] ss:$12 sps:$4 sm:$0xff]  }
 0x5d6   :  { %2313 = vmatprep.subr.bf16.mxu0 %v5965_v40  ;;  %4065 = vmatprep.subr.bf16.mxu1 %v6772_v56  ;;  %6916 = vst [vmem:[#allocation43_spill] sm:$0xff] %v5977_v13  ;;  %v5981_v47 = vld [vmem:[#allocation3 + $0x4] ss:$12 sps:$4 sm:$0xff]  }
 0x5d7   :  { %6917 = vst [vmem:[#allocation44_spill] sm:$0xff] %v5981_v47 }
 0x5d9   :  { %2314 = vmatpush1.bf16.msra.mxu0 %v5969_v41  ;;  %4066 = vmatpush3.bf16.msra.mxu1 %v5584_v16  ;;  %v5985_v41 = vld [vmem:[#allocation3] ss:$12 sps:$4 sm:$0xff]  }
 0x5da   :  { %2315 = vmatprep.subr.bf16.mxu0 %v5973_v6  ;;  %4067 = vmatprep.subr.bf16.mxu1 %v6772_v56  ;;  %6918 = vst [vmem:[#allocation19_spill] sm:$0xff] %v5985_v41  ;;  %v6919_v16 = vld [vmem:[#allocation54_spill] sm:$0xff] }
 0x5dd   :  { %2316 = vmatpush1.bf16.msra.mxu0 %v5977_v13  ;;  %4068 = vmatpush3.bf16.msra.mxu1 %v5590_v31  ;;  %v6920_v31 = vld [vmem:[#allocation25_spill] sm:$0xff] }
 0x5de   :  { %2317 = vmatprep.subr.bf16.mxu0 %v5981_v47  ;;  %4069 = vmatprep.subr.bf16.mxu1 %v6772_v56 }
 0x5e1   :  { %2318 = vmatpush1.bf16.msra.mxu0 %v5985_v41  ;;  %4070 = vmatpush3.bf16.msra.mxu1 %v5596_v17  ;;  %v6921_v17 = vld [vmem:[#allocation26_spill] sm:$0xff] }
 0x5e2   :  { %2384 = vmatprep.subr.bf16.mxu0 %v5599_v19  ;;  %4075 = vmatprep.subr.bf16.mxu1 %v6772_v56  ;;  %v6922_v19 = vld [vmem:[#allocation27_spill] sm:$0xff] }
 0x5e4   :  { %2336 = vmatmul.mubr.bf16.vlgmr.msra.gmra.mxu0 %v2200_v36  ;;  %4072 = vmatmul.mubr.bf16.vlgmr.msra.gmra.mxu1 %v2200_v36  ;;  %v6932_v36 = vld [vmem:[#allocation30_spill] sm:$0xff] }
 0x5e5   :  { %2385 = vmatpush1.bf16.msra.mxu0 %v5603_v20  ;;  %4076 = vmatpush3.bf16.msra.mxu1 %v5606_v21  ;;  %v6923_v20 = vld [vmem:[#allocation28_spill] sm:$0xff]  ;;  %v6924_v21 = vld [vmem:[#allocation29_spill] sm:$0xff] }
 0x5e6   :  { %2386 = vmatprep.subr.bf16.mxu0 %v5609_v39  ;;  %4077 = vmatprep.subr.bf16.mxu1 %v6772_v56  ;;  %v6925_v39 = vld [vmem:[#allocation37_spill] sm:$0xff] }
 0x5e7   :  { %2416 = vmatprep.mubr.bf16.mxu0 %v6773_v60  ;;  %4091 = vmatprep.mubr.msk.bf16.mxu1 %vm4764_vm1, %v6772_v56 }
 0x5e9   :  { %2387 = vmatpush1.bf16.msra.mxu0 %v5616_v23  ;;  %4078 = vmatpush3.bf16.msra.mxu1 %v5619_v24  ;;  %v6926_v23 = vld [vmem:[#allocation38_spill] sm:$0xff]  ;;  %v6927_v24 = vld [vmem:[#allocation40_spill] sm:$0xff] }
 0x5ea   :  { %2388 = vmatprep.subr.bf16.mxu0 %v6878_v51  ;;  %4079 = vmatprep.subr.bf16.mxu1 %v6772_v56  ;;  %v6928_v51 = vld [vmem:[#allocation41_spill] sm:$0xff] }
 0x5ed   :  { %2389 = vmatpush1.bf16.msra.mxu0 %v6879_v48  ;;  %4080 = vmatpush3.bf16.msra.mxu1 %v6880_v52  ;;  %v6929_v48 = vld [vmem:[#allocation45_spill] sm:$0xff]  ;;  %v6930_v52 = vld [vmem:[#allocation46_spill] sm:$0xff] }
 0x5ee   :  { %2390 = vmatprep.subr.bf16.mxu0 %v6881_v12  ;;  %4081 = vmatprep.subr.bf16.mxu1 %v6772_v56  ;;  %v6931_v12 = vld [vmem:[#allocation49_spill] sm:$0xff] }
 0x5f1   :  { %2391 = vmatpush1.bf16.msra.mxu0 %v6919_v16  ;;  %4082 = vmatpush3.bf16.msra.mxu1 %v6920_v31  ;;  %v6933_v16 = vld [vmem:[#allocation31_spill] sm:$0xff] }
 0x5f2   :  { %2392 = vmatprep.subr.bf16.mxu0 %v6921_v17  ;;  %4083 = vmatprep.subr.bf16.mxu1 %v6772_v56 }
 0x5f5   :  { %2393 = vmatpush1.bf16.msra.mxu0 %v6922_v19  ;;  %4084 = vmatpush3.bf16.msra.mxu1 %v6923_v20 }
 0x5f6   :  { %2394 = vmatprep.subr.bf16.mxu0 %v6924_v21  ;;  %4085 = vmatprep.subr.bf16.mxu1 %v6772_v56 }
 0x5f9   :  { %2395 = vmatpush1.bf16.msra.mxu0 %v6925_v39  ;;  %4086 = vmatpush3.bf16.msra.mxu1 %v6926_v23 }
 0x5fa   :  { %2396 = vmatprep.subr.bf16.mxu0 %v6927_v24  ;;  %4087 = vmatprep.subr.bf16.mxu1 %v6772_v56 }
 0x5fd   :  { %2397 = vmatpush1.bf16.msra.mxu0 %v6928_v51  ;;  %4088 = vmatpush3.bf16.msra.mxu1 %v6929_v48 }
 0x5fe   :  { %2398 = vmatprep.subr.bf16.mxu0 %v6930_v52  ;;  %4089 = vmatprep.subr.bf16.mxu1 %v6772_v56 }
 0x601   :  { %2399 = vmatpush1.bf16.msra.mxu0 %v6931_v12  ;;  %4090 = vmatpush3.bf16.msra.mxu1 %v6932_v36 }
 0x602   :  { %2489 = vmatprep.subr.bf16.mxu0 %v6933_v16  ;;  %4095 = vmatprep.subr.bf16.mxu1 %v6772_v56 }
 0x664   :  { %v2130_v31 = vpop.f32.mrf.mxu0  ;;  %v2171_v17 = vpop.f32.mrf.mxu1 }
 0x665   :  { %v2131_v52 = vadd.f32 %v2130_v31, %v5315_v58 }
 0x666   :  { %v2132_v19 = vpop.f32.mrf.mxu0  ;;  %v4033_v20 = vpop.f32.mrf.mxu1 }
 0x668   :  { %v2134_v21 = vpop.f32.mrf.mxu0  ;;  %v2174_v39 = vpop.f32.mrf.mxu1 }
 0x669   :  { %v6934_v21 = vld [vmem:[#allocation10_spill] sm:$0xff] }
 0x66a   :  { %v2135_v23 = vpop.f32.mrf.mxu0  ;;  %v4034_v24 = vpop.f32.mrf.mxu1  ;;  %v2133_v39 = vadd.f32 %v2132_v19, %v6934_v21 }
 0x684   :  { %v2235_v51 = vpop.f32.mrf.mxu0  ;;  %v2276_v48 = vpop.f32.mrf.mxu1 }
 0x685   :  { %v2236_v12 = vadd.f32 %v2235_v51, %v5318_v63 }
 0x686   :  { %v2237_v41 = vpop.f32.mrf.mxu0  ;;  %v4053_v36 = vpop.f32.mrf.mxu1 }
 0x687   :  { %v2282_v47 = vadd.f32 %v2236_v12, %v2131_v52  ;;  %v2238_v20 = vadd.f32 %v2237_v41, %v5323_v53 }
 0x688   :  { %v2239_v16 = vpop.f32.mrf.mxu0  ;;  %v2279_v13 = vpop.f32.mrf.mxu1 }
 0x689   :  { %v3482_v6 = vmul.f32 -1.442695, %v2282_v47  ;;  %v2283_v23 = vadd.f32 %v2238_v20, %v2133_v39  ;;  %v2277_v20 = vadd.f32 %v2276_v48, %v5335_v57 }
 0x68a   :  { %v2240_v40 = vpop.f32.mrf.mxu0  ;;  %v4054_v11 = vpop.f32.mrf.mxu1 }
 0x68b   :  { %4475 = vpow2.f32 %v3482_v6  ;;  %v3483_v24 = vmul.f32 -1.442695, %v2283_v23  ;;  %v6935_v40 = vld [vmem:[#allocation13_spill] sm:$0xff] }
 0x68c   :  { %v2172_v11 = vadd.f32 %v2171_v17, %v6935_v40  ;;  %v6936_v6 = vld [vmem:[#allocation53_spill] sm:$0xff] }
 0x68d   :  { %4477 = vpow2.f32 %v3483_v24 }
 0x698   :  { %v4476_v9 = vpop.eup %4475 }
 0x699   :  { %v2290_v18 = vadd.f32 1.0, %v4476_v9 }
 0x69a   :  { %v4478_v47 = vpop.eup %4477 }
 0x69b   :  { %4479 = vrcp.f32 %v2290_v18  ;;  %v2291_v21 = vadd.f32 1.0, %v4478_v47 }
 0x6a4   :  { %v2337_v31 = vpop.f32.mrf.mxu0  ;;  %v2378_v51 = vpop.f32.mrf.mxu1 }
 0x6a5   :  { %v2338_v52 = vadd.f32 %v2337_v31, %v6786_v2 }
 0x6a6   :  { %v2339_v12 = vpop.f32.mrf.mxu0  ;;  %v4073_v13 = vpop.f32.mrf.mxu1 }
 0x6a7   :  { %v2468_v36 = vadd.f32 %v2338_v52, %v6936_v6  ;;  %v2340_v31 = vadd.f32 %v2339_v12, %v5221_v15  ;;  %v6937_v13 = vld [vmem:[#allocation55_spill] sm:$0xff] }
 0x6a8   :  { %v4480_v41 = vpop.eup %4479  ;;  %v2341_v16 = vpop.f32.mrf.mxu0 }
 0x6a9   :  { %v2381_v19 = vpop.f32.mrf.mxu1  ;;  %v2296_v39 = vmul.f32 %v4480_v41, %v2172_v11  ;;  %v3484_v9 = vmul.f32 -1.442695, %v2468_v36  ;;  %v2469_v17 = vadd.f32 %v2340_v31, %v6937_v13  ;;  %v6151_v31 = vld [vmem:[#allocation7 + $0x78] ss:$12 sps:$4 sm:$0xff]   ;;  %v6154_v13 = vld [vmem:[#allocation7 + $0x80] ss:$12 sps:$4 sm:$0xff]  }
 0x6aa   :  { %v2342_v23 = vpop.f32.mrf.mxu0  ;;  %v6124_v19 = vld [vmem:[#allocation7 + $0xac] ss:$12 sps:$4 sm:$0xff]   ;;  %6951 = vst [vmem:[#allocation20_spill] sm:$0xff] %v6151_v31  ;;  %6952 = vst [vmem:[#allocation47_spill] sm:$0xff] %v6154_v13 }
 0x6ab   :  { %v4074_v18 = vpop.f32.mrf.mxu1  ;;  %v2297_v24 = vadd.f32 %v2296_v39, %v2277_v20  ;;  %4481 = vpow2.f32 %v3484_v9  ;;  %v3485_v40 = vmul.f32 -1.442695, %v2469_v17  ;;  %v6128_v20 = vld [vmem:[#allocation7 + $0xa8] ss:$12 sps:$4 sm:$0xff]   ;;  %v6131_v39 = vld [vmem:[#allocation7 + $0xb0] ss:$12 sps:$4 sm:$0xff]  }
 0x6ac   :  { %v6134_v9 = vld [vmem:[#allocation7 + $0x94] ss:$12 sps:$4 sm:$0xff]   ;;  %v6141_v23 = vld [vmem:[#allocation7 + $0x90] ss:$12 sps:$4 sm:$0xff]   ;;  %v6144_v18 = vld [vmem:[#allocation7 + $0x98] ss:$12 sps:$4 sm:$0xff]  }
 0x6ad   :  { %4483 = vtanh.f32 %v2297_v24  ;;  %v6147_v24 = vld [vmem:[#allocation7 + $0x7c] ss:$12 sps:$4 sm:$0xff]   ;;  %v6157_v17 = vld [vmem:[#allocation7 + $0x64] ss:$12 sps:$4 sm:$0xff]  }
 0x6ae   :  { %4485 = vrcp.f32 %v2291_v21  ;;  %v2379_v21 = vadd.f32 %v2378_v51, %v5226_v62  ;;  %v6121_v51 = vld [vmem:[#allocation3 + $0x8] ss:$12 sps:$4 sm:$0xff]   ;;  %6953 = vst [vmem:[#allocation48_spill] sm:$0xff] %v6157_v17 }
 0x6af   :  { %4487 = vpow2.f32 %v3485_v40 }
 0x6b8   :  { %v4482_v52 = vpop.eup %4481 }
 0x6b9   :  { %v2476_v6 = vadd.f32 1.0, %v4482_v52  ;;  %v6161_v52 = vld [vmem:[#allocation7 + $0x60] ss:$12 sps:$4 sm:$0xff]  }
 0x6ba   :  { %v4484_v16 = vpop.eup %4483  ;;  %6954 = vst [vmem:[#allocation52_spill] sm:$0xff] %v6161_v52 }
 0x6bb   :  { %4489 = vrcp.f32 %v2476_v6  ;;  %v2299_v48 = vsub.f32 %v5870_v32, %v4484_v16  ;;  %v4486_v11 = vpop.eup %4485  ;;  %v6164_v6 = vld [vmem:[#allocation7 + $0x68] ss:$12 sps:$4 sm:$0xff]  }
 0x6bc   :  { %v4488_v32 = vpop.eup %4487  ;;  %6955 = vst [vmem:[#allocation21_spill] sm:$0xff] %v6164_v6 }
 0x6bd   :  { %v2300_v36 = vmul.f32 %v4486_v11, %v2299_v48  ;;  %v2477_v40 = vadd.f32 1.0, %v4488_v32  ;;  %v6171_v48 = vld [vmem:[#allocation7 + $0x48] ss:$12 sps:$4 sm:$0xff]   ;;  %v6174_v11 = vld [vmem:[#allocation7 + $0x50] ss:$12 sps:$4 sm:$0xff]  }
 0x6be   :  { %6957 = vst [vmem:[#allocation23_spill] sm:$0xff] %v6171_v48  ;;  %6958 = vst [vmem:[#allocation24_spill] sm:$0xff] %v6174_v11  ;;  %v6184_v32 = vld [vmem:[#allocation7 + $0x38] ss:$12 sps:$4 sm:$0xff]  }
 0x6bf   :  { %v6037_v41 = vadd.f32 %v4484_v16, %v2300_v36  ;;  %v6167_v16 = vld [vmem:[#allocation7 + $0x4c] ss:$12 sps:$4 sm:$0xff]   ;;  %v6177_v36 = vld [vmem:[#allocation7 + $0x34] ss:$12 sps:$4 sm:$0xff]   ;;  %6961 = vst [vmem:[#allocation58_spill] sm:$0xff] %v6184_v32 }
 0x6c0   :  { %6956 = vst [vmem:[#allocation22_spill] sm:$0xff] %v6167_v16  ;;  %6959 = vst [vmem:[#allocation50_spill] sm:$0xff] %v6177_v36 }
 0x6c1   :  { %v2302_v47 = vpack.c.bf16 %v6037_v41, %v6037_v41 }
 0x6c3   :  { %2417 = vmatmul.mubr.bf16.vlgmr.msra.gmra.mxu0 %v2302_v47  ;;  %4092 = vmatmul.mubr.bf16.vlgmr.msra.gmra.mxu1 %v2302_v47  ;;  %v6181_v47 = vld [vmem:[#allocation7 + $0x30] ss:$12 sps:$4 sm:$0xff]  }
 0x6c4   :  { %2490 = vmatpush1.bf16.msra.mxu0 %v5701_v61  ;;  %4096 = vmatpush3.bf16.msra.mxu1 %v5704_v26  ;;  %v6938_v26 = vld [vmem:[#allocation63_spill] sm:$0xff]  ;;  %6960 = vst [vmem:[#allocation51_spill] sm:$0xff] %v6181_v47 }
 0x6c5   :  { %2491 = vmatprep.subr.bf16.mxu0 %v5707_v59  ;;  %4097 = vmatprep.subr.bf16.mxu1 %v6772_v56 }
 0x6c6   :  { %2521 = vmatprep.mubr.bf16.mxu0 %v6773_v60  ;;  %4111 = vmatprep.mubr.msk.bf16.mxu1 %vm4764_vm1, %v6772_v56 }
 0x6c8   :  { %v4490_v12 = vpop.eup %4489  ;;  %2492 = vmatpush1.bf16.msra.mxu0 %v5715_v0  ;;  %4098 = vmatpush3.bf16.msra.mxu1 %v5718_v14 }
 0x6c9   :  { %v2482_v61 = vmul.f32 %v4490_v12, %v2379_v21  ;;  %2493 = vmatprep.subr.bf16.mxu0 %v5721_v4  ;;  %4099 = vmatprep.subr.bf16.mxu1 %v6772_v56  ;;  %v6187_v21 = vld [vmem:[#allocation7 + $0x1c] ss:$12 sps:$4 sm:$0xff]   ;;  %v6191_v12 = vld [vmem:[#allocation7 + $0x18] ss:$12 sps:$4 sm:$0xff]  }
 0x6ca   :  { %6962 = vst [vmem:[#allocation32_spill] sm:$0xff] %v6187_v21  ;;  %6963 = vst [vmem:[#allocation33_spill] sm:$0xff] %v6191_v12 }
 0x6cb   :  { %v2483_v59 = vadd.f32 %v2482_v61, %v6938_v26  ;;  %v6194_v61 = vld [vmem:[#allocation7 + $0x20] ss:$12 sps:$4 sm:$0xff]   ;;  %v6197_v26 = vld [vmem:[#allocation7 + $0x4] ss:$12 sps:$4 sm:$0xff]  }
 0x6cc   :  { %2494 = vmatpush1.bf16.msra.mxu0 %v5726_v37  ;;  %4100 = vmatpush3.bf16.msra.mxu1 %v5729_v5  ;;  %6964 = vst [vmem:[#allocation34_spill] sm:$0xff] %v6194_v61  ;;  %6965 = vst [vmem:[#allocation35_spill] sm:$0xff] %v6197_v26 }
 0x6cd   :  { %4491 = vtanh.f32 %v2483_v59  ;;  %2495 = vmatprep.subr.bf16.mxu0 %v5732_v27  ;;  %4101 = vmatprep.subr.bf16.mxu1 %v6772_v56  ;;  %v6201_v59 = vld [vmem:[#allocation7] ss:$12 sps:$4 sm:$0xff]  }
 0x6ce   :  { %4493 = vrcp.f32 %v2477_v40  ;;  %6966 = vst [vmem:[#allocation36_spill] sm:$0xff] %v6201_v59  ;;  %v6204_v40 = vld [vmem:[#allocation7 + $0x8] ss:$12 sps:$4 sm:$0xff]  }
 0x6cf   :  { %6967 = vst [vmem:[#allocation39_spill] sm:$0xff] %v6204_v40 }
 0x6d0   :  { %2496 = vmatpush1.bf16.msra.mxu0 %v5736_v30  ;;  %4102 = vmatpush3.bf16.msra.mxu1 %v5739_v35  ;;  %v6939_v30 = vld [vmem:[#allocation11_spill] sm:$0xff]  ;;  %v6940_v35 = vld [vmem:[#allocation12_spill] sm:$0xff] }
 0x6d1   :  { %2497 = vmatprep.subr.bf16.mxu0 %v5742_v7  ;;  %4103 = vmatprep.subr.bf16.mxu1 %v6772_v56  ;;  %v6941_v7 = vld [vmem:[#allocation16_spill] sm:$0xff] }
 0x6d4   :  { %2498 = vmatpush1.bf16.msra.mxu0 %v5746_v54  ;;  %4104 = vmatpush3.bf16.msra.mxu1 %v6901_v49  ;;  %v6942_v54 = vld [vmem:[#allocation14_spill] sm:$0xff] }
 0x6d5   :  { %2499 = vmatprep.subr.bf16.mxu0 %v6902_v42  ;;  %4105 = vmatprep.subr.bf16.mxu1 %v6772_v56  ;;  %v6946_v49 = vld [vmem:[#allocation42_spill] sm:$0xff] }
 0x6d6   :  { %v6109_v42 = vld [vmem:[#allocation3 + $0x38] ss:$12 sps:$4 sm:$0xff]  }
 0x6d8   :  { %2500 = vmatpush1.bf16.msra.mxu0 %v6903_v3  ;;  %4106 = vmatpush3.bf16.msra.mxu1 %v6904_v8  ;;  %v6947_v3 = vld [vmem:[#allocation62_spill] sm:$0xff]  ;;  %v6948_v8 = vld [vmem:[#allocation43_spill] sm:$0xff] }
 0x6d9   :  { %2501 = vmatprep.subr.bf16.mxu0 %v6905_v28  ;;  %4107 = vmatprep.subr.bf16.mxu1 %v6772_v56  ;;  %v6115_v28 = vld [vmem:[#allocation3 + $0x20] ss:$12 sps:$4 sm:$0xff]  }
 0x6da   :  { %v4492_v0 = vpop.eup %4491 }
 0x6db   :  { %v2485_v14 = vsub.f32 %v5908_v46, %v4492_v0  ;;  %v4494_v4 = vpop.eup %4493  ;;  %v6950_v46 = vld [vmem:[#allocation19_spill] sm:$0xff] }
 0x6dc   :  { %2502 = vmatpush1.bf16.msra.mxu0 %v5767_v22  ;;  %4108 = vmatpush3.bf16.msra.mxu1 %v6906_v10  ;;  %v6103_v22 = vld [vmem:[#allocation3 + $0x50] ss:$12 sps:$4 sm:$0xff]  }
 0x6dd   :  { %2503 = vmatprep.subr.bf16.mxu0 %v5773_v25  ;;  %4109 = vmatprep.subr.bf16.mxu1 %v6772_v56  ;;  %v2486_v37 = vmul.f32 %v4494_v4, %v2485_v14  ;;  %v6944_v25 = vld [vmem:[#allocation17_spill] sm:$0xff]  ;;  %v6949_v10 = vld [vmem:[#allocation44_spill] sm:$0xff] }
 0x6df   :  { %v6075_v5 = vadd.f32 %v4492_v0, %v2486_v37  ;;  %v6207_v0 = vld [vmem:[#allocation5 + $0xac] ss:$12 sps:$4 sm:$0xff]  }
 0x6e0   :  { %2504 = vmatpush1.bf16.msra.mxu0 %v5779_v33  ;;  %4110 = vmatpush3.bf16.msra.mxu1 %v5782_v38  ;;  %v6943_v33 = vld [vmem:[#allocation15_spill] sm:$0xff]  ;;  %v6945_v38 = vld [vmem:[#allocation18_spill] sm:$0xff]  ;;  %6968 = vst [vmem:[#allocation54_spill] sm:$0xff] %v6207_v0 }
 0x6e1   :  { %v2488_v27 = vpack.c.bf16 %v6075_v5, %v6075_v5  ;;  %2591 = vmatprep.subr.bf16.mxu0 %v5912_v43  ;;  %4115 = vmatprep.subr.bf16.mxu1 %v6772_v56 }
 0x6e3   :  { %2522 = vmatmul.mubr.bf16.vlgmr.msra.gmra.mxu0 %v2488_v27  ;;  %4112 = vmatmul.mubr.bf16.vlgmr.msra.gmra.mxu1 %v2488_v27 }
 0x6e4   :  { %2592 = vmatpush1.bf16.msra.mxu0 %v5918_v1  ;;  %4116 = vmatpush3.bf16.msra.mxu1 %v5921_v45 }
 0x6e5   :  { %2593 = vmatprep.subr.bf16.mxu0 %v5924_v50  ;;  %4117 = vmatprep.subr.bf16.mxu1 %v6772_v56 }
 0x6e6   :  { %2623 = vmatprep.mubr.bf16.mxu0 %v6773_v60  ;;  %4131 = vmatprep.mubr.msk.bf16.mxu1 %vm4764_vm1, %v6772_v56 }
 0x6e8   :  { %2594 = vmatpush1.bf16.msra.mxu0 %v5931_v55  ;;  %4118 = vmatpush3.bf16.msra.mxu1 %v5934_v34 }
 0x6e9   :  { %2595 = vmatprep.subr.bf16.mxu0 %v5937_v44  ;;  %4119 = vmatprep.subr.bf16.mxu1 %v6772_v56 }
 0x6ec   :  { %2596 = vmatpush1.bf16.msra.mxu0 %v5941_v29  ;;  %4120 = vmatpush3.bf16.msra.mxu1 %v6939_v30 }
 0x6ed   :  { %2597 = vmatprep.subr.bf16.mxu0 %v6940_v35  ;;  %4121 = vmatprep.subr.bf16.mxu1 %v6772_v56 }
 0x6f0   :  { %2598 = vmatpush1.bf16.msra.mxu0 %v6941_v7  ;;  %4122 = vmatpush3.bf16.msra.mxu1 %v6942_v54 }
 0x6f1   :  { %2599 = vmatprep.subr.bf16.mxu0 %v6943_v33  ;;  %4123 = vmatprep.subr.bf16.mxu1 %v6772_v56 }
 0x6f4   :  { %2600 = vmatpush1.bf16.msra.mxu0 %v6944_v25  ;;  %4124 = vmatpush3.bf16.msra.mxu1 %v6103_v22 }
 0x6f5   :  { %2601 = vmatprep.subr.bf16.mxu0 %v6945_v38  ;;  %4125 = vmatprep.subr.bf16.mxu1 %v6772_v56 }
 0x6f8   :  { %2602 = vmatpush1.bf16.msra.mxu0 %v6946_v49  ;;  %4126 = vmatpush3.bf16.msra.mxu1 %v6109_v42 }
 0x6f9   :  { %2603 = vmatprep.subr.bf16.mxu0 %v6947_v3  ;;  %4127 = vmatprep.subr.bf16.mxu1 %v6772_v56 }
 0x6fc   :  { %2604 = vmatpush1.bf16.msra.mxu0 %v6948_v8  ;;  %4128 = vmatpush3.bf16.msra.mxu1 %v6115_v28 }
 0x6fd   :  { %2605 = vmatprep.subr.bf16.mxu0 %v6949_v10  ;;  %4129 = vmatprep.subr.bf16.mxu1 %v6772_v56 }
 0x700   :  { %2606 = vmatpush1.bf16.msra.mxu0 %v6950_v46  ;;  %4130 = vmatpush3.bf16.msra.mxu1 %v6121_v51 }
 0x701   :  { %2672 = vmatprep.subr.bf16.mxu0 %v6124_v19  ;;  %4135 = vmatprep.subr.bf16.mxu1 %v6772_v56 }
 0x703   :  { %2624 = vmatmul.mubr.bf16.vlgmr.msra.gmra.mxu0 %v2488_v27  ;;  %4132 = vmatmul.mubr.bf16.vlgmr.msra.gmra.mxu1 %v2488_v27 }
 0x704   :  { %2673 = vmatpush1.bf16.msra.mxu0 %v6128_v20  ;;  %4136 = vmatpush3.bf16.msra.mxu1 %v6131_v39 }
 0x705   :  { %2674 = vmatprep.subr.bf16.mxu0 %v6134_v9  ;;  %4137 = vmatprep.subr.bf16.mxu1 %v6772_v56 }
 0x706   :  { %2704 = vmatprep.mubr.bf16.mxu0 %v6773_v60  ;;  %4151 = vmatprep.mubr.msk.bf16.mxu1 %vm4764_vm1, %v6772_v56 }
 0x708   :  { %2675 = vmatpush1.bf16.msra.mxu0 %v6141_v23  ;;  %4138 = vmatpush3.bf16.msra.mxu1 %v6144_v18 }
 0x709   :  { %2676 = vmatprep.subr.bf16.mxu0 %v6147_v24  ;;  %4139 = vmatprep.subr.bf16.mxu1 %v6772_v56 }
 0x70c   :  { %2677 = vmatpush1.bf16.msra.mxu0 %v6151_v31  ;;  %4140 = vmatpush3.bf16.msra.mxu1 %v6154_v13 }
 0x70d   :  { %2678 = vmatprep.subr.bf16.mxu0 %v6157_v17  ;;  %4141 = vmatprep.subr.bf16.mxu1 %v6772_v56 }
 0x710   :  { %2679 = vmatpush1.bf16.msra.mxu0 %v6161_v52  ;;  %4142 = vmatpush3.bf16.msra.mxu1 %v6164_v6 }
 0x711   :  { %2680 = vmatprep.subr.bf16.mxu0 %v6167_v16  ;;  %4143 = vmatprep.subr.bf16.mxu1 %v6772_v56 }
 0x714   :  { %2681 = vmatpush1.bf16.msra.mxu0 %v6171_v48  ;;  %4144 = vmatpush3.bf16.msra.mxu1 %v6174_v11 }
 0x715   :  { %2682 = vmatprep.subr.bf16.mxu0 %v6177_v36  ;;  %4145 = vmatprep.subr.bf16.mxu1 %v6772_v56 }
 0x718   :  { %2683 = vmatpush1.bf16.msra.mxu0 %v6181_v47  ;;  %4146 = vmatpush3.bf16.msra.mxu1 %v6184_v32 }
 0x719   :  { %2684 = vmatprep.subr.bf16.mxu0 %v6187_v21  ;;  %4147 = vmatprep.subr.bf16.mxu1 %v6772_v56 }
 0x71c   :  { %2685 = vmatpush1.bf16.msra.mxu0 %v6191_v12  ;;  %4148 = vmatpush3.bf16.msra.mxu1 %v6194_v61 }
 0x71d   :  { %2686 = vmatprep.subr.bf16.mxu0 %v6197_v26  ;;  %4149 = vmatprep.subr.bf16.mxu1 %v6772_v56 }
 0x720   :  { %2687 = vmatpush1.bf16.msra.mxu0 %v6201_v59  ;;  %4150 = vmatpush3.bf16.msra.mxu1 %v6204_v40 }
 0x721   :  { %2777 = vmatprep.subr.bf16.mxu0 %v6207_v0  ;;  %4155 = vmatprep.subr.bf16.mxu1 %v6772_v56 }
 0x783   :  { %v2418_v14 = vpop.f32.mrf.mxu0  ;;  %v2459_v4 = vpop.f32.mrf.mxu1 }
 0x784   :  { %v2419_v47 = vadd.f32 %v2418_v14, %v5315_v58 }
 0x785   :  { %v2420_v37 = vpop.f32.mrf.mxu0  ;;  %v4093_v27 = vpop.f32.mrf.mxu1 }
 0x787   :  { %v2422_v26 = vpop.f32.mrf.mxu0  ;;  %v2462_v61 = vpop.f32.mrf.mxu1 }
 0x788   :  { %v6969_v61 = vld [vmem:[#allocation10_spill] sm:$0xff] }
 0x789   :  { %v2423_v12 = vpop.f32.mrf.mxu0  ;;  %v4094_v21 = vpop.f32.mrf.mxu1 }
 0x78a   :  { %v2421_v12 = vadd.f32 %v2420_v37, %v6969_v61 }
 0x7a3   :  { %v2523_v32 = vpop.f32.mrf.mxu0  ;;  %v2564_v59 = vpop.f32.mrf.mxu1 }
 0x7a4   :  { %v2524_v40 = vadd.f32 %v2523_v32, %v5318_v63 }
 0x7a5   :  { %v2525_v36 = vpop.f32.mrf.mxu0  ;;  %v4113_v11 = vpop.f32.mrf.mxu1 }
 0x7a6   :  { %v2570_v48 = vadd.f32 %v2524_v40, %v2419_v47  ;;  %v2526_v26 = vadd.f32 %v2525_v36, %v5323_v53 }
 0x7a7   :  { %v2527_v0 = vpop.f32.mrf.mxu0  ;;  %v2567_v16 = vpop.f32.mrf.mxu1 }
 0x7a8   :  { %v3486_v6 = vmul.f32 -1.442695, %v2570_v48  ;;  %v2571_v21 = vadd.f32 %v2526_v26, %v2421_v12  ;;  %v2565_v26 = vadd.f32 %v2564_v59, %v5335_v57 }
 0x7a9   :  { %v2528_v52 = vpop.f32.mrf.mxu0  ;;  %v4114_v17 = vpop.f32.mrf.mxu1 }
 0x7aa   :  { %4495 = vpow2.f32 %v3486_v6  ;;  %v3487_v27 = vmul.f32 -1.442695, %v2571_v21  ;;  %v6970_v52 = vld [vmem:[#allocation13_spill] sm:$0xff] }
 0x7ab   :  { %v2460_v17 = vadd.f32 %v2459_v4, %v6970_v52  ;;  %v6971_v6 = vld [vmem:[#allocation57_spill] sm:$0xff] }
 0x7ac   :  { %4497 = vpow2.f32 %v3487_v27 }
 0x7b7   :  { %v4496_v13 = vpop.eup %4495 }
 0x7b8   :  { %v2578_v31 = vadd.f32 1.0, %v4496_v13 }
 0x7b9   :  { %v4498_v48 = vpop.eup %4497 }
 0x7ba   :  { %4499 = vrcp.f32 %v2578_v31  ;;  %v2579_v61 = vadd.f32 1.0, %v4498_v48 }
 0x7c3   :  { %v2625_v32 = vpop.f32.mrf.mxu0  ;;  %v2666_v14 = vpop.f32.mrf.mxu1 }
 0x7c4   :  { %v2626_v11 = vadd.f32 %v2625_v32, %v6786_v2 }
 0x7c5   :  { %v2627_v47 = vpop.f32.mrf.mxu0  ;;  %v4133_v16 = vpop.f32.mrf.mxu1 }
 0x7c6   :  { %v2756_v40 = vadd.f32 %v2626_v11, %v6971_v6  ;;  %v2628_v32 = vadd.f32 %v2627_v47, %v5221_v15  ;;  %v6972_v16 = vld [vmem:[#allocation59_spill] sm:$0xff]  ;;  %v6229_v47 = vld [vmem:[#allocation5 + $0xb0] ss:$12 sps:$4 sm:$0xff]  }
 0x7c7   :  { %v4500_v36 = vpop.eup %4499  ;;  %v2629_v0 = vpop.f32.mrf.mxu0 }
 0x7c8   :  { %v2669_v37 = vpop.f32.mrf.mxu1  ;;  %v2584_v12 = vmul.f32 %v4500_v36, %v2460_v17  ;;  %v3488_v13 = vmul.f32 -1.442695, %v2756_v40  ;;  %v2757_v4 = vadd.f32 %v2628_v32, %v6972_v16 }
 0x7c9   :  { %v2630_v21 = vpop.f32.mrf.mxu0  ;;  %v2667_v37 = vadd.f32 %v2666_v14, %v5226_v62  ;;  %v6251_v14 = vld [vmem:[#allocation5 + $0x78] ss:$12 sps:$4 sm:$0xff]  }
 0x7ca   :  { %v4134_v31 = vpop.f32.mrf.mxu1  ;;  %v2585_v27 = vadd.f32 %v2584_v12, %v2565_v26  ;;  %4501 = vpow2.f32 %v3488_v13  ;;  %v3489_v52 = vmul.f32 -1.442695, %v2757_v4  ;;  %v6240_v12 = vld [vmem:[#allocation5 + $0x90] ss:$12 sps:$4 sm:$0xff]   ;;  %v6243_v13 = vld [vmem:[#allocation5 + $0x98] ss:$12 sps:$4 sm:$0xff]  }
 0x7cb   :  { %v6246_v31 = vld [vmem:[#allocation5 + $0x7c] ss:$12 sps:$4 sm:$0xff]   ;;  %v6254_v4 = vld [vmem:[#allocation5 + $0x80] ss:$12 sps:$4 sm:$0xff]  }
 0x7cc   :  { %4503 = vtanh.f32 %v2585_v27  ;;  %v6973_v27 = vld [vmem:[#allocation56_spill] sm:$0xff] }
 0x7cd   :  { %4505 = vrcp.f32 %v2579_v61  ;;  %v6226_v61 = vld [vmem:[#allocation5 + $0xa8] ss:$12 sps:$4 sm:$0xff]  }
 0x7ce   :  { %4507 = vpow2.f32 %v3489_v52  ;;  %v6232_v52 = vld [vmem:[#allocation5 + $0x94] ss:$12 sps:$4 sm:$0xff]  }
 0x7d7   :  { %v4502_v11 = vpop.eup %4501 }
 0x7d8   :  { %v2764_v6 = vadd.f32 1.0, %v4502_v11  ;;  %v6257_v11 = vld [vmem:[#allocation5 + $0x64] ss:$12 sps:$4 sm:$0xff]  }
 0x7d9   :  { %v4504_v0 = vpop.eup %4503 }
 0x7da   :  { %4509 = vrcp.f32 %v2764_v6  ;;  %v2587_v59 = vsub.f32 %v6037_v41, %v4504_v0  ;;  %v4506_v17 = vpop.eup %4505  ;;  %v6261_v6 = vld [vmem:[#allocation5 + $0x60] ss:$12 sps:$4 sm:$0xff]  }
 0x7db   :  { %v4508_v41 = vpop.eup %4507 }
 0x7dc   :  { %v2588_v40 = vmul.f32 %v4506_v17, %v2587_v59  ;;  %v2765_v16 = vadd.f32 1.0, %v4508_v41  ;;  %v6267_v59 = vld [vmem:[#allocation5 + $0x4c] ss:$12 sps:$4 sm:$0xff]   ;;  %v6271_v17 = vld [vmem:[#allocation5 + $0x48] ss:$12 sps:$4 sm:$0xff]  }
 0x7dd   :  { %v6281_v41 = vld [vmem:[#allocation5 + $0x30] ss:$12 sps:$4 sm:$0xff]  }
 0x7de   :  { %v6222_v36 = vadd.f32 %v4504_v0, %v2588_v40  ;;  %v6264_v0 = vld [vmem:[#allocation5 + $0x68] ss:$12 sps:$4 sm:$0xff]   ;;  %v6274_v40 = vld [vmem:[#allocation5 + $0x50] ss:$12 sps:$4 sm:$0xff]   ;;  %6976 = vst [vmem:[#allocation27_spill] sm:$0xff] %v6281_v41 }
 0x7df   :  { %6974 = vst [vmem:[#allocation25_spill] sm:$0xff] %v6274_v40 }
 0x7e0   :  { %v2590_v48 = vpack.c.bf16 %v6222_v36, %v6222_v36 }
 0x7e2   :  { %2705 = vmatmul.mubr.bf16.vlgmr.msra.gmra.mxu0 %v2590_v48  ;;  %4152 = vmatmul.mubr.bf16.vlgmr.msra.gmra.mxu1 %v2590_v48  ;;  %v6277_v48 = vld [vmem:[#allocation5 + $0x34] ss:$12 sps:$4 sm:$0xff]  }
 0x7e3   :  { %2778 = vmatpush1.bf16.msra.mxu0 %v6226_v61  ;;  %4156 = vmatpush3.bf16.msra.mxu1 %v6229_v47  ;;  %6975 = vst [vmem:[#allocation26_spill] sm:$0xff] %v6277_v48 }
 0x7e4   :  { %2779 = vmatprep.subr.bf16.mxu0 %v6232_v52  ;;  %4157 = vmatprep.subr.bf16.mxu1 %v6772_v56 }
 0x7e5   :  { %2809 = vmatprep.mubr.bf16.mxu0 %v6773_v60  ;;  %4171 = vmatprep.mubr.msk.bf16.mxu1 %vm4764_vm1, %v6772_v56 }
 0x7e7   :  { %v4510_v26 = vpop.eup %4509  ;;  %2780 = vmatpush1.bf16.msra.mxu0 %v6240_v12  ;;  %4158 = vmatpush3.bf16.msra.mxu1 %v6243_v13 }
 0x7e8   :  { %v2770_v21 = vmul.f32 %v4510_v26, %v2667_v37  ;;  %2781 = vmatprep.subr.bf16.mxu0 %v6246_v31  ;;  %4159 = vmatprep.subr.bf16.mxu1 %v6772_v56  ;;  %v6284_v37 = vld [vmem:[#allocation5 + $0x38] ss:$12 sps:$4 sm:$0xff]   ;;  %v6287_v26 = vld [vmem:[#allocation5 + $0x1c] ss:$12 sps:$4 sm:$0xff]  }
 0x7e9   :  { %6977 = vst [vmem:[#allocation28_spill] sm:$0xff] %v6284_v37  ;;  %6978 = vst [vmem:[#allocation29_spill] sm:$0xff] %v6287_v26 }
 0x7ea   :  { %v2771_v32 = vadd.f32 %v2770_v21, %v6973_v27 }
 0x7eb   :  { %2782 = vmatpush1.bf16.msra.mxu0 %v6251_v14  ;;  %4160 = vmatpush3.bf16.msra.mxu1 %v6254_v4 }
 0x7ec   :  { %4511 = vtanh.f32 %v2771_v32  ;;  %2783 = vmatprep.subr.bf16.mxu0 %v6257_v11  ;;  %4161 = vmatprep.subr.bf16.mxu1 %v6772_v56 }
 0x7ed   :  { %4513 = vrcp.f32 %v2765_v16  ;;  %v6292_v16 = vld [vmem:[#allocation5 + $0x18] ss:$12 sps:$4 sm:$0xff]  }
 0x7ef   :  { %2784 = vmatpush1.bf16.msra.mxu0 %v6261_v6  ;;  %4162 = vmatpush3.bf16.msra.mxu1 %v6264_v0 }
 0x7f0   :  { %2785 = vmatprep.subr.bf16.mxu0 %v6267_v59  ;;  %4163 = vmatprep.subr.bf16.mxu1 %v6772_v56 }
 0x7f3   :  { %2786 = vmatpush1.bf16.msra.mxu0 %v6271_v17  ;;  %4164 = vmatpush3.bf16.msra.mxu1 %v6274_v40  ;;  %v6304_v40 = vld [vmem:[#allocation5] ss:$12 sps:$4 sm:$0xff]  }
 0x7f4   :  { %2787 = vmatprep.subr.bf16.mxu0 %v6277_v48  ;;  %4165 = vmatprep.subr.bf16.mxu1 %v6772_v56  ;;  %v6295_v48 = vld [vmem:[#allocation5 + $0x20] ss:$12 sps:$4 sm:$0xff]  }
 0x7f7   :  { %2788 = vmatpush1.bf16.msra.mxu0 %v6281_v41  ;;  %4166 = vmatpush3.bf16.msra.mxu1 %v6284_v37  ;;  %v6298_v41 = vld [vmem:[#allocation5 + $0x4] ss:$12 sps:$4 sm:$0xff]  }
 0x7f8   :  { %2789 = vmatprep.subr.bf16.mxu0 %v6287_v26  ;;  %4167 = vmatprep.subr.bf16.mxu1 %v6772_v56  ;;  %6979 = vst [vmem:[#allocation37_spill] sm:$0xff] %v6298_v41 }
 0x7f9   :  { %v4512_v21 = vpop.eup %4511 }
 0x7fa   :  { %v2773_v27 = vsub.f32 %v6075_v5, %v4512_v21  ;;  %v4514_v32 = vpop.eup %4513  ;;  %v6307_v5 = vld [vmem:[#allocation5 + $0x8] ss:$12 sps:$4 sm:$0xff]  }
 0x7fb   :  { %2790 = vmatpush1.bf16.msra.mxu0 %v6292_v16  ;;  %4168 = vmatpush3.bf16.msra.mxu1 %v6295_v48 }
 0x7fc   :  { %2791 = vmatprep.subr.bf16.mxu0 %v6298_v41  ;;  %4169 = vmatprep.subr.bf16.mxu1 %v6772_v56  ;;  %v2774_v26 = vmul.f32 %v4514_v32, %v2773_v27 }
 0x7fe   :  { %v6302_v37 = vadd.f32 %v4512_v21, %v2774_v26 }
 0x7ff   :  { %2792 = vmatpush1.bf16.msra.mxu0 %v6304_v40  ;;  %4170 = vmatpush3.bf16.msra.mxu1 %v6307_v5 }
 0x800   :  { %2879 = vmatprep.subr.bf16.mxu0 %v5912_v43  ;;  %4175 = vmatprep.subr.bf16.mxu1 %v6772_v56  ;;  %v2776_v41 = vpack.c.bf16 %v6302_v37, %v6302_v37  ;;  %v6980_v43 = vld [vmem:[#allocation20_spill] sm:$0xff] }
 0x802   :  { %2810 = vmatmul.mubr.bf16.vlgmr.msra.gmra.mxu0 %v2776_v41  ;;  %4172 = vmatmul.mubr.bf16.vlgmr.msra.gmra.mxu1 %v2776_v41 }
 0x803   :  { %2880 = vmatpush1.bf16.msra.mxu0 %v5918_v1  ;;  %4176 = vmatpush3.bf16.msra.mxu1 %v5921_v45  ;;  %v6981_v1 = vld [vmem:[#allocation47_spill] sm:$0xff]  ;;  %v6982_v45 = vld [vmem:[#allocation48_spill] sm:$0xff] }
 0x804   :  { %2881 = vmatprep.subr.bf16.mxu0 %v5924_v50  ;;  %4177 = vmatprep.subr.bf16.mxu1 %v6772_v56  ;;  %v6983_v50 = vld [vmem:[#allocation52_spill] sm:$0xff] }
 0x805   :  { %2911 = vmatprep.mubr.bf16.mxu0 %v6773_v60  ;;  %4191 = vmatprep.mubr.msk.bf16.mxu1 %vm4764_vm1, %v6772_v56 }
 0x807   :  { %2882 = vmatpush1.bf16.msra.mxu0 %v5931_v55  ;;  %4178 = vmatpush3.bf16.msra.mxu1 %v5934_v34  ;;  %v6984_v55 = vld [vmem:[#allocation21_spill] sm:$0xff]  ;;  %v6985_v34 = vld [vmem:[#allocation22_spill] sm:$0xff] }
 0x808   :  { %2883 = vmatprep.subr.bf16.mxu0 %v5937_v44  ;;  %4179 = vmatprep.subr.bf16.mxu1 %v6772_v56  ;;  %v6986_v44 = vld [vmem:[#allocation23_spill] sm:$0xff] }
 0x80b   :  { %2884 = vmatpush1.bf16.msra.mxu0 %v5941_v29  ;;  %4180 = vmatpush3.bf16.msra.mxu1 %v6939_v30  ;;  %v6987_v29 = vld [vmem:[#allocation24_spill] sm:$0xff]  ;;  %v6988_v30 = vld [vmem:[#allocation50_spill] sm:$0xff] }
 0x80c   :  { %2885 = vmatprep.subr.bf16.mxu0 %v6940_v35  ;;  %4181 = vmatprep.subr.bf16.mxu1 %v6772_v56  ;;  %v6989_v35 = vld [vmem:[#allocation51_spill] sm:$0xff] }
 0x80f   :  { %2886 = vmatpush1.bf16.msra.mxu0 %v6941_v7  ;;  %4182 = vmatpush3.bf16.msra.mxu1 %v6942_v54  ;;  %v6990_v7 = vld [vmem:[#allocation58_spill] sm:$0xff]  ;;  %v6991_v54 = vld [vmem:[#allocation32_spill] sm:$0xff] }
 0x810   :  { %2887 = vmatprep.subr.bf16.mxu0 %v6943_v33  ;;  %4183 = vmatprep.subr.bf16.mxu1 %v6772_v56  ;;  %v6992_v33 = vld [vmem:[#allocation33_spill] sm:$0xff] }
 0x813   :  { %2888 = vmatpush1.bf16.msra.mxu0 %v6944_v25  ;;  %4184 = vmatpush3.bf16.msra.mxu1 %v6103_v22  ;;  %v6993_v25 = vld [vmem:[#allocation34_spill] sm:$0xff]  ;;  %v6994_v22 = vld [vmem:[#allocation35_spill] sm:$0xff] }
 0x814   :  { %2889 = vmatprep.subr.bf16.mxu0 %v6945_v38  ;;  %4185 = vmatprep.subr.bf16.mxu1 %v6772_v56  ;;  %v6995_v38 = vld [vmem:[#allocation36_spill] sm:$0xff] }
 0x817   :  { %2890 = vmatpush1.bf16.msra.mxu0 %v6946_v49  ;;  %4186 = vmatpush3.bf16.msra.mxu1 %v6109_v42  ;;  %v6996_v49 = vld [vmem:[#allocation39_spill] sm:$0xff]  ;;  %v6997_v42 = vld [vmem:[#allocation54_spill] sm:$0xff] }
 0x818   :  { %2891 = vmatprep.subr.bf16.mxu0 %v6947_v3  ;;  %4187 = vmatprep.subr.bf16.mxu1 %v6772_v56 }
 0x81b   :  { %2892 = vmatpush1.bf16.msra.mxu0 %v6948_v8  ;;  %4188 = vmatpush3.bf16.msra.mxu1 %v6115_v28 }
 0x81c   :  { %2893 = vmatprep.subr.bf16.mxu0 %v6949_v10  ;;  %4189 = vmatprep.subr.bf16.mxu1 %v6772_v56 }
 0x81f   :  { %2894 = vmatpush1.bf16.msra.mxu0 %v6950_v46  ;;  %4190 = vmatpush3.bf16.msra.mxu1 %v6121_v51 }
 0x820   :  { %2960 = vmatprep.subr.bf16.mxu0 %v6124_v19  ;;  %4195 = vmatprep.subr.bf16.mxu1 %v6772_v56 }
 0x822   :  { %2912 = vmatmul.mubr.bf16.vlgmr.msra.gmra.mxu0 %v2776_v41  ;;  %4192 = vmatmul.mubr.bf16.vlgmr.msra.gmra.mxu1 %v2776_v41 }
 0x823   :  { %2961 = vmatpush1.bf16.msra.mxu0 %v6128_v20  ;;  %4196 = vmatpush3.bf16.msra.mxu1 %v6131_v39 }
 0x824   :  { %2962 = vmatprep.subr.bf16.mxu0 %v6134_v9  ;;  %4197 = vmatprep.subr.bf16.mxu1 %v6772_v56 }
 0x825   :  { %2992 = vmatprep.mubr.bf16.mxu0 %v6773_v60  ;;  %4211 = vmatprep.mubr.msk.bf16.mxu1 %vm4764_vm1, %v6772_v56 }
 0x827   :  { %2963 = vmatpush1.bf16.msra.mxu0 %v6141_v23  ;;  %4198 = vmatpush3.bf16.msra.mxu1 %v6144_v18 }
 0x828   :  { %2964 = vmatprep.subr.bf16.mxu0 %v6147_v24  ;;  %4199 = vmatprep.subr.bf16.mxu1 %v6772_v56 }
 0x82b   :  { %2965 = vmatpush1.bf16.msra.mxu0 %v6980_v43  ;;  %4200 = vmatpush3.bf16.msra.mxu1 %v6981_v1 }
 0x82c   :  { %2966 = vmatprep.subr.bf16.mxu0 %v6982_v45  ;;  %4201 = vmatprep.subr.bf16.mxu1 %v6772_v56 }
 0x82f   :  { %2967 = vmatpush1.bf16.msra.mxu0 %v6983_v50  ;;  %4202 = vmatpush3.bf16.msra.mxu1 %v6984_v55  ;;  %v6998_v50 = vld [vmem:[#allocation10_spill] sm:$0xff] }
 0x830   :  { %2968 = vmatprep.subr.bf16.mxu0 %v6985_v34  ;;  %4203 = vmatprep.subr.bf16.mxu1 %v6772_v56 }
 0x833   :  { %2969 = vmatpush1.bf16.msra.mxu0 %v6986_v44  ;;  %4204 = vmatpush3.bf16.msra.mxu1 %v6987_v29 }
 0x834   :  { %2970 = vmatprep.subr.bf16.mxu0 %v6988_v30  ;;  %4205 = vmatprep.subr.bf16.mxu1 %v6772_v56 }
 0x837   :  { %2971 = vmatpush1.bf16.msra.mxu0 %v6989_v35  ;;  %4206 = vmatpush3.bf16.msra.mxu1 %v6990_v7 }
 0x838   :  { %2972 = vmatprep.subr.bf16.mxu0 %v6991_v54  ;;  %4207 = vmatprep.subr.bf16.mxu1 %v6772_v56 }
 0x83b   :  { %2973 = vmatpush1.bf16.msra.mxu0 %v6992_v33  ;;  %4208 = vmatpush3.bf16.msra.mxu1 %v6993_v25 }
 0x83c   :  { %2974 = vmatprep.subr.bf16.mxu0 %v6994_v22  ;;  %4209 = vmatprep.subr.bf16.mxu1 %v6772_v56 }
 0x83f   :  { %2975 = vmatpush1.bf16.msra.mxu0 %v6995_v38  ;;  %4210 = vmatpush3.bf16.msra.mxu1 %v6996_v49  ;;  %v6999_v38 = vld [vmem:[#allocation13_spill] sm:$0xff] }
 0x840   :  { %3065 = vmatprep.subr.bf16.mxu0 %v6997_v42  ;;  %4215 = vmatprep.subr.bf16.mxu1 %v6772_v56  ;;  %v7000_v42 = vld [vmem:[#allocation61_spill] sm:$0xff] }
 0x8a2   :  { %v2706_v3 = vpop.f32.mrf.mxu0  ;;  %v2747_v8 = vpop.f32.mrf.mxu1 }
 0x8a3   :  { %v2707_v23 = vadd.f32 %v2706_v3, %v5315_v58  ;;  %v2748_v49 = vadd.f32 %v2747_v8, %v6999_v38 }
 0x8a4   :  { %v2708_v28 = vpop.f32.mrf.mxu0  ;;  %v4153_v10 = vpop.f32.mrf.mxu1 }
 0x8a5   :  { %v2709_v55 = vadd.f32 %v2708_v28, %v6998_v50 }
 0x8a6   :  { %v2710_v46 = vpop.f32.mrf.mxu0  ;;  %v2750_v51 = vpop.f32.mrf.mxu1 }
 0x8a8   :  { %v2711_v19 = vpop.f32.mrf.mxu0  ;;  %v4154_v20 = vpop.f32.mrf.mxu1 }
 0x8c2   :  { %v2811_v39 = vpop.f32.mrf.mxu0  ;;  %v2852_v9 = vpop.f32.mrf.mxu1 }
 0x8c3   :  { %v2812_v18 = vadd.f32 %v2811_v39, %v5318_v63  ;;  %v2853_v51 = vadd.f32 %v2852_v9, %v5335_v57 }
 0x8c4   :  { %v2813_v24 = vpop.f32.mrf.mxu0  ;;  %v4173_v41 = vpop.f32.mrf.mxu1 }
 0x8c5   :  { %v2858_v26 = vadd.f32 %v2812_v18, %v2707_v23  ;;  %v2814_v45 = vadd.f32 %v2813_v24, %v5323_v53  ;;  %v7001_v41 = vld [vmem:[#allocation64_spill] sm:$0xff] }
 0x8c6   :  { %v2815_v21 = vpop.f32.mrf.mxu0  ;;  %v2855_v27 = vpop.f32.mrf.mxu1 }
 0x8c7   :  { %v3490_v32 = vmul.f32 -1.442695, %v2858_v26  ;;  %v2859_v34 = vadd.f32 %v2814_v45, %v2709_v55 }
 0x8c8   :  { %v2816_v43 = vpop.f32.mrf.mxu0  ;;  %v4174_v1 = vpop.f32.mrf.mxu1 }
 0x8c9   :  { %4515 = vpow2.f32 %v3490_v32  ;;  %v3491_v44 = vmul.f32 -1.442695, %v2859_v34 }
 0x8cb   :  { %4517 = vpow2.f32 %v3491_v44 }
 0x8d6   :  { %v4516_v29 = vpop.eup %4515 }
 0x8d7   :  { %v2866_v30 = vadd.f32 1.0, %v4516_v29  ;;  %v4380_v29 = vld [vmem:[%s6510_s9 + $0x10] sm:$0xff]  }
 0x8d8   :  { %v4518_v22 = vpop.eup %4517 }
 0x8d9   :  { %4519 = vrcp.f32 %v2866_v30  ;;  %v2867_v24 = vadd.f32 1.0, %v4518_v22  ;;  %v4381_v30 = vld [vmem:[%s6510_s9 + $0x8] sm:$0xff]  }
 0x8e2   :  { %v2913_v35 = vpop.f32.mrf.mxu0  ;;  %v2954_v7 = vpop.f32.mrf.mxu1 }
 0x8e3   :  { %v2914_v54 = vadd.f32 %v2913_v35, %v6786_v2  ;;  %v4382_v35 = vld [vmem:[%s6510_s9] sm:$0xff]  }
 0x8e4   :  { %v2915_v33 = vpop.f32.mrf.mxu0  ;;  %v4193_v25 = vpop.f32.mrf.mxu1 }
 0x8e5   :  { %v3044_v3 = vadd.f32 %v2914_v54, %v7000_v42  ;;  %v2916_v2 = vadd.f32 %v2915_v33, %v5221_v15 }
 0x8e6   :  { %v4520_v10 = vpop.eup %4519  ;;  %v2917_v46 = vpop.f32.mrf.mxu0 }
 0x8e7   :  { %v2957_v28 = vpop.f32.mrf.mxu1  ;;  %v2872_v19 = vmul.f32 %v4520_v10, %v2748_v49  ;;  %v3492_v20 = vmul.f32 -1.442695, %v3044_v3  ;;  %v3045_v8 = vadd.f32 %v2916_v2, %v7001_v41 }
 0x8e8   :  { %v2918_v39 = vpop.f32.mrf.mxu0 }
 0x8e9   :  { %v4194_v23 = vpop.f32.mrf.mxu1  ;;  %v2873_v18 = vadd.f32 %v2872_v19, %v2853_v51  ;;  %4521 = vpow2.f32 %v3492_v20  ;;  %v3493_v26 = vmul.f32 -1.442695, %v3045_v8 }
 0x8eb   :  { %4523 = vtanh.f32 %v2873_v18 }
 0x8ec   :  { %4525 = vrcp.f32 %v2867_v24 }
 0x8ed   :  { %4527 = vpow2.f32 %v3493_v26 }
 0x8f6   :  { %v4522_v21 = vpop.eup %4521 }
 0x8f7   :  { %v3052_v27 = vadd.f32 1.0, %v4522_v21 }
 0x8f8   :  { %v4524_v32 = vpop.eup %4523 }
 0x8f9   :  { %4529 = vrcp.f32 %v3052_v27  ;;  %v2875_v9 = vsub.f32 %v6222_v36, %v4524_v32  ;;  %v4526_v43 = vpop.eup %4525  ;;  %v2955_v36 = vadd.f32 %v2954_v7, %v5226_v62  ;;  %v7003_v62 = vld [vmem:[#allocation25_spill] sm:$0xff] }
 0x8fa   :  { %v4528_v15 = vpop.eup %4527 }
 0x8fb   :  { %v2876_v1 = vmul.f32 %v4526_v43, %v2875_v9  ;;  %v3053_v44 = vadd.f32 1.0, %v4528_v15 }
 0x8fd   :  { %v6395_v45 = vadd.f32 %v4524_v32, %v2876_v1 }
 0x8ff   :  { %v2878_v55 = vpack.c.bf16 %v6395_v45, %v6395_v45 }
 0x901   :  { %2993 = vmatmul.mubr.bf16.vlgmr.msra.gmra.mxu0 %v2878_v55  ;;  %4212 = vmatmul.mubr.bf16.vlgmr.msra.gmra.mxu1 %v2878_v55 }
 0x902   :  { %3066 = vmatpush1.bf16.msra.mxu0 %v6226_v61  ;;  %4216 = vmatpush3.bf16.msra.mxu1 %v6229_v47  ;;  %v7002_v47 = vld [vmem:[#allocation60_spill] sm:$0xff] }
 0x903   :  { %3067 = vmatprep.subr.bf16.mxu0 %v6232_v52  ;;  %4217 = vmatprep.subr.bf16.mxu1 %v6772_v56 }
 0x904   :  { %3097 = vmatprep.mubr.bf16.mxu0 %v6773_v60  ;;  %4231 = vmatprep.mubr.msk.bf16.mxu1 %vm4764_vm1, %v6772_v56  ;;  %v7004_v60 = vld [vmem:[#allocation26_spill] sm:$0xff] }
 0x906   :  { %v4530_v34 = vpop.eup %4529  ;;  %3068 = vmatpush1.bf16.msra.mxu0 %v6240_v12  ;;  %4218 = vmatpush3.bf16.msra.mxu1 %v6243_v13  ;;  %v7005_v12 = vld [vmem:[#allocation27_spill] sm:$0xff]  ;;  %v7006_v13 = vld [vmem:[#allocation28_spill] sm:$0xff] }
 0x907   :  { %v3058_v61 = vmul.f32 %v4530_v34, %v2955_v36  ;;  %3069 = vmatprep.subr.bf16.mxu0 %v6246_v31  ;;  %4219 = vmatprep.subr.bf16.mxu1 %v6772_v56  ;;  %v7007_v31 = vld [vmem:[#allocation29_spill] sm:$0xff] }
 0x909   :  { %v3059_v52 = vadd.f32 %v3058_v61, %v7002_v47 }
 0x90a   :  { %3070 = vmatpush1.bf16.msra.mxu0 %v6251_v14  ;;  %4220 = vmatpush3.bf16.msra.mxu1 %v6254_v4 }
 0x90b   :  { %4531 = vtanh.f32 %v3059_v52  ;;  %3071 = vmatprep.subr.bf16.mxu0 %v6257_v11  ;;  %4221 = vmatprep.subr.bf16.mxu1 %v6772_v56 }
 0x90c   :  { %4533 = vrcp.f32 %v3053_v44 }
 0x90e   :  { %3072 = vmatpush1.bf16.msra.mxu0 %v6261_v6  ;;  %4222 = vmatpush3.bf16.msra.mxu1 %v6264_v0  ;;  %v7008_v6 = vld [vmem:[#allocation37_spill] sm:$0xff] }
 0x90f   :  { %3073 = vmatprep.subr.bf16.mxu0 %v6267_v59  ;;  %4223 = vmatprep.subr.bf16.mxu1 %v6772_v56 }
 0x912   :  { %3074 = vmatpush1.bf16.msra.mxu0 %v6271_v17  ;;  %4224 = vmatpush3.bf16.msra.mxu1 %v7003_v62 }
 0x913   :  { %3075 = vmatprep.subr.bf16.mxu0 %v7004_v60  ;;  %4225 = vmatprep.subr.bf16.mxu1 %v6772_v56 }
 0x916   :  { %3076 = vmatpush1.bf16.msra.mxu0 %v7005_v12  ;;  %4226 = vmatpush3.bf16.msra.mxu1 %v7006_v13 }
 0x917   :  { %3077 = vmatprep.subr.bf16.mxu0 %v7007_v31  ;;  %4227 = vmatprep.subr.bf16.mxu1 %v6772_v56 }
 0x918   :  { %v4532_v14 = vpop.eup %4531 }
 0x919   :  { %v3061_v4 = vsub.f32 %v6302_v37, %v4532_v14  ;;  %v4534_v11 = vpop.eup %4533  ;;  %v4377_v37 = vld [vmem:[%s6510_s9 + $0x28] sm:$0xff]  }
 0x91a   :  { %3078 = vmatpush1.bf16.msra.mxu0 %v6292_v16  ;;  %4228 = vmatpush3.bf16.msra.mxu1 %v6295_v48  ;;  %v4375_v48 = vld [vmem:[%s6510_s9 + $0x38] sm:$0xff]   ;;  %v4378_v16 = vld [vmem:[%s6510_s9 + $0x20] sm:$0xff]  }
 0x91b   :  { %3079 = vmatprep.subr.bf16.mxu0 %v7008_v6  ;;  %4229 = vmatprep.subr.bf16.mxu1 %v6772_v56  ;;  %v3062_v0 = vmul.f32 %v4534_v11, %v3061_v4  ;;  %v3506_v11 = vld [vmem:[%s6512_s11] ss:$0 sm:$0xff] }
 0x91d   :  { %v3063_v59 = vadd.f32 %v4532_v14, %v3062_v0  ;;  %v3507_v0 = vld [vmem:[%s6513_s12] ss:$0 sm:$0xff] }
 0x91e   :  { %3080 = vmatpush1.bf16.msra.mxu0 %v6304_v40  ;;  %4230 = vmatpush3.bf16.msra.mxu1 %v6307_v5  ;;  %v4376_v40 = vld [vmem:[%s6510_s9 + $0x30] sm:$0xff]   ;;  %v4379_v5 = vld [vmem:[%s6510_s9 + $0x18] sm:$0xff]  }
 0x91f   :  { %v3064_v17 = vpack.c.bf16 %v3063_v59, %v3063_v59  ;;  %4235 = vmatprep.subr.bf16.mxu0 %v6772_v56  ;;  %4255 = vmatprep.subr.bf16.mxu1 %v6772_v56 }
 0x921   :  { %3098 = vmatmul.mubr.bf16.vlgmr.msra.gmra.mxu0 %v3064_v17  ;;  %4232 = vmatmul.mubr.bf16.vlgmr.msra.gmra.mxu1 %v3064_v17 }
 0x922   :  { %4251 = vmatprep.mubr.msk.bf16.mxu0 %vm4764_vm1, %v6772_v56  ;;  %4259 = vmatprep.mubr.msk.bf16.mxu1 %vm4764_vm1, %v6772_v56 }
 0x923   :  { %4236 = vmatpush3.bf16.msra.mxu0 %v4375_v48 }
 0x924   :  { %4237 = vmatprep.subr.bf16.mxu0 %v6772_v56 }
 0x927   :  { %4238 = vmatpush3.bf16.msra.mxu0 %v4376_v40  ;;  %v3508_v40 = vld [vmem:[%s6515_s14] ss:$0 sm:$0xff] }
 0x928   :  { %4239 = vmatprep.subr.bf16.mxu0 %v6772_v56 }
 0x92b   :  { %4240 = vmatpush3.bf16.msra.mxu0 %v4377_v37 }
 0x92c   :  { %4241 = vmatprep.subr.bf16.mxu0 %v6772_v56 }
 0x92f   :  { %4242 = vmatpush3.bf16.msra.mxu0 %v4378_v16 }
 0x930   :  { %4243 = vmatprep.subr.bf16.mxu0 %v6772_v56 }
 0x933   :  { %4244 = vmatpush3.bf16.msra.mxu0 %v4379_v5 }
 0x934   :  { %4245 = vmatprep.subr.bf16.mxu0 %v6772_v56 }
 0x937   :  { %4246 = vmatpush3.bf16.msra.mxu0 %v4380_v29 }
 0x938   :  { %4247 = vmatprep.subr.bf16.mxu0 %v6772_v56 }
 0x93b   :  { %4248 = vmatpush3.bf16.msra.mxu0 %v4381_v30 }
 0x93c   :  { %4249 = vmatprep.subr.bf16.mxu0 %v6772_v56 }
 0x93f   :  { %4250 = vmatpush3.bf16.msra.mxu0 %v4382_v35 }
 0x9c1   :  { %v2994_v7 = vpop.f32.mrf.mxu0  ;;  %v3035_v54 = vpop.f32.mrf.mxu1 }
 0x9c2   :  { %v2995_v28 = vadd.f32 %v2994_v7, %v5315_v58 }
 0x9c3   :  { %v2996_v33 = vpop.f32.mrf.mxu0  ;;  %v4213_v25 = vpop.f32.mrf.mxu1 }
 0x9c4   :  { %v2997_v26 = vadd.f32 %v2996_v33, %v6998_v50 }
 0x9c5   :  { %v2998_v22 = vpop.f32.mrf.mxu0  ;;  %v3038_v49 = vpop.f32.mrf.mxu1 }
 0x9c7   :  { %v2999_v42 = vpop.f32.mrf.mxu0  ;;  %v4214_v3 = vpop.f32.mrf.mxu1 }
 0x9e1   :  { %v3099_v10 = vpop.f32.mrf.mxu0  ;;  %v3140_v46 = vpop.f32.mrf.mxu1 }
 0x9e2   :  { %v3100_v51 = vadd.f32 %v3099_v10, %v5318_v63  ;;  %v3036_v63 = vadd.f32 %v3035_v54, %v6999_v38  ;;  %v3141_v1 = vadd.f32 %v3140_v46, %v5335_v57  ;;  %v4383_v38 = vld [vmem:[%s6514_s13 + $0x8] sm:$0xff]   ;;  %v4384_v57 = vld [vmem:[%s6514_s13] sm:$0xff]  }
 0x9e3   :  { %v3101_v19 = vpop.f32.mrf.mxu0  ;;  %v4233_v20 = vpop.f32.mrf.mxu1  ;;  %4256 = vmatpush3.bf16.msra.mxu1 %v4383_v38 }
 0x9e4   :  { %v3146_v39 = vadd.f32 %v3100_v51, %v2995_v28  ;;  %v3102_v8 = vadd.f32 %v3101_v19, %v5323_v53  ;;  %4257 = vmatprep.subr.bf16.mxu1 %v6772_v56 }
 0x9e5   :  { %v3103_v23 = vpop.f32.mrf.mxu0  ;;  %v3143_v18 = vpop.f32.mrf.mxu1 }
 0x9e6   :  { %v3494_v24 = vmul.f32 -1.442695, %v3146_v39  ;;  %v3147_v21 = vadd.f32 %v3102_v8, %v2997_v26 }
 0x9e7   :  { %v3104_v2 = vpop.f32.mrf.mxu0  ;;  %v4234_v41 = vpop.f32.mrf.mxu1  ;;  %4258 = vmatpush3.bf16.msra.mxu1 %v4384_v57 }
 0x9e8   :  { %4535 = vpow2.f32 %v3494_v24  ;;  %v3495_v27 = vmul.f32 -1.442695, %v3147_v21 }
 0x9ea   :  { %4537 = vpow2.f32 %v3495_v27 }
 0x9f5   :  { %v4536_v32 = vpop.eup %4535 }
 0x9f6   :  { %v3154_v9 = vadd.f32 1.0, %v4536_v32 }
 0x9f7   :  { %v4538_v58 = vpop.eup %4537 }
 0x9f8   :  { %4539 = vrcp.f32 %v3154_v9  ;;  %v3155_v36 = vadd.f32 1.0, %v4538_v58 }
 0xa05   :  { %v4540_v43 = vpop.eup %4539 }
 0xa06   :  { %v3160_v55 = vmul.f32 %v4540_v43, %v3036_v63 }
 0xa08   :  { %v3161_v15 = vadd.f32 %v3160_v55, %v3141_v1 }
 0xa0a   :  { %4541 = vtanh.f32 %v3161_v15 }
 0xa0b   :  { %4543 = vrcp.f32 %v3155_v36 }
 0xa17   :  { %v4542_v53 = vpop.eup %4541 }
 0xa18   :  { %v3163_v50 = vsub.f32 %v6395_v45, %v4542_v53  ;;  %v4544_v34 = vpop.eup %4543  ;;  %v3496_v45 = vld [vmem:[%s6511_s10] ss:$0 sm:$0xff] }
 0xa1a   :  { %v3164_v61 = vmul.f32 %v4544_v34, %v3163_v50 }
 0xa1c   :  { %v3165_v47 = vadd.f32 %v4542_v53, %v3164_v61 }
 0xa1e   :  { %v3166_v52 = vpack.c.bf16 %v3165_v47, %v3165_v47 }
 0xa20   :  { %4252 = vmatmul.mubr.bf16.vlgmr.msra.gmra.mxu0 %v3166_v52 }
 0xae0   :  { %v3272_v44 = vpop.f32.mrf.mxu0 }
 0xae1   :  { %v3273_v62 = vadd.f32 %v3496_v45, %v3272_v44 }
 0xae2   :  { %v4253_v60 = vpop.f32.mrf.mxu0 }
 0xae3   :  { %v3505_v12 = vmul.f32 -1.442695, %v3273_v62 }
 0xae4   :  { %v3275_v13 = vpop.f32.mrf.mxu0 }
 0xae5   :  { %4545 = vpow2.f32 %v3505_v12 }
 0xae6   :  { %v4254_v31 = vpop.f32.mrf.mxu0 }
 0xaf2   :  { %v4546_v14 = vpop.eup %4545 }
 0xaf3   :  { %v3281_v4 = vadd.f32 1.0, %v4546_v14 }
 0xaf5   :  { %4547 = vrcp.f32 %v3281_v4 }
 0xb02   :  { %v4548_v56 = vpop.eup %4547 }
 0xb03   :  { %v3284_v6 = vmul.f32 %v4548_v56, %v3273_v62 }
 0xb05   :  { %v3292_v59 = vmul.f32 %v3506_v11, %v3284_v6 }
 0xb07   :  { %v3300_v17 = vadd.f32 %v3507_v0, %v3292_v59 }
 0xb09   :  { %v3301_v48 = vpack.c.bf16 %v3300_v17, %v3300_v17 }
 0xb0b   :  { %4260 = vmatmul.mubr.msk.bf16.vlgmr.msra.gmra.mxu1 %vm3325_vm2, %v3301_v48 }
 0xbcb   :  { %v3363_v37 = vpop.f32.mrf.mxu1 }
 0xbcc   :  { %v3364_v16 = vadd.f32 %v3508_v40, %v3363_v37 }
 0xbcd   :  { %v4261_v5 = vpop.f32.mrf.mxu1 }
 0xbce   :  { %3370 = vst.msk [vmem:[%s6516_s15] sm:$0xff] %vm3369_vm3, %v3364_v16 }
 0xbcf   :  { %v3366_v29 = vpop.f32.mrf.mxu1 }
 0xbd1   :  { %v4262_v30 = vpop.f32.mrf.mxu1 }
 0xbd2   :  { %3375 = vsyncpa [#allocation4], 1 }
 0xbd3   :  { %3376 = vsyncpa [#allocation6], 1 }

</bundles_post_ra>
